<compile_context>
chip_gen: v6e
topology: v6e:2x2x1
jax: 0.10.0
libtpu: 0.0.40
codegen_flags: <defaults>
</compile_context>

<pallas_src>
import functools

import jax
import jax.numpy as jnp
from jax import lax
from jax.experimental import pallas as pl
from jax.experimental.pallas import tpu as pltpu

EPS = 1e-5  # PyTorch BatchNorm2d default eps


# ----------------------------------------------------------------------------
# Fused Block kernel (one image per grid step)
# ----------------------------------------------------------------------------
def _block_kernel(x_ref, dw1_ref, pw1_ref, b1_ref, dw2_ref, pw2_ref, b2_ref,
                  wsk_ref, bsk_ref, out_ref, pad_in_ref, pad_out_ref,
                  *, H, W, Ho, Wo):
    Cin = x_ref.shape[-1]
    Cout = out_ref.shape[-1]

    # ---- SepConv1: ReLU -> depthwise 3x3 (pad 1) -> pointwise (+ BN1 bias) ---
    # zero-padded relu(x) built in VMEM scratch (never materialized in HBM)
    pad_in_ref[...] = jnp.zeros_like(pad_in_ref)
    pad_in_ref[1:H + 1, 1:W + 1, :] = jnp.maximum(x_ref[...], 0.0)
    xp = pad_in_ref[...]                                   # (H+2, W+2, Cin)
    dw1 = dw1_ref[...]                                     # (3, 3, Cin)
    acc = jnp.zeros((H, W, Cin), jnp.float32)
    for dh in range(3):
        for dwi in range(3):
            acc = acc + xp[dh:dh + H, dwi:dwi + W, :] * dw1[dh, dwi, :]
    # BN1 scale already folded into pw1; only the bias is added here.
    h1 = jnp.dot(acc.reshape(H * W, Cin), pw1_ref[...],
                 preferred_element_type=jnp.float32) + b1_ref[0]
    h1 = h1.reshape(H, W, Cout)

    # ---- SepConv2: ReLU -> depthwise 3x3 (pad 1) -> pointwise (+ BN2 bias) ---
    pad_out_ref[...] = jnp.zeros_like(pad_out_ref)
    pad_out_ref[1:H + 1, 1:W + 1, :] = jnp.maximum(h1, 0.0)
    hp = pad_out_ref[...]                                  # (H+2, W+2, Cout)
    dw2 = dw2_ref[...]                                     # (3, 3, Cout)
    acc2 = jnp.zeros((H, W, Cout), jnp.float32)
    for dh in range(3):
        for dwi in range(3):
            acc2 = acc2 + hp[dh:dh + H, dwi:dwi + W, :] * dw2[dh, dwi, :]
    h2 = jnp.dot(acc2.reshape(H * W, Cout), pw2_ref[...],
                 preferred_element_type=jnp.float32) + b2_ref[0]
    h2 = h2.reshape(H, W, Cout)

    # ---- MaxPool 3x3, stride 2, pad 1 -- computed directly at the strided ----
    # output positions (scratch buffer reused as the -inf padded pool input).
    pad_out_ref[...] = jnp.full((H + 2, W + 2, Cout), -jnp.inf, jnp.float32)
    pad_out_ref[1:H + 1, 1:W + 1, :] = h2
    # horizontal max over padded cols {2j, 2j+1, 2j+2} via sublane-strided loads
    hm = jnp.maximum(
        jnp.maximum(pad_out_ref[:, pl.ds(0, Wo, 2), :],
                    pad_out_ref[:, pl.ds(1, Wo, 2), :]),
        pad_out_ref[:, pl.ds(2, Wo, 2), :])                # (H+2, Wo, Cout)
    # vertical max over padded rows {2i, 2i+1, 2i+2} via outer-dim reshape trick
    a = hm[0:2 * Ho].reshape(Ho, 2, Wo, Cout)
    b = hm[2:2 * Ho + 2].reshape(Ho, 2, Wo, Cout)
    pooled = jnp.maximum(jnp.maximum(a[:, 0], a[:, 1]), b[:, 0])  # (Ho,Wo,Cout)

    # ---- Skip: 1x1 stride-2 conv (+ folded BN) + residual add ---------------
    # strided read of the raw (pre-ReLU) input straight from the VMEM block
    xs = x_ref[:, pl.ds(0, Wo, 2), :]                      # (H, Wo, Cin)
    xs = xs[0:2 * Ho].reshape(Ho, 2, Wo, Cin)[:, 0]        # (Ho, Wo, Cin)
    skip = jnp.dot(xs.reshape(Ho * Wo, Cin), wsk_ref[...],
                   preferred_element_type=jnp.float32) + bsk_ref[0]

    out_ref[...] = pooled + skip.reshape(Ho, Wo, Cout)


# ----------------------------------------------------------------------------
# Wrappers
# ----------------------------------------------------------------------------
def fold_bn(gamma, beta, mean, var):
    scale = gamma / jnp.sqrt(var + EPS)
    return scale, beta - mean * scale


def block_forward(x_nchw, p, strides):
    """Block(Cin, Cout, reps=2, strides=2, start_with_relu=True, grow_first=True)."""
    assert strides == 2, "fused kernel implements the strides=2 configuration"
    x = jnp.transpose(x_nchw, (0, 2, 3, 1)).astype(jnp.float32)   # NCHW -> NHWC
    N, H, W, Cin = x.shape
    Cout = p['pw1'].shape[1]
    Ho, Wo = H // strides, W // strides

    s1, b1 = fold_bn(*p['bn1'])
    s2, b2 = fold_bn(*p['bn2'])
    ss, bs = fold_bn(*p['bnskip'])
    # Fold BN scale into the pointwise / skip weights (done once, off the hot path).
    pw1 = p['pw1'] * s1[None, :]
    pw2 = p['pw2'] * s2[None, :]
    wsk = p['wskip'] * ss[None, :]

    kern = functools.partial(_block_kernel, H=H, W=W, Ho=Ho, Wo=Wo)
    out = pl.pallas_call(
        kern,
        out_shape=jax.ShapeDtypeStruct((N, Ho, Wo, Cout), jnp.float32),
        grid=(N,),
        in_specs=[
            pl.BlockSpec((None, H, W, Cin), lambda n: (n, 0, 0, 0)),   # x
            pl.BlockSpec((3, 3, Cin), lambda n: (0, 0, 0)),            # dw1
            pl.BlockSpec((Cin, Cout), lambda n: (0, 0)),               # pw1 (BN folded)
            pl.BlockSpec((1, Cout), lambda n: (0, 0)),                 # bias1
            pl.BlockSpec((3, 3, Cout), lambda n: (0, 0, 0)),           # dw2
            pl.BlockSpec((Cout, Cout), lambda n: (0, 0)),              # pw2 (BN folded)
            pl.BlockSpec((1, Cout), lambda n: (0, 0)),                 # bias2
            pl.BlockSpec((Cin, Cout), lambda n: (0, 0)),               # wskip (BN folded)
            pl.BlockSpec((1, Cout), lambda n: (0, 0)),                 # bias skip
        ],
        out_specs=pl.BlockSpec((None, Ho, Wo, Cout), lambda n: (n, 0, 0, 0)),
        scratch_shapes=[
            pltpu.VMEM((H + 2, W + 2, Cin), jnp.float32),   # zero-padded relu(x)
            pltpu.VMEM((H + 2, W + 2, Cout), jnp.float32),  # padded h1 / pool buffer
        ],
        compiler_params=pltpu.CompilerParams(
            dimension_semantics=("parallel",),
            vmem_limit_bytes=32 * 1024 * 1024),
    )(x, p['dw1'], pw1, b1.reshape(1, -1), p['dw2'], pw2, b2.reshape(1, -1),
      wsk, bs.reshape(1, -1))
    return jnp.transpose(out, (0, 3, 1, 2))                       # NHWC -> NCHW


# ----------------------------------------------------------------------------
# Pure-JAX reference
# ----------------------------------------------------------------------------
def block_reference(x_nchw, p, strides):
    x = jnp.transpose(x_nchw, (0, 2, 3, 1)).astype(jnp.float32)
    dn = ('NHWC', 'HWIO', 'NHWC')

    def bn(y, g, b, m, v):
        return (y - m) / jnp.sqrt(v + EPS) * g + b

    def sepconv(y, dw, pw):
        cin = y.shape[-1]
        y = lax.conv_general_dilated(y, dw.reshape(3, 3, 1, cin), (1, 1),
                                     [(1, 1), (1, 1)], dimension_numbers=dn,
                                     feature_group_count=cin)
        return lax.conv_general_dilated(y, pw[None, None], (1, 1),
                                        [(0, 0), (0, 0)], dimension_numbers=dn)

    h = jnp.maximum(x, 0.0)
    h = bn(sepconv(h, p['dw1'], p['pw1']), *p['bn1'])
    h = jnp.maximum(h, 0.0)
    h = bn(sepconv(h, p['dw2'], p['pw2']), *p['bn2'])
    h = lax.reduce_window(h, -jnp.inf, lax.max, (1, 3, 3, 1),
                          (1, strides, strides, 1),
                          [(0, 0), (1, 1), (1, 1), (0, 0)])
    skip = lax.conv_general_dilated(x, p['wskip'][None, None],
                                    (strides, strides), [(0, 0), (0, 0)],
                                    dimension_numbers=dn)
    skip = bn(skip, *p['bnskip'])
    return jnp.transpose(h + skip, (0, 3, 1, 2))


if __name__ == "__main__":
    N, Cin, H, W = 2, 4, 16, 16
    Cout = 8
    strides = 2

    key = jax.random.PRNGKey(0)
    ks = jax.random.split(key, 20)
    x = jax.random.normal(ks[0], (N, Cin, H, W), jnp.float32)

    def rn(k, shape, scale=0.2):
        return scale * jax.random.normal(k, shape, jnp.float32)

    params = dict(
        dw1=rn(ks[1], (3, 3, Cin)),            # depthwise weight of SepConv1
        pw1=rn(ks[2], (Cin, Cout)),            # pointwise weight of SepConv1
        bn1=(1.0 + rn(ks[3], (Cout,)), rn(ks[4], (Cout,)), rn(ks[5], (Cout,)),
             jax.random.uniform(ks[6], (Cout,), minval=0.5, maxval=1.5)),
        dw2=rn(ks[7], (3, 3, Cout)),
        pw2=rn(ks[8], (Cout, Cout)),
        bn2=(1.0 + rn(ks[9], (Cout,)), rn(ks[10], (Cout,)), rn(ks[11], (Cout,)),
             jax.random.uniform(ks[12], (Cout,), minval=0.5, maxval=1.5)),
        wskip=rn(ks[13], (Cin, Cout)),         # 1x1 stride-2 skip conv
        bnskip=(1.0 + rn(ks[14], (Cout,)), rn(ks[15], (Cout,)), rn(ks[16], (Cout,)),
                jax.random.uniform(ks[17], (Cout,), minval=0.5, maxval=1.5)),
    )

    out = jax.block_until_ready(block_forward(x, params, strides))
    ref = jax.block_until_ready(block_reference(x, params, strides))

    assert out.shape == (N, Cout, H // strides, W // strides), out.shape
    assert jnp.allclose(out, ref, atol=1e-4, rtol=1e-4), \
        float(jnp.max(jnp.abs(out - ref)))
    print("KERNEL_OK")
</pallas_src>

<mosaic_0001>
module attributes {stable_mosaic.version = 11 : i64} {
  func.func @_block_kernel(%arg0: i32, %arg1: memref<1x16x16x4xf32, #tpu.memory_space<vmem>>, %arg2: memref<3x3x4xf32, #tpu.memory_space<vmem>>, %arg3: memref<4x8xf32, #tpu.memory_space<vmem>>, %arg4: memref<1x8xf32, #tpu.memory_space<vmem>>, %arg5: memref<3x3x8xf32, #tpu.memory_space<vmem>>, %arg6: memref<8x8xf32, #tpu.memory_space<vmem>>, %arg7: memref<1x8xf32, #tpu.memory_space<vmem>>, %arg8: memref<4x8xf32, #tpu.memory_space<vmem>>, %arg9: memref<1x8xf32, #tpu.memory_space<vmem>>, %arg10: memref<1x8x8x8xf32, #tpu.memory_space<vmem>>, %arg11: memref<18x18x4xf32, #tpu.memory_space<vmem>>, %arg12: memref<18x18x8xf32, #tpu.memory_space<vmem>>) attributes {dimension_semantics = [#tpu.dimension_semantics<parallel>], iteration_bounds = array<i64: 2>, scalar_prefetch = 0 : i64, scratch_operands = 2 : i64, tpu.core_type = #tpu.core_type<tc>, window_params = [{transform_indices = @transform_0, window_bounds = array<i64: 1, 16, 16, 4>}, {pipeline_mode = #tpu.pipeline_mode<synchronous>, transform_indices = @transform_1, window_bounds = array<i64: 3, 3, 4>}, {pipeline_mode = #tpu.pipeline_mode<synchronous>, transform_indices = @transform_2, window_bounds = array<i64: 4, 8>}, {pipeline_mode = #tpu.pipeline_mode<synchronous>, transform_indices = @transform_3, window_bounds = array<i64: 1, 8>}, {pipeline_mode = #tpu.pipeline_mode<synchronous>, transform_indices = @transform_4, window_bounds = array<i64: 3, 3, 8>}, {pipeline_mode = #tpu.pipeline_mode<synchronous>, transform_indices = @transform_5, window_bounds = array<i64: 8, 8>}, {pipeline_mode = #tpu.pipeline_mode<synchronous>, transform_indices = @transform_6, window_bounds = array<i64: 1, 8>}, {pipeline_mode = #tpu.pipeline_mode<synchronous>, transform_indices = @transform_7, window_bounds = array<i64: 4, 8>}, {pipeline_mode = #tpu.pipeline_mode<synchronous>, transform_indices = @transform_8, window_bounds = array<i64: 1, 8>}, {transform_indices = @transform_9, window_bounds = array<i64: 1, 8, 8, 8>}]} {
    %cst = arith.constant 0.000000e+00 : f32
    %0 = vector.broadcast %cst : f32 to vector<18x18x4xf32>
    %c0 = arith.constant 0 : index
    %c0_0 = arith.constant 0 : index
    %c0_1 = arith.constant 0 : index
    %1 = vector.load %arg11[%c0, %c0_0, %c0_1] : memref<18x18x4xf32, #tpu.memory_space<vmem>>, vector<18x18x4xf32>
    tpu.vector_store %arg11[%c0, %c0_0, %c0_1], %0 {strides = array<i32>} : memref<18x18x4xf32, #tpu.memory_space<vmem>>, vector<18x18x4xf32>,
    %c0_2 = arith.constant 0 : index
    %c0_3 = arith.constant 0 : index
    %c0_4 = arith.constant 0 : index
    %c0_5 = arith.constant 0 : index
    %2 = vector.load %arg1[%c0_2, %c0_3, %c0_4, %c0_5] : memref<1x16x16x4xf32, #tpu.memory_space<vmem>>, vector<1x16x16x4xf32>
    %3 = vector.shape_cast %2 : vector<1x16x16x4xf32> to vector<16x16x4xf32>
    %cst_6 = arith.constant 0.000000e+00 : f32
    %4 = vector.broadcast %cst_6 : f32 to vector<16x16x4xf32>
    %5 = arith.maximumf %3, %4 : vector<16x16x4xf32>
    %c1 = arith.constant 1 : index
    %c1_7 = arith.constant 1 : index
    %c0_8 = arith.constant 0 : index
    %6 = vector.load %arg11[%c1, %c1_7, %c0_8] : memref<18x18x4xf32, #tpu.memory_space<vmem>>, vector<16x16x4xf32>
    tpu.vector_store %arg11[%c1, %c1_7, %c0_8], %5 {strides = array<i32>} : memref<18x18x4xf32, #tpu.memory_space<vmem>>, vector<16x16x4xf32>,
    %c0_9 = arith.constant 0 : index
    %c0_10 = arith.constant 0 : index
    %c0_11 = arith.constant 0 : index
    %7 = vector.load %arg11[%c0_9, %c0_10, %c0_11] : memref<18x18x4xf32, #tpu.memory_space<vmem>>, vector<18x18x4xf32>
    %c0_12 = arith.constant 0 : index
    %c0_13 = arith.constant 0 : index
    %c0_14 = arith.constant 0 : index
    %8 = vector.load %arg2[%c0_12, %c0_13, %c0_14] : memref<3x3x4xf32, #tpu.memory_space<vmem>>, vector<3x3x4xf32>
    %cst_15 = arith.constant 0.000000e+00 : f32
    %9 = vector.broadcast %cst_15 : f32 to vector<16x16x4xf32>
    %10 = vector.extract_strided_slice %7 {offsets = [0, 0, 0], sizes = [16, 16, 4], strides = [1, 1, 1]} : vector<18x18x4xf32> to vector<16x16x4xf32>
    %11 = vector.extract_strided_slice %8 {offsets = [0, 0, 0], sizes = [1, 1, 4], strides = [1, 1, 1]} : vector<3x3x4xf32> to vector<1x1x4xf32>
    %12 = vector.shape_cast %11 : vector<1x1x4xf32> to vector<4xf32>
    %13 = vector.shape_cast %12 : vector<4xf32> to vector<1x1x4xf32>
    %14 = vector.broadcast %13 : vector<1x1x4xf32> to vector<16x16x4xf32>
    %15 = arith.mulf %10, %14 : vector<16x16x4xf32>
    %16 = arith.addf %9, %15 : vector<16x16x4xf32>
    %17 = vector.extract_strided_slice %7 {offsets = [0, 1, 0], sizes = [16, 16, 4], strides = [1, 1, 1]} : vector<18x18x4xf32> to vector<16x16x4xf32>
    %18 = vector.extract_strided_slice %8 {offsets = [0, 1, 0], sizes = [1, 1, 4], strides = [1, 1, 1]} : vector<3x3x4xf32> to vector<1x1x4xf32>
    %19 = vector.shape_cast %18 : vector<1x1x4xf32> to vector<4xf32>
    %20 = vector.shape_cast %19 : vector<4xf32> to vector<1x1x4xf32>
    %21 = vector.broadcast %20 : vector<1x1x4xf32> to vector<16x16x4xf32>
    %22 = arith.mulf %17, %21 : vector<16x16x4xf32>
    %23 = arith.addf %16, %22 : vector<16x16x4xf32>
    %24 = vector.extract_strided_slice %7 {offsets = [0, 2, 0], sizes = [16, 16, 4], strides = [1, 1, 1]} : vector<18x18x4xf32> to vector<16x16x4xf32>
    %25 = vector.extract_strided_slice %8 {offsets = [0, 2, 0], sizes = [1, 1, 4], strides = [1, 1, 1]} : vector<3x3x4xf32> to vector<1x1x4xf32>
    %26 = vector.shape_cast %25 : vector<1x1x4xf32> to vector<4xf32>
    %27 = vector.shape_cast %26 : vector<4xf32> to vector<1x1x4xf32>
    %28 = vector.broadcast %27 : vector<1x1x4xf32> to vector<16x16x4xf32>
    %29 = arith.mulf %24, %28 : vector<16x16x4xf32>
    %30 = arith.addf %23, %29 : vector<16x16x4xf32>
    %31 = vector.extract_strided_slice %7 {offsets = [1, 0, 0], sizes = [16, 16, 4], strides = [1, 1, 1]} : vector<18x18x4xf32> to vector<16x16x4xf32>
    %32 = vector.extract_strided_slice %8 {offsets = [1, 0, 0], sizes = [1, 1, 4], strides = [1, 1, 1]} : vector<3x3x4xf32> to vector<1x1x4xf32>
    %33 = vector.shape_cast %32 : vector<1x1x4xf32> to vector<4xf32>
    %34 = vector.shape_cast %33 : vector<4xf32> to vector<1x1x4xf32>
    %35 = vector.broadcast %34 : vector<1x1x4xf32> to vector<16x16x4xf32>
    %36 = arith.mulf %31, %35 : vector<16x16x4xf32>
    %37 = arith.addf %30, %36 : vector<16x16x4xf32>
    %38 = vector.extract_strided_slice %7 {offsets = [1, 1, 0], sizes = [16, 16, 4], strides = [1, 1, 1]} : vector<18x18x4xf32> to vector<16x16x4xf32>
    %39 = vector.extract_strided_slice %8 {offsets = [1, 1, 0], sizes = [1, 1, 4], strides = [1, 1, 1]} : vector<3x3x4xf32> to vector<1x1x4xf32>
    %40 = vector.shape_cast %39 : vector<1x1x4xf32> to vector<4xf32>
    %41 = vector.shape_cast %40 : vector<4xf32> to vector<1x1x4xf32>
    %42 = vector.broadcast %41 : vector<1x1x4xf32> to vector<16x16x4xf32>
    %43 = arith.mulf %38, %42 : vector<16x16x4xf32>
    %44 = arith.addf %37, %43 : vector<16x16x4xf32>
    %45 = vector.extract_strided_slice %7 {offsets = [1, 2, 0], sizes = [16, 16, 4], strides = [1, 1, 1]} : vector<18x18x4xf32> to vector<16x16x4xf32>
    %46 = vector.extract_strided_slice %8 {offsets = [1, 2, 0], sizes = [1, 1, 4], strides = [1, 1, 1]} : vector<3x3x4xf32> to vector<1x1x4xf32>
    %47 = vector.shape_cast %46 : vector<1x1x4xf32> to vector<4xf32>
    %48 = vector.shape_cast %47 : vector<4xf32> to vector<1x1x4xf32>
    %49 = vector.broadcast %48 : vector<1x1x4xf32> to vector<16x16x4xf32>
    %50 = arith.mulf %45, %49 : vector<16x16x4xf32>
    %51 = arith.addf %44, %50 : vector<16x16x4xf32>
    %52 = vector.extract_strided_slice %7 {offsets = [2, 0, 0], sizes = [16, 16, 4], strides = [1, 1, 1]} : vector<18x18x4xf32> to vector<16x16x4xf32>
    %53 = vector.extract_strided_slice %8 {offsets = [2, 0, 0], sizes = [1, 1, 4], strides = [1, 1, 1]} : vector<3x3x4xf32> to vector<1x1x4xf32>
    %54 = vector.shape_cast %53 : vector<1x1x4xf32> to vector<4xf32>
    %55 = vector.shape_cast %54 : vector<4xf32> to vector<1x1x4xf32>
    %56 = vector.broadcast %55 : vector<1x1x4xf32> to vector<16x16x4xf32>
    %57 = arith.mulf %52, %56 : vector<16x16x4xf32>
    %58 = arith.addf %51, %57 : vector<16x16x4xf32>
    %59 = vector.extract_strided_slice %7 {offsets = [2, 1, 0], sizes = [16, 16, 4], strides = [1, 1, 1]} : vector<18x18x4xf32> to vector<16x16x4xf32>
    %60 = vector.extract_strided_slice %8 {offsets = [2, 1, 0], sizes = [1, 1, 4], strides = [1, 1, 1]} : vector<3x3x4xf32> to vector<1x1x4xf32>
    %61 = vector.shape_cast %60 : vector<1x1x4xf32> to vector<4xf32>
    %62 = vector.shape_cast %61 : vector<4xf32> to vector<1x1x4xf32>
    %63 = vector.broadcast %62 : vector<1x1x4xf32> to vector<16x16x4xf32>
    %64 = arith.mulf %59, %63 : vector<16x16x4xf32>
    %65 = arith.addf %58, %64 : vector<16x16x4xf32>
    %66 = vector.extract_strided_slice %7 {offsets = [2, 2, 0], sizes = [16, 16, 4], strides = [1, 1, 1]} : vector<18x18x4xf32> to vector<16x16x4xf32>
    %67 = vector.extract_strided_slice %8 {offsets = [2, 2, 0], sizes = [1, 1, 4], strides = [1, 1, 1]} : vector<3x3x4xf32> to vector<1x1x4xf32>
    %68 = vector.shape_cast %67 : vector<1x1x4xf32> to vector<4xf32>
    %69 = vector.shape_cast %68 : vector<4xf32> to vector<1x1x4xf32>
    %70 = vector.broadcast %69 : vector<1x1x4xf32> to vector<16x16x4xf32>
    %71 = arith.mulf %66, %70 : vector<16x16x4xf32>
    %72 = arith.addf %65, %71 : vector<16x16x4xf32>
    %73 = vector.shape_cast %72 : vector<16x16x4xf32> to vector<256x4xf32>
    %c0_16 = arith.constant 0 : index
    %c0_17 = arith.constant 0 : index
    %74 = vector.load %arg3[%c0_16, %c0_17] : memref<4x8xf32, #tpu.memory_space<vmem>>, vector<4x8xf32>
    %cst_18 = arith.constant dense<0.000000e+00> : vector<256x8xf32>
    %75 = tpu.matmul %73, %74, %cst_18 {dimension_numbers = #tpu.dot_dimension_numbers<[1], [0], [0], [1], [0, 0, 1, 1], [], []>} : vector<256x4xf32>, vector<4x8xf32>, vector<256x8xf32> -> vector<256x8xf32>
    %c0_19 = arith.constant 0 : index
    %c0_20 = arith.constant 0 : index
    %76 = vector.load %arg4[%c0_19, %c0_20] : memref<1x8xf32, #tpu.memory_space<vmem>>, vector<1x8xf32>
    %77 = vector.shape_cast %76 : vector<1x8xf32> to vector<8xf32>
    %78 = vector.shape_cast %77 : vector<8xf32> to vector<1x8xf32>
    %79 = vector.broadcast %78 : vector<1x8xf32> to vector<256x8xf32>
    %80 = arith.addf %75, %79 : vector<256x8xf32>
    %81 = vector.shape_cast %80 : vector<256x8xf32> to vector<16x16x8xf32>
    %cst_21 = arith.constant 0.000000e+00 : f32
    %82 = vector.broadcast %cst_21 : f32 to vector<18x18x8xf32>
    %c0_22 = arith.constant 0 : index
    %c0_23 = arith.constant 0 : index
    %c0_24 = arith.constant 0 : index
    %83 = vector.load %arg12[%c0_22, %c0_23, %c0_24] : memref<18x18x8xf32, #tpu.memory_space<vmem>>, vector<18x18x8xf32>
    tpu.vector_store %arg12[%c0_22, %c0_23, %c0_24], %82 {strides = array<i32>} : memref<18x18x8xf32, #tpu.memory_space<vmem>>, vector<18x18x8xf32>,
    %cst_25 = arith.constant 0.000000e+00 : f32
    %84 = vector.broadcast %cst_25 : f32 to vector<16x16x8xf32>
    %85 = arith.maximumf %81, %84 : vector<16x16x8xf32>
    %c1_26 = arith.constant 1 : index
    %c1_27 = arith.constant 1 : index
    %c0_28 = arith.constant 0 : index
    %86 = vector.load %arg12[%c1_26, %c1_27, %c0_28] : memref<18x18x8xf32, #tpu.memory_space<vmem>>, vector<16x16x8xf32>
    tpu.vector_store %arg12[%c1_26, %c1_27, %c0_28], %85 {strides = array<i32>} : memref<18x18x8xf32, #tpu.memory_space<vmem>>, vector<16x16x8xf32>,
    %c0_29 = arith.constant 0 : index
    %c0_30 = arith.constant 0 : index
    %c0_31 = arith.constant 0 : index
    %87 = vector.load %arg12[%c0_29, %c0_30, %c0_31] : memref<18x18x8xf32, #tpu.memory_space<vmem>>, vector<18x18x8xf32>
    %c0_32 = arith.constant 0 : index
    %c0_33 = arith.constant 0 : index
    %c0_34 = arith.constant 0 : index
    %88 = vector.load %arg5[%c0_32, %c0_33, %c0_34] : memref<3x3x8xf32, #tpu.memory_space<vmem>>, vector<3x3x8xf32>
    %cst_35 = arith.constant 0.000000e+00 : f32
    %89 = vector.broadcast %cst_35 : f32 to vector<16x16x8xf32>
    %90 = vector.extract_strided_slice %87 {offsets = [0, 0, 0], sizes = [16, 16, 8], strides = [1, 1, 1]} : vector<18x18x8xf32> to vector<16x16x8xf32>
    %91 = vector.extract_strided_slice %88 {offsets = [0, 0, 0], sizes = [1, 1, 8], strides = [1, 1, 1]} : vector<3x3x8xf32> to vector<1x1x8xf32>
    %92 = vector.shape_cast %91 : vector<1x1x8xf32> to vector<8xf32>
    %93 = vector.shape_cast %92 : vector<8xf32> to vector<1x1x8xf32>
    %94 = vector.broadcast %93 : vector<1x1x8xf32> to vector<16x16x8xf32>
    %95 = arith.mulf %90, %94 : vector<16x16x8xf32>
    %96 = arith.addf %89, %95 : vector<16x16x8xf32>
    %97 = vector.extract_strided_slice %87 {offsets = [0, 1, 0], sizes = [16, 16, 8], strides = [1, 1, 1]} : vector<18x18x8xf32> to vector<16x16x8xf32>
    %98 = vector.extract_strided_slice %88 {offsets = [0, 1, 0], sizes = [1, 1, 8], strides = [1, 1, 1]} : vector<3x3x8xf32> to vector<1x1x8xf32>
    %99 = vector.shape_cast %98 : vector<1x1x8xf32> to vector<8xf32>
    %100 = vector.shape_cast %99 : vector<8xf32> to vector<1x1x8xf32>
    %101 = vector.broadcast %100 : vector<1x1x8xf32> to vector<16x16x8xf32>
    %102 = arith.mulf %97, %101 : vector<16x16x8xf32>
    %103 = arith.addf %96, %102 : vector<16x16x8xf32>
    %104 = vector.extract_strided_slice %87 {offsets = [0, 2, 0], sizes = [16, 16, 8], strides = [1, 1, 1]} : vector<18x18x8xf32> to vector<16x16x8xf32>
    %105 = vector.extract_strided_slice %88 {offsets = [0, 2, 0], sizes = [1, 1, 8], strides = [1, 1, 1]} : vector<3x3x8xf32> to vector<1x1x8xf32>
    %106 = vector.shape_cast %105 : vector<1x1x8xf32> to vector<8xf32>
    %107 = vector.shape_cast %106 : vector<8xf32> to vector<1x1x8xf32>
    %108 = vector.broadcast %107 : vector<1x1x8xf32> to vector<16x16x8xf32>
    %109 = arith.mulf %104, %108 : vector<16x16x8xf32>
    %110 = arith.addf %103, %109 : vector<16x16x8xf32>
    %111 = vector.extract_strided_slice %87 {offsets = [1, 0, 0], sizes = [16, 16, 8], strides = [1, 1, 1]} : vector<18x18x8xf32> to vector<16x16x8xf32>
    %112 = vector.extract_strided_slice %88 {offsets = [1, 0, 0], sizes = [1, 1, 8], strides = [1, 1, 1]} : vector<3x3x8xf32> to vector<1x1x8xf32>
    %113 = vector.shape_cast %112 : vector<1x1x8xf32> to vector<8xf32>
    %114 = vector.shape_cast %113 : vector<8xf32> to vector<1x1x8xf32>
    %115 = vector.broadcast %114 : vector<1x1x8xf32> to vector<16x16x8xf32>
    %116 = arith.mulf %111, %115 : vector<16x16x8xf32>
    %117 = arith.addf %110, %116 : vector<16x16x8xf32>
    %118 = vector.extract_strided_slice %87 {offsets = [1, 1, 0], sizes = [16, 16, 8], strides = [1, 1, 1]} : vector<18x18x8xf32> to vector<16x16x8xf32>
    %119 = vector.extract_strided_slice %88 {offsets = [1, 1, 0], sizes = [1, 1, 8], strides = [1, 1, 1]} : vector<3x3x8xf32> to vector<1x1x8xf32>
    %120 = vector.shape_cast %119 : vector<1x1x8xf32> to vector<8xf32>
    %121 = vector.shape_cast %120 : vector<8xf32> to vector<1x1x8xf32>
    %122 = vector.broadcast %121 : vector<1x1x8xf32> to vector<16x16x8xf32>
    %123 = arith.mulf %118, %122 : vector<16x16x8xf32>
    %124 = arith.addf %117, %123 : vector<16x16x8xf32>
    %125 = vector.extract_strided_slice %87 {offsets = [1, 2, 0], sizes = [16, 16, 8], strides = [1, 1, 1]} : vector<18x18x8xf32> to vector<16x16x8xf32>
    %126 = vector.extract_strided_slice %88 {offsets = [1, 2, 0], sizes = [1, 1, 8], strides = [1, 1, 1]} : vector<3x3x8xf32> to vector<1x1x8xf32>
    %127 = vector.shape_cast %126 : vector<1x1x8xf32> to vector<8xf32>
    %128 = vector.shape_cast %127 : vector<8xf32> to vector<1x1x8xf32>
    %129 = vector.broadcast %128 : vector<1x1x8xf32> to vector<16x16x8xf32>
    %130 = arith.mulf %125, %129 : vector<16x16x8xf32>
    %131 = arith.addf %124, %130 : vector<16x16x8xf32>
    %132 = vector.extract_strided_slice %87 {offsets = [2, 0, 0], sizes = [16, 16, 8], strides = [1, 1, 1]} : vector<18x18x8xf32> to vector<16x16x8xf32>
    %133 = vector.extract_strided_slice %88 {offsets = [2, 0, 0], sizes = [1, 1, 8], strides = [1, 1, 1]} : vector<3x3x8xf32> to vector<1x1x8xf32>
    %134 = vector.shape_cast %133 : vector<1x1x8xf32> to vector<8xf32>
    %135 = vector.shape_cast %134 : vector<8xf32> to vector<1x1x8xf32>
    %136 = vector.broadcast %135 : vector<1x1x8xf32> to vector<16x16x8xf32>
    %137 = arith.mulf %132, %136 : vector<16x16x8xf32>
    %138 = arith.addf %131, %137 : vector<16x16x8xf32>
    %139 = vector.extract_strided_slice %87 {offsets = [2, 1, 0], sizes = [16, 16, 8], strides = [1, 1, 1]} : vector<18x18x8xf32> to vector<16x16x8xf32>
    %140 = vector.extract_strided_slice %88 {offsets = [2, 1, 0], sizes = [1, 1, 8], strides = [1, 1, 1]} : vector<3x3x8xf32> to vector<1x1x8xf32>
    %141 = vector.shape_cast %140 : vector<1x1x8xf32> to vector<8xf32>
    %142 = vector.shape_cast %141 : vector<8xf32> to vector<1x1x8xf32>
    %143 = vector.broadcast %142 : vector<1x1x8xf32> to vector<16x16x8xf32>
    %144 = arith.mulf %139, %143 : vector<16x16x8xf32>
    %145 = arith.addf %138, %144 : vector<16x16x8xf32>
    %146 = vector.extract_strided_slice %87 {offsets = [2, 2, 0], sizes = [16, 16, 8], strides = [1, 1, 1]} : vector<18x18x8xf32> to vector<16x16x8xf32>
    %147 = vector.extract_strided_slice %88 {offsets = [2, 2, 0], sizes = [1, 1, 8], strides = [1, 1, 1]} : vector<3x3x8xf32> to vector<1x1x8xf32>
    %148 = vector.shape_cast %147 : vector<1x1x8xf32> to vector<8xf32>
    %149 = vector.shape_cast %148 : vector<8xf32> to vector<1x1x8xf32>
    %150 = vector.broadcast %149 : vector<1x1x8xf32> to vector<16x16x8xf32>
    %151 = arith.mulf %146, %150 : vector<16x16x8xf32>
    %152 = arith.addf %145, %151 : vector<16x16x8xf32>
    %153 = vector.shape_cast %152 : vector<16x16x8xf32> to vector<256x8xf32>
    %c0_36 = arith.constant 0 : index
    %c0_37 = arith.constant 0 : index
    %154 = vector.load %arg6[%c0_36, %c0_37] : memref<8x8xf32, #tpu.memory_space<vmem>>, vector<8x8xf32>
    %cst_38 = arith.constant dense<0.000000e+00> : vector<256x8xf32>
    %155 = tpu.matmul %153, %154, %cst_38 {dimension_numbers = #tpu.dot_dimension_numbers<[1], [0], [0], [1], [0, 0, 1, 1], [], []>} : vector<256x8xf32>, vector<8x8xf32>, vector<256x8xf32> -> vector<256x8xf32>
    %c0_39 = arith.constant 0 : index
    %c0_40 = arith.constant 0 : index
    %156 = vector.load %arg7[%c0_39, %c0_40] : memref<1x8xf32, #tpu.memory_space<vmem>>, vector<1x8xf32>
    %157 = vector.shape_cast %156 : vector<1x8xf32> to vector<8xf32>
    %158 = vector.shape_cast %157 : vector<8xf32> to vector<1x8xf32>
    %159 = vector.broadcast %158 : vector<1x8xf32> to vector<256x8xf32>
    %160 = arith.addf %155, %159 : vector<256x8xf32>
    %161 = vector.shape_cast %160 : vector<256x8xf32> to vector<16x16x8xf32>
    %cst_41 = arith.constant 0xFF800000 : f32
    %162 = vector.broadcast %cst_41 : f32 to vector<18x18x8xf32>
    %c0_42 = arith.constant 0 : index
    %c0_43 = arith.constant 0 : index
    %c0_44 = arith.constant 0 : index
    %163 = vector.load %arg12[%c0_42, %c0_43, %c0_44] : memref<18x18x8xf32, #tpu.memory_space<vmem>>, vector<18x18x8xf32>
    tpu.vector_store %arg12[%c0_42, %c0_43, %c0_44], %162 {strides = array<i32>} : memref<18x18x8xf32, #tpu.memory_space<vmem>>, vector<18x18x8xf32>,
    %c1_45 = arith.constant 1 : index
    %c1_46 = arith.constant 1 : index
    %c0_47 = arith.constant 0 : index
    %164 = vector.load %arg12[%c1_45, %c1_46, %c0_47] : memref<18x18x8xf32, #tpu.memory_space<vmem>>, vector<16x16x8xf32>
    tpu.vector_store %arg12[%c1_45, %c1_46, %c0_47], %161 {strides = array<i32>} : memref<18x18x8xf32, #tpu.memory_space<vmem>>, vector<16x16x8xf32>,
    %c0_48 = arith.constant 0 : index
    %c0_49 = arith.constant 0 : index
    %c0_50 = arith.constant 0 : index
    %165 = tpu.strided_load %arg12[%c0_48, %c0_49, %c0_50] {strides = array<i32: 1, 2, 1>} : memref<18x18x8xf32, #tpu.memory_space<vmem>>, vector<18x8x8xf32>
    %c0_51 = arith.constant 0 : index
    %c1_52 = arith.constant 1 : index
    %c0_53 = arith.constant 0 : index
    %166 = tpu.strided_load %arg12[%c0_51, %c1_52, %c0_53] {strides = array<i32: 1, 2, 1>} : memref<18x18x8xf32, #tpu.memory_space<vmem>>, vector<18x8x8xf32>
    %167 = arith.maximumf %165, %166 : vector<18x8x8xf32>
    %c0_54 = arith.constant 0 : index
    %c2 = arith.constant 2 : index
    %c0_55 = arith.constant 0 : index
    %168 = tpu.strided_load %arg12[%c0_54, %c2, %c0_55] {strides = array<i32: 1, 2, 1>} : memref<18x18x8xf32, #tpu.memory_space<vmem>>, vector<18x8x8xf32>
    %169 = arith.maximumf %167, %168 : vector<18x8x8xf32>
    %170 = vector.extract_strided_slice %169 {offsets = [0, 0, 0], sizes = [16, 8, 8], strides = [1, 1, 1]} : vector<18x8x8xf32> to vector<16x8x8xf32>
    %171 = vector.shape_cast %170 : vector<16x8x8xf32> to vector<8x2x8x8xf32>
    %172 = vector.extract_strided_slice %169 {offsets = [2, 0, 0], sizes = [16, 8, 8], strides = [1, 1, 1]} : vector<18x8x8xf32> to vector<16x8x8xf32>
    %173 = vector.shape_cast %172 : vector<16x8x8xf32> to vector<8x2x8x8xf32>
    %174 = vector.extract_strided_slice %171 {offsets = [0, 0, 0, 0], sizes = [8, 1, 8, 8], strides = [1, 1, 1, 1]} : vector<8x2x8x8xf32> to vector<8x1x8x8xf32>
    %175 = vector.shape_cast %174 : vector<8x1x8x8xf32> to vector<8x8x8xf32>
    %176 = vector.extract_strided_slice %171 {offsets = [0, 1, 0, 0], sizes = [8, 1, 8, 8], strides = [1, 1, 1, 1]} : vector<8x2x8x8xf32> to vector<8x1x8x8xf32>
    %177 = vector.shape_cast %176 : vector<8x1x8x8xf32> to vector<8x8x8xf32>
    %178 = arith.maximumf %175, %177 : vector<8x8x8xf32>
    %179 = vector.extract_strided_slice %173 {offsets = [0, 0, 0, 0], sizes = [8, 1, 8, 8], strides = [1, 1, 1, 1]} : vector<8x2x8x8xf32> to vector<8x1x8x8xf32>
    %180 = vector.shape_cast %179 : vector<8x1x8x8xf32> to vector<8x8x8xf32>
    %181 = arith.maximumf %178, %180 : vector<8x8x8xf32>
    %c0_56 = arith.constant 0 : index
    %c0_57 = arith.constant 0 : index
    %c0_58 = arith.constant 0 : index
    %c0_59 = arith.constant 0 : index
    %182 = tpu.strided_load %arg1[%c0_56, %c0_57, %c0_58, %c0_59] {strides = array<i32: 1, 1, 2, 1>} : memref<1x16x16x4xf32, #tpu.memory_space<vmem>>, vector<1x16x8x4xf32>
    %183 = vector.shape_cast %182 : vector<1x16x8x4xf32> to vector<16x8x4xf32>
    %184 = vector.shape_cast %183 : vector<16x8x4xf32> to vector<8x2x8x4xf32>
    %185 = vector.extract_strided_slice %184 {offsets = [0, 0, 0, 0], sizes = [8, 1, 8, 4], strides = [1, 1, 1, 1]} : vector<8x2x8x4xf32> to vector<8x1x8x4xf32>
    %186 = vector.shape_cast %185 : vector<8x1x8x4xf32> to vector<8x8x4xf32>
    %187 = vector.shape_cast %186 : vector<8x8x4xf32> to vector<64x4xf32>
    %c0_60 = arith.constant 0 : index
    %c0_61 = arith.constant 0 : index
    %188 = vector.load %arg8[%c0_60, %c0_61] : memref<4x8xf32, #tpu.memory_space<vmem>>, vector<4x8xf32>
    %cst_62 = arith.constant dense<0.000000e+00> : vector<64x8xf32>
    %189 = tpu.matmul %187, %188, %cst_62 {dimension_numbers = #tpu.dot_dimension_numbers<[1], [0], [0], [1], [0, 0, 1, 1], [], []>} : vector<64x4xf32>, vector<4x8xf32>, vector<64x8xf32> -> vector<64x8xf32>
    %c0_63 = arith.constant 0 : index
    %c0_64 = arith.constant 0 : index
    %190 = vector.load %arg9[%c0_63, %c0_64] : memref<1x8xf32, #tpu.memory_space<vmem>>, vector<1x8xf32>
    %191 = vector.shape_cast %190 : vector<1x8xf32> to vector<8xf32>
    %192 = vector.shape_cast %191 : vector<8xf32> to vector<1x8xf32>
    %193 = vector.broadcast %192 : vector<1x8xf32> to vector<64x8xf32>
    %194 = arith.addf %189, %193 : vector<64x8xf32>
    %195 = vector.shape_cast %194 : vector<64x8xf32> to vector<8x8x8xf32>
    %196 = arith.addf %181, %195 : vector<8x8x8xf32>
    %c0_65 = arith.constant 0 : index
    %c0_66 = arith.constant 0 : index
    %c0_67 = arith.constant 0 : index
    %c0_68 = arith.constant 0 : index
    %197 = vector.load %arg10[%c0_65, %c0_66, %c0_67, %c0_68] : memref<1x8x8x8xf32, #tpu.memory_space<vmem>>, vector<1x8x8x8xf32>
    %198 = vector.shape_cast %197 : vector<1x8x8x8xf32> to vector<8x8x8xf32>
    %199 = vector.shape_cast %196 : vector<8x8x8xf32> to vector<1x8x8x8xf32>
    tpu.vector_store %arg10[%c0_65, %c0_66, %c0_67, %c0_68], %199 {strides = array<i32>} : memref<1x8x8x8xf32, #tpu.memory_space<vmem>>, vector<1x8x8x8xf32>,
    return
  }
  func.func @transform_0(%arg0: i32) -> (i32, i32, i32, i32) {
    %c0_i32 = arith.constant 0 : i32
    %c0_i32_0 = arith.constant 0 : i32
    %c0_i32_1 = arith.constant 0 : i32
    %c0_i32_2 = arith.constant 0 : i32
    return %arg0, %c0_i32, %c0_i32_0, %c0_i32_1 : i32, i32, i32, i32
  }
  func.func @transform_1(%arg0: i32) -> (i32, i32, i32) {
    %c0_i32 = arith.constant 0 : i32
    %c0_i32_0 = arith.constant 0 : i32
    %c0_i32_1 = arith.constant 0 : i32
    %c0_i32_2 = arith.constant 0 : i32
    return %c0_i32, %c0_i32_0, %c0_i32_1 : i32, i32, i32
  }
  func.func @transform_2(%arg0: i32) -> (i32, i32) {
    %c0_i32 = arith.constant 0 : i32
    %c0_i32_0 = arith.constant 0 : i32
    %c0_i32_1 = arith.constant 0 : i32
    return %c0_i32, %c0_i32_0 : i32, i32
  }
  func.func @transform_3(%arg0: i32) -> (i32, i32) {
    %c0_i32 = arith.constant 0 : i32
    %c0_i32_0 = arith.constant 0 : i32
    %c0_i32_1 = arith.constant 0 : i32
    return %c0_i32, %c0_i32_0 : i32, i32
  }
  func.func @transform_4(%arg0: i32) -> (i32, i32, i32) {
    %c0_i32 = arith.constant 0 : i32
    %c0_i32_0 = arith.constant 0 : i32
    %c0_i32_1 = arith.constant 0 : i32
    %c0_i32_2 = arith.constant 0 : i32
    return %c0_i32, %c0_i32_0, %c0_i32_1 : i32, i32, i32
  }
  func.func @transform_5(%arg0: i32) -> (i32, i32) {
    %c0_i32 = arith.constant 0 : i32
    %c0_i32_0 = arith.constant 0 : i32
    %c0_i32_1 = arith.constant 0 : i32
    return %c0_i32, %c0_i32_0 : i32, i32
  }
  func.func @transform_6(%arg0: i32) -> (i32, i32) {
    %c0_i32 = arith.constant 0 : i32
    %c0_i32_0 = arith.constant 0 : i32
    %c0_i32_1 = arith.constant 0 : i32
    return %c0_i32, %c0_i32_0 : i32, i32
  }
  func.func @transform_7(%arg0: i32) -> (i32, i32) {
    %c0_i32 = arith.constant 0 : i32
    %c0_i32_0 = arith.constant 0 : i32
    %c0_i32_1 = arith.constant 0 : i32
    return %c0_i32, %c0_i32_0 : i32, i32
  }
  func.func @transform_8(%arg0: i32) -> (i32, i32) {
    %c0_i32 = arith.constant 0 : i32
    %c0_i32_0 = arith.constant 0 : i32
    %c0_i32_1 = arith.constant 0 : i32
    return %c0_i32, %c0_i32_0 : i32, i32
  }
  func.func @transform_9(%arg0: i32) -> (i32, i32, i32, i32) {
    %c0_i32 = arith.constant 0 : i32
    %c0_i32_0 = arith.constant 0 : i32
    %c0_i32_1 = arith.constant 0 : i32
    %c0_i32_2 = arith.constant 0 : i32
    return %arg0, %c0_i32, %c0_i32_0, %c0_i32_1 : i32, i32, i32, i32
  }
}

</mosaic_0001>

<bundles_post_ra>
// kernel: tpu_custom_call.1
= control target key start
LH: loop header
LB: loop body
LE: loop exit
PB: predicated region body
PF: predicated region fallthrough
CT: control target
= control target key end

     0   :  { %14 = vsyncpa [#allocation5], 0  ;;  %s9009_s0 = inlined_call_operand.vmem [shape: f32[2,16,16,4], index: 0, kind: input, shape index: {}]   ;;  %s9010_s1 = inlined_call_operand.vmem [shape: f32[3,3,4], index: 1, kind: input, shape index: {}]   ;;  %s9011_s2 = inlined_call_operand.vmem [shape: f32[4,8], index: 2, kind: input, shape index: {}]   ;;  %s9012_s3 = inlined_call_operand.vmem [shape: f32[1,8], index: 3, kind: input, shape index: {}]   ;;  %s9013_s4 = inlined_call_operand.vmem [shape: f32[3,3,8], index: 4, kind: input, shape index: {}]   ;;  %s9014_s5 = inlined_call_operand.vmem [shape: f32[8,8], index: 5, kind: input, shape index: {}]   ;;  %s9015_s6 = inlined_call_operand.vmem [shape: f32[1,8], index: 6, kind: input, shape index: {}]   ;;  %s9016_s7 = inlined_call_operand.vmem [shape: f32[4,8], index: 7, kind: input, shape index: {}]   ;;  %s9017_s8 = inlined_call_operand.vmem [shape: f32[1,8], index: 8, kind: input, shape index: {}]   ;;  %s9018_s9 = inlined_call_operand.hbm [shape: f32[2,8,8,8], index: 9, kind: output, shape index: {}]  }
   0x1   :  { %16 = vsyncpa [#allocation5 + $0x1], 0  ;;  %s5654_s30 = smov 0   ;;  %s5656_s10 = smov 0  }
   0x2   :  { %s5658_s11 = smov 0   ;;  %s5660_s12 = smov 0  }
   0x3 LB: > { %s5675_s13 = sadd.s32 4294967295, %s5597_s12   ;;  %s5203_s14 = sadd.s32 4294967294, %s5597_s12   ;;  %s5597_s12 = sphi %s5660_s12, %s9031_s12   ;;  %s5593_s11 = sphi %s5658_s11, %s9030_s11   ;;  %s5589_s10 = sphi %s5656_s10, %s9029_s10   ;;  %s5585_s30 = sphi %s5654_s30, %s9028_s30  }
   0x4   : > { %s5679_s15 = sadd.s32 1, %s5597_s12   ;;  %s223_s16 = sadd.s32 1, %s5593_s11 }
   0x5   : > { %s220_s17 = ssub.s32 %s5597_s12, %s5679_s15  ;;  %p233_p0 = scmp.ne.s32.totalorder %s5593_s11, %s5589_s10 }
   0x6   : > { %p221_p1 = scmp.eq.s32.totalorder %s220_s17, 0  ;;  %p234_p2 = scmp.eq.s32.totalorder %s5675_s13, 1 }
   0x7   : > { %p239_p3 = scmp.ne.s32.totalorder %s5589_s10, %s5585_s30  ;;  %p240_p4 = scmp.eq.s32.totalorder %s5203_s14, 1 }
   0x8   : > { %s5690_s18 = scalar_select %p221_p1, %s5593_s11, %s223_s16  }
   0x9   : > { %p5692_p5 = por %p234_p2, %p233_p0  ;;  %p5696_p6 = por %p240_p4, %p239_p3 }
   0xa   : > { %p5206_p7 = scmp.ge.s32.totalorder %s5597_s12, 1  ;;  %p290_p8 = scmp.lt.s32.totalorder %s5597_s12, 3 }
   0xc   : > { %p291_p9 = pnand %p5206_p7, %p290_p8 }
   0xd   : > { %p326_p10 = scmp.lt.s32.totalorder (!%p291_p9), %s5675_s13, 1  ;;  %s5300_s22 = sshll.u32 (!%p291_p9), %s5675_s13, 10 }
   0xe   : > { %294 = sbr.rel (%p291_p9) target bundleno = 894 (0x37e), region = 56  ;;  %s8961_s25 = scalar_lea.hbm (!%p291_p9), %s9018_s9, %s5300_s22 }
   0xf   : > { %s5601_s27 = smov (!%p291_p9), [#allocation4]  }
  0x10   : > { %s5541_s29 = sshll.u32 (!%p291_p9), %s5601_s27, 4  ;;  %s5542_s29 = int_to_ptr.vmem [resolvable:$false] %s5541_s29 }
  0x11   : > { %s5543_s14 = scalar_lea.vmem (!%p291_p9), %s5542_s29, 2048 }
  0x13   : > { %v5705_v0 = vld [vmem:[%s9011_s2] sm:$0xf]  ;;  %vm2315_vm0 = vcmask 1043456   ;;  %vm331_vm1 = vcmask 31744   ;;  %v541_v1 = vlaneseq  ;;  %v9019_v2 = vmov 0.0   ;;  %s327_s23 = scalar_select %p326_p10, %s5675_s13, 1 }
  0x14   : > { %5376 = vmatprep.subr.msk.mxu0 %vm2315_vm0, %v5705_v0  ;;  %332 = vst.msk [vmem:[#allocation2] sm:$0xff] %vm331_vm1, %v9019_v2  ;;  %333 = vst.msk [vmem:[#allocation2 + $0x8] sm:$0xff] %vm331_vm1, %v9019_v2  ;;  %vm334_vm2 = vcmask 25600   ;;  %5490 = vmatprep.subr.msk.mxu1 %vm2315_vm0, %v5705_v0  ;;  %v538_v4 = vld [vmem:[%s9010_s1] sm:$0x7]  ;;  %vm709_vm3 = vcmask 1046528  }
  0x15   : > { %336 = vst.msk [vmem:[#allocation2 + $0x18] sm:$0xff] %vm331_vm1, %v9019_v2  ;;  %337 = vst.msk [vmem:[#allocation2 + $0x20] sm:$0xff] %vm331_vm1, %v9019_v2  ;;  %5377 = vmatpush3.msk.msra.mxu0 %vm2315_vm0, %v5705_v0  ;;  %v542_v3 = vshrl.u32 %v541_v1, 7  ;;  %5491 = vmatpush3.msk.msra.mxu1 %vm2315_vm0, %v5705_v0  ;;  %v539_v5 = vld [vmem:[%s9010_s1 + $0x4] sm:$0x7]  ;;  %s5299_s28 = sshll.u32 %s327_s23, 8 }
  0x16   : > { %339 = vst.msk [vmem:[#allocation2 + $0x30] sm:$0xff] %vm331_vm1, %v9019_v2  ;;  %340 = vst.msk [vmem:[#allocation2 + $0x38] sm:$0xff] %vm331_vm1, %v9019_v2  ;;  %s5842_s16 = scalar_lea.vmem %s9009_s0, %s5299_s28  ;;  %v540_v9 = vld [vmem:[%s9010_s1 + $0x8] sm:$0x7]  ;;  %vm954_vm4 = vcmask 1045504   ;;  %vm2544_vm5 = vcmask 64512  }
  0x17   : > { %342 = vst.msk [vmem:[#allocation2 + $0x48] sm:$0xff] %vm331_vm1, %v9019_v2  ;;  %343 = vst.msk [vmem:[#allocation2 + $0x50] sm:$0xff] %vm331_vm1, %v9019_v2  ;;  %v5833_v6 = vsub.s32 0, %v542_v3  ;;  %v5835_v7 = vsub.s32 1, %v542_v3  ;;  %v5837_v8 = vsub.s32 2, %v542_v3  ;;  %v387_v10 = vld [vmem:[%s5842_s16] sm:$0xff] }
  0x18   : > { %345 = vst.msk [vmem:[#allocation2 + $0x60] sm:$0xff] %vm331_vm1, %v9019_v2  ;;  %346 = vst.msk [vmem:[#allocation2 + $0x68] sm:$0xff] %vm331_vm1, %v9019_v2  ;;  %v388_v11 = vld [vmem:[%s5842_s16 + $0x8] sm:$0xff]  ;;  %v389_v12 = vld [vmem:[%s5842_s16 + $0x10] sm:$0xff]  ;;  %v419_v18 = vmax.f32 %v387_v10, 0.0  ;;  %vm2547_vm6 = vcmask 58368  }
  0x19   : > { %348 = vst.msk [vmem:[#allocation2 + $0x78] sm:$0xff] %vm331_vm1, %v9019_v2  ;;  %349 = vst.msk [vmem:[#allocation2 + $0x80] sm:$0xff] %vm331_vm1, %v9019_v2  ;;  %v5851_v13 = vrot.slane %v538_v4, %v5833_v6  ;;  %v5854_v14 = vrot.slane %v538_v4, %v5835_v7  ;;  %v5857_v15 = vrot.slane %v538_v4, %v5837_v8  ;;  %v390_v17 = vld [vmem:[%s5842_s16 + $0x18] sm:$0xff]  ;;  %v420_v19 = vmax.f32 %v388_v11, 0.0  ;;  %v391_v33 = vld [vmem:[%s5842_s16 + $0x20] sm:$0xff]  ;;  %s323_s28 = sand.u32 1, %s5589_s10  }
  0x1a   : > { %351 = vst.msk [vmem:[#allocation2 + $0x90] sm:$0xff] %vm331_vm1, %v9019_v2  ;;  %352 = vst.msk [vmem:[#allocation2 + $0x98] sm:$0xff] %vm331_vm1, %v9019_v2  ;;  %v5860_v16 = vrot.slane %v539_v5, %v5833_v6  ;;  %v421_v20 = vmax.f32 %v389_v12, 0.0  ;;  %v5864_v21 = vrot.slane %v539_v5, %v5835_v7  ;;  %v422_v22 = vmax.f32 %v390_v17, 0.0  ;;  %v392_v34 = vld [vmem:[%s5842_s16 + $0x28] sm:$0xff]  ;;  %v393_v39 = vld [vmem:[%s5842_s16 + $0x30] sm:$0xff] }
  0x1b   : > { %354 = vst.msk [vmem:[#allocation2 + $0xa8] sm:$0xff] %vm331_vm1, %v9019_v2  ;;  %355 = vst.msk [vmem:[#allocation2 + $0xb0] sm:$0xff] %vm331_vm1, %v9019_v2  ;;  %v484_v23 = vld [vmem:[#allocation2] sm:$0xff]  ;;  %v485_v24 = vld [vmem:[#allocation2 + $0x8] sm:$0xff]  ;;  %v5867_v25 = vrot.slane %v539_v5, %v5837_v8  ;;  %v5870_v26 = vrot.slane %v540_v9, %v5833_v6  ;;  %v5873_v27 = vrot.slane %v540_v9, %v5835_v7  ;;  %v423_v48 = vmax.f32 %v391_v33, 0.0  ;;  %s5207_s17 = sshll.u32 %s323_s28, 6 }
  0x1c   : > { %357 = vst.msk [vmem:[#allocation2 + $0xc0] sm:$0xff] %vm331_vm1, %v9019_v2  ;;  %358 = vst.msk [vmem:[#allocation2 + $0xc8] sm:$0xff] %vm331_vm1, %v9019_v2  ;;  %v545_v28 = vmul.f32 %v5851_v13, %v484_v23  ;;  %v613_v29 = vmul.f32 %v5854_v14, %v484_v23  ;;  %v614_v30 = vmul.f32 %v5854_v14, %v485_v24  ;;  %v394_v40 = vld [vmem:[%s5842_s16 + $0x38] sm:$0xff]  ;;  %v395_v45 = vld [vmem:[%s5842_s16 + $0x40] sm:$0xff]  ;;  %v424_v49 = vmax.f32 %v392_v34, 0.0  ;;  %s8890_s21 = scalar_lea.vmem [#allocation4], %s5207_s17 }
  0x1d   : > { %360 = vst.msk [vmem:[#allocation2 + $0xd8] sm:$0xff] %vm331_vm1, %v9019_v2  ;;  %361 = vst.msk [vmem:[#allocation2 + $0xe0] sm:$0xff] %vm331_vm1, %v9019_v2  ;;  %v858_v31 = vmul.f32 %v5857_v15, %v484_v23  ;;  %v859_v35 = vmul.f32 %v5857_v15, %v485_v24  ;;  %v5887_v36 = vrot.slane %v540_v9, %v5837_v8  ;;  %v396_v50 = vld [vmem:[%s5842_s16 + $0x48] sm:$0xff]  ;;  %v397_v51 = vld [vmem:[%s5842_s16 + $0x50] sm:$0xff]  ;;  %v425_v54 = vmax.f32 %v393_v39, 0.0  ;;  %s5141_s23 = sshll.u32 %s8890_s21, 4  ;;  %s8963_s23 = int_to_ptr.vmem [resolvable:$true] %s5141_s23 }
  0x1e   : > { %363 = vst.msk [vmem:[#allocation2 + $0xf0] sm:$0xff] %vm331_vm1, %v9019_v2  ;;  %364 = vst.msk [vmem:[#allocation2 + $0xf8] sm:$0xff] %vm331_vm1, %v9019_v2  ;;  %v546_v37 = vmul.f32 %v5851_v13, %v485_v24  ;;  %v710_v41 = vrot.slane %v613_v29, 1  ;;  %v711_v42 = vrot.slane %v614_v30, 1  ;;  %v426_v55 = vmax.f32 %v394_v40, 0.0  ;;  %v398_v56 = vld [vmem:[%s5842_s16 + $0x58] sm:$0xff]  ;;  %p5544_p0 = scmp.lt.s32.totalorder %s8963_s23, %s5542_s29 }
  0x1f   : > { %366 = vst.msk [vmem:[#allocation2 + $0x108] sm:$0xff] %vm331_vm1, %v9019_v2  ;;  %367 = vst.msk [vmem:[#allocation2 + $0x110] sm:$0xff] %vm331_vm1, %v9019_v2  ;;  %v955_v43 = vrot.slane %v858_v31, 2  ;;  %v956_v46 = vrot.slane %v859_v35, 2  ;;  %v399_v57 = vld [vmem:[%s5842_s16 + $0x60] sm:$0xff]  ;;  %v400_v58 = vld [vmem:[%s5842_s16 + $0x68] sm:$0xff] }
  0x20   : > { %369 = vst.msk [vmem:[#allocation2 + $0x120] sm:$0xff] %vm331_vm1, %v9019_v2  ;;  %370 = vst.msk [vmem:[#allocation2 + $0x128] sm:$0xff] %vm331_vm1, %v9019_v2  ;;  %v712_v52 = vsel %vm709_vm3, %v710_v41, %v711_v42  ;;  %v427_v62 = vmax.f32 %v395_v45, 0.0  ;;  %v428_v1 = vmax.f32 %v396_v50, 0.0  ;;  %v429_v3 = vmax.f32 %v397_v51, 0.0  ;;  %s8969_s26 = scalar_lea.sflag [#allocation5], %s323_s28 }
  0x21   : > { %372 = vst.msk [vmem:[#allocation2 + $0x138] sm:$0xff] %vm331_vm1, %v9019_v2  ;;  %373 = vst.msk [vmem:[#allocation2 + $0x140] sm:$0xff] %vm331_vm1, %v9019_v2  ;;  %v822_v59 = vadd.f32 %v712_v52, %v545_v28  ;;  %v957_v60 = vsel %vm954_vm4, %v955_v43, %v956_v46  ;;  %v430_v10 = vmax.f32 %v398_v56, 0.0  ;;  %v431_v11 = vmax.f32 %v399_v57, 0.0  ;;  %s5537_s13 = scalar_lea.vmem %s8963_s23, 1024 }
  0x22   : > { %375 = vst.msk [vmem:[#allocation2 + $0x150] sm:$0xff] %vm331_vm1, %v9019_v2  ;;  %376 = vst.msk [vmem:[#allocation2 + $0x158] sm:$0xff] %vm331_vm1, %v9019_v2  ;;  %v432_v12 = vmax.f32 %v400_v58, 0.0  ;;  %p5538_p11 = scmp.ne.s32.totalorder %s8963_s23, %s5537_s13  ;;  %p5545_p1 = scmp.lt.s32.totalorder %s5543_s14, %s5537_s13 }
  0x23   : > { %378 = vst.msk [vmem:[#allocation2 + $0x168] sm:$0xff] %vm331_vm1, %v9019_v2  ;;  %379 = vst.msk [vmem:[#allocation2 + $0x170] sm:$0xff] %vm331_vm1, %v9019_v2  ;;  %v1067_v9 = vadd.f32 %v957_v60, %v822_v59 }
  0x24   : > { %381 = vst.msk [vmem:[#allocation2 + $0x180] sm:$0xff] %vm331_vm1, %v9019_v2  ;;  %382 = vst.msk [vmem:[#allocation2 + $0x188] sm:$0xff] %vm331_vm1, %v9019_v2  ;;  %p5539_p12 = pnand %p5538_p11, %p5692_p5  ;;  %p5546_p2 = por %p5545_p1, %p5544_p0 }
  0x25   : > { %384 = vst.msk [vmem:[#allocation2 + $0x198] sm:$0xff] %vm331_vm1, %v9019_v2  ;;  %385 = vst.msk [vmem:[#allocation2 + $0x1a0] sm:$0xff] %vm331_vm1, %v9019_v2 }
  0x26   : > { %338 = vst.msk [vmem:[#allocation2 + $0x28] sm:$0x3] %vm334_vm2, %v9019_v2  ;;  %341 = vst.msk [vmem:[#allocation2 + $0x40] sm:$0x3] %vm334_vm2, %v9019_v2  ;;  %p5540_p13 = pneg %p5539_p12 }
  0x27   : > { %335 = vst.msk [vmem:[#allocation2 + $0x10] sm:$0x3] %vm334_vm2, %v9019_v2  ;;  %344 = vst.msk [vmem:[#allocation2 + $0x58] sm:$0x3] %vm334_vm2, %v9019_v2 }
  0x28   : > { %347 = vst.msk [vmem:[#allocation2 + $0x70] sm:$0x3] %vm334_vm2, %v9019_v2  ;;  %350 = vst.msk [vmem:[#allocation2 + $0x88] sm:$0x3] %vm334_vm2, %v9019_v2  ;;  %p5547_p3 = pnand %p5546_p2, %p5540_p13 }
  0x29   : > { %353 = vst.msk [vmem:[#allocation2 + $0xa0] sm:$0x3] %vm334_vm2, %v9019_v2  ;;  %356 = vst.msk [vmem:[#allocation2 + $0xb8] sm:$0x3] %vm334_vm2, %v9019_v2 }
  0x2a   : > { %359 = vst.msk [vmem:[#allocation2 + $0xd0] sm:$0x3] %vm334_vm2, %v9019_v2  ;;  %362 = vst.msk [vmem:[#allocation2 + $0xe8] sm:$0x3] %vm334_vm2, %v9019_v2 }
  0x2b   : > { %365 = vst.msk [vmem:[#allocation2 + $0x100] sm:$0x3] %vm334_vm2, %v9019_v2  ;;  %368 = vst.msk [vmem:[#allocation2 + $0x118] sm:$0x3] %vm334_vm2, %v9019_v2 }
  0x2c   : > { %371 = vst.msk [vmem:[#allocation2 + $0x130] sm:$0x3] %vm334_vm2, %v9019_v2  ;;  %374 = vst.msk [vmem:[#allocation2 + $0x148] sm:$0x3] %vm334_vm2, %v9019_v2 }
  0x2d   : > { %377 = vst.msk [vmem:[#allocation2 + $0x160] sm:$0x3] %vm334_vm2, %v9019_v2  ;;  %380 = vst.msk [vmem:[#allocation2 + $0x178] sm:$0x3] %vm334_vm2, %v9019_v2 }
  0x2e   : > { %383 = vst.msk [vmem:[#allocation2 + $0x190] sm:$0x3] %vm334_vm2, %v9019_v2  ;;  %386 = vst.msk [vmem:[#allocation2 + $0x1a8] sm:$0x3] %vm334_vm2, %v9019_v2  ;;  %v486_v32 = vld [vmem:[#allocation2 + $0x10] sm:$0x3] }
  0x2f   : > { %452 = vst.msk [vmem:[#allocation2 + $0x19] sm:$0xff] %vm331_vm1, %v419_v18  ;;  %453 = vst.msk [vmem:[#allocation2 + $0x21] sm:$0xff] %vm331_vm1, %v420_v19  ;;  %v615_v38 = vmul.f32 %v5854_v14, %v486_v32  ;;  %v860_v44 = vmul.f32 %v5857_v15, %v486_v32 }
  0x30   : > { %454 = vst.msk [vmem:[#allocation2 + $0x31] sm:$0xff] %vm331_vm1, %v421_v20  ;;  %455 = vst.msk [vmem:[#allocation2 + $0x39] sm:$0xff] %vm331_vm1, %v422_v22 }
  0x31   : > { %v713_v47 = vrot.slane %v615_v38, 1  ;;  %v958_v53 = vrot.slane %v860_v44, 2  ;;  %456 = vst.msk [vmem:[#allocation2 + $0x49] sm:$0xff] %vm331_vm1, %v423_v48  ;;  %457 = vst.msk [vmem:[#allocation2 + $0x51] sm:$0xff] %vm331_vm1, %v424_v49 }
  0x32   : > { %458 = vst.msk [vmem:[#allocation2 + $0x61] sm:$0xff] %vm331_vm1, %v425_v54  ;;  %459 = vst.msk [vmem:[#allocation2 + $0x69] sm:$0xff] %vm331_vm1, %v426_v55 }
  0x33   : > { %v714_v61 = vsel %vm709_vm3, %v711_v42, %v713_v47  ;;  %v959_v0 = vsel %vm954_vm4, %v956_v46, %v958_v53  ;;  %460 = vst.msk [vmem:[#allocation2 + $0x79] sm:$0xff] %vm331_vm1, %v427_v62  ;;  %461 = vst.msk [vmem:[#allocation2 + $0x81] sm:$0xff] %vm331_vm1, %v428_v1 }
  0x34   : > { %v823_v63 = vadd.f32 %v714_v61, %v546_v37  ;;  %462 = vst.msk [vmem:[#allocation2 + $0x91] sm:$0xff] %vm331_vm1, %v429_v3  ;;  %463 = vst.msk [vmem:[#allocation2 + $0x99] sm:$0xff] %vm331_vm1, %v430_v10 }
  0x35   : > { %464 = vst.msk [vmem:[#allocation2 + $0xa9] sm:$0xff] %vm331_vm1, %v431_v11  ;;  %465 = vst.msk [vmem:[#allocation2 + $0xb1] sm:$0xff] %vm331_vm1, %v432_v12 }
  0x36   : > { %v487_v4 = vld [vmem:[#allocation2 + $0x18] sm:$0xff]  ;;  %v5908_v5 = vld [vmem:[#allocation2 + $0x20] sm:$0xff]  ;;  %v5935_v40 = vld [vmem:[#allocation2 + $0x28] sm:$0x3]  ;;  %v1068_v43 = vadd.f32 %v959_v0, %v823_v63 }
  0x37   : > { %v5911_v17 = vld [vmem:[#allocation2 + $0x30] sm:$0xff]  ;;  %v5913_v18 = vld [vmem:[#allocation2 + $0x38] sm:$0xff]  ;;  %v1103_v19 = vmul.f32 %v5860_v16, %v487_v4  ;;  %v1171_v20 = vmul.f32 %v5864_v21, %v487_v4  ;;  %v1172_v22 = vmul.f32 %v5864_v21, %v5908_v5  ;;  %v1415_v23 = vmul.f32 %v5867_v25, %v487_v4  ;;  %v5944_v50 = vld [vmem:[#allocation2 + $0x40] sm:$0x3] }
  0x38   : > { %v1416_v24 = vmul.f32 %v5867_v25, %v5908_v5  ;;  %v1659_v28 = vmul.f32 %v5870_v26, %v5911_v17  ;;  %v1727_v29 = vmul.f32 %v5873_v27, %v5911_v17  ;;  %v1728_v30 = vmul.f32 %v5873_v27, %v5913_v18 }
  0x39   : > { %v1135_v31 = vadd.f32 %v1103_v19, %v1067_v9  ;;  %v1267_v32 = vrot.slane %v1171_v20, 1  ;;  %v1268_v33 = vrot.slane %v1172_v22, 1  ;;  %v1511_v34 = vrot.slane %v1415_v23, 2 }
  0x3a   : > { %v1512_v35 = vrot.slane %v1416_v24, 2  ;;  %v1823_v37 = vrot.slane %v1727_v29, 1  ;;  %v1824_v38 = vrot.slane %v1728_v30, 1  ;;  %v1971_v39 = vmul.f32 %v5887_v36, %v5911_v17 }
  0x3b   : > { %v1269_v41 = vsel %vm709_vm3, %v1267_v32, %v1268_v33  ;;  %v1972_v42 = vmul.f32 %v5887_v36, %v5913_v18  ;;  %v1104_v44 = vmul.f32 %v5860_v16, %v5908_v5  ;;  %v1173_v52 = vmul.f32 %v5864_v21, %v5935_v40 }
  0x3c   : > { %v1379_v45 = vadd.f32 %v1269_v41, %v1135_v31  ;;  %v1513_v46 = vsel %vm954_vm4, %v1511_v34, %v1512_v35  ;;  %v1825_v47 = vsel %vm709_vm3, %v1823_v37, %v1824_v38  ;;  %v2067_v48 = vrot.slane %v1971_v39, 2  ;;  %v5981_v39 = vld [vmem:[#allocation2 + $0x48] sm:$0xff] }
  0x3d   : > { %v2068_v49 = vrot.slane %v1972_v42, 2  ;;  %v1136_v51 = vadd.f32 %v1104_v44, %v1068_v43  ;;  %v1417_v53 = vmul.f32 %v5867_v25, %v5935_v40  ;;  %v1660_v55 = vmul.f32 %v5870_v26, %v5913_v18 }
  0x3e   : > { %v1623_v54 = vadd.f32 %v1513_v46, %v1379_v45  ;;  %v1729_v56 = vmul.f32 %v5873_v27, %v5944_v50  ;;  %v1973_v57 = vmul.f32 %v5887_v36, %v5944_v50  ;;  %v1270_v59 = vrot.slane %v1173_v52, 1 }
  0x3f   : > { %v2069_v58 = vsel %vm954_vm4, %v2067_v48, %v2068_v49  ;;  %v1514_v60 = vrot.slane %v1417_v53, 2  ;;  %v547_v61 = vmul.f32 %v5851_v13, %v487_v4  ;;  %v616_v1 = vmul.f32 %v5854_v14, %v487_v4 }
  0x40   : > { %v1691_v62 = vadd.f32 %v1659_v28, %v1623_v54  ;;  %v1826_v63 = vrot.slane %v1729_v56, 1  ;;  %v2070_v0 = vrot.slane %v1973_v57, 2  ;;  %v1271_v3 = vsel %vm709_vm3, %v1268_v33, %v1270_v59 }
  0x41   : > { %v1515_v9 = vsel %vm954_vm4, %v1512_v35, %v1514_v60  ;;  %v5963_v10 = vmul.f32 %v5854_v14, %v5908_v5  ;;  %v861_v11 = vmul.f32 %v5857_v15, %v487_v4  ;;  %v1380_v19 = vadd.f32 %v1271_v3, %v1136_v51 }
  0x42   : > { %v1935_v12 = vadd.f32 %v1825_v47, %v1691_v62  ;;  %v1827_v20 = vsel %vm709_vm3, %v1824_v38, %v1826_v63  ;;  %v2071_v22 = vsel %vm954_vm4, %v2068_v49, %v2070_v0  ;;  %v715_v23 = vrot.slane %v616_v1, 1  ;;  %v5988_v49 = vld [vmem:[#allocation2 + $0x50] sm:$0xff] }
  0x43   : > { %v716_v24 = vrot.slane %v5963_v10, 1  ;;  %v862_v28 = vmul.f32 %v5857_v15, %v5908_v5  ;;  %v960_v29 = vrot.slane %v861_v11, 2  ;;  %v1624_v31 = vadd.f32 %v1515_v9, %v1380_v19 }
  0x44   : > { %v2179_v30 = vadd.f32 %v2069_v58, %v1935_v12  ;;  %v1105_v32 = vmul.f32 %v5860_v16, %v5911_v17  ;;  %v1174_v4 = vmul.f32 %v5864_v21, %v5911_v17  ;;  %v1175_v35 = vmul.f32 %v5864_v21, %v5913_v18 }
  0x45   : > { %v717_v33 = vsel %vm709_vm3, %v715_v23, %v716_v24  ;;  %v961_v34 = vrot.slane %v862_v28, 2  ;;  %v1418_v37 = vmul.f32 %v5867_v25, %v5911_v17  ;;  %v1692_v38 = vadd.f32 %v1660_v55, %v1624_v31  ;;  %v6015_v23 = vld [vmem:[#allocation2 + $0x58] sm:$0x3] }
  0x46   : > { %5378 = vmatprep.mubr.msk.f32.mxu0 %vm331_vm1, %v2179_v30  ;;  %v824_v41 = vadd.f32 %v717_v33, %v547_v61  ;;  %v1272_v42 = vrot.slane %v1174_v4, 1  ;;  %v1419_v43 = vmul.f32 %v5867_v25, %v5913_v18  ;;  %v1273_v45 = vrot.slane %v1175_v35, 1 }
  0x47   : > { %v962_v44 = vsel %vm954_vm4, %v960_v29, %v961_v34  ;;  %v1516_v46 = vrot.slane %v1418_v37, 2  ;;  %v1661_v47 = vmul.f32 %v5870_v26, %v5981_v39  ;;  %v1936_v48 = vadd.f32 %v1827_v20, %v1692_v38 }
  0x48   : > { %v1069_v51 = vadd.f32 %v962_v44, %v824_v41  ;;  %v1517_v52 = vrot.slane %v1419_v43, 2  ;;  %v1730_v53 = vmul.f32 %v5873_v27, %v5981_v39  ;;  %v1274_v54 = vsel %vm709_vm3, %v1272_v42, %v1273_v45 }
  0x49   : > { %v1731_v55 = vmul.f32 %v5873_v27, %v5988_v49  ;;  %v1974_v56 = vmul.f32 %v5887_v36, %v5981_v39  ;;  %v1975_v57 = vmul.f32 %v5887_v36, %v5988_v49  ;;  %v2180_v58 = vadd.f32 %v2071_v22, %v1936_v48 }
  0x4a   : > { %v1137_v59 = vadd.f32 %v1105_v32, %v1069_v51  ;;  %v1518_v60 = vsel %vm954_vm4, %v1516_v46, %v1517_v52  ;;  %v1828_v61 = vrot.slane %v1730_v53, 1  ;;  %v548_v1 = vmul.f32 %v5851_v13, %v5908_v5 }
  0x4b   : > { %v1829_v62 = vrot.slane %v1731_v55, 1  ;;  %v2072_v63 = vrot.slane %v1974_v56, 2  ;;  %v2073_v0 = vrot.slane %v1975_v57, 2  ;;  %5379 = vmatmul.mubr.msk.f32.vlgmr.msra.gmra.mxu0 %vm331_vm1, %v2180_v58  ;;  %v618_v9 = vmul.f32 %v5854_v14, %v5935_v40 }
  0x4c   : > { %v1381_v3 = vadd.f32 %v1274_v54, %v1137_v59  ;;  %v863_v10 = vmul.f32 %v5857_v15, %v5935_v40  ;;  %v1106_v11 = vmul.f32 %v5860_v16, %v5913_v18  ;;  %v1176_v20 = vmul.f32 %v5864_v21, %v5944_v50 }
  0x4d   : > { %v1830_v12 = vsel %vm709_vm3, %v1828_v61, %v1829_v62  ;;  %v2074_v19 = vsel %vm954_vm4, %v2072_v63, %v2073_v0  ;;  %v1420_v5 = vmul.f32 %v5867_v25, %v5944_v50  ;;  %v718_v28 = vrot.slane %v618_v9, 1 }
  0x4e   : > { %v1625_v22 = vadd.f32 %v1518_v60, %v1381_v3  ;;  %v963_v29 = vrot.slane %v863_v10, 2  ;;  %v1662_v40 = vmul.f32 %v5870_v26, %v5988_v49  ;;  %v1275_v30 = vrot.slane %v1176_v20, 1 }
  0x4f   : > { %v1519_v31 = vrot.slane %v1420_v5, 2  ;;  %v1732_v32 = vmul.f32 %v5873_v27, %v6015_v23  ;;  %v1976_v4 = vmul.f32 %v5887_v36, %v6015_v23  ;;  %v719_v35 = vsel %vm709_vm3, %v716_v24, %v718_v28 }
  0x50   : > { %v1693_v33 = vadd.f32 %v1661_v47, %v1625_v22  ;;  %v964_v37 = vsel %vm954_vm4, %v961_v34, %v963_v29  ;;  %v549_v38 = vmul.f32 %v5851_v13, %v5911_v17  ;;  %v825_v41 = vadd.f32 %v719_v35, %v548_v1  ;;  %v6052_v1 = vld [vmem:[#allocation2 + $0x60] sm:$0xff]  ;;  %v6059_v22 = vld [vmem:[#allocation2 + $0x68] sm:$0xff] }
  0x51   : > { %v1276_v42 = vsel %vm709_vm3, %v1273_v45, %v1275_v30  ;;  %v1520_v43 = vsel %vm954_vm4, %v1517_v52, %v1519_v31  ;;  %v1831_v44 = vrot.slane %v1732_v32, 1  ;;  %v2075_v48 = vrot.slane %v1976_v4, 2 }
  0x52   : > { %v1937_v46 = vadd.f32 %v1830_v12, %v1693_v33  ;;  %v619_v51 = vmul.f32 %v5854_v14, %v5911_v17  ;;  %v6033_v47 = vmul.f32 %v5854_v14, %v5913_v18  ;;  %v1070_v24 = vadd.f32 %v964_v37, %v825_v41 }
  0x53   : > { %v1832_v34 = vsel %vm709_vm3, %v1829_v62, %v1831_v44  ;;  %v864_v53 = vmul.f32 %v5857_v15, %v5911_v17  ;;  %v865_v45 = vmul.f32 %v5857_v15, %v5913_v18  ;;  %v2076_v54 = vsel %vm954_vm4, %v2073_v0, %v2075_v48 }
  0x54   : > { %v2181_v52 = vadd.f32 %v2074_v19, %v1937_v46  ;;  %v720_v55 = vrot.slane %v619_v51, 1  ;;  %v721_v56 = vrot.slane %v6033_v47, 1  ;;  %v1138_v57 = vadd.f32 %v1106_v11, %v1070_v24 }
  0x55   : > { %v965_v58 = vrot.slane %v864_v53, 2  ;;  %v966_v59 = vrot.slane %v865_v45, 2  ;;  %v1107_v60 = vmul.f32 %v5860_v16, %v5981_v39  ;;  %v1177_v17 = vmul.f32 %v5864_v21, %v5981_v39 }
  0x56   : > { %5381 = vmatprep.mubr.msk.f32.mxu0 %vm331_vm1, %v2181_v52  ;;  %v722_v61 = vsel %vm709_vm3, %v720_v55, %v721_v56  ;;  %v1178_v62 = vmul.f32 %v5864_v21, %v5988_v49  ;;  %v1421_v63 = vmul.f32 %v5867_v25, %v5981_v39  ;;  %v1382_v0 = vadd.f32 %v1276_v42, %v1138_v57 }
  0x57   : > { %v826_v3 = vadd.f32 %v722_v61, %v549_v38  ;;  %v967_v9 = vsel %vm954_vm4, %v965_v58, %v966_v59  ;;  %v1422_v10 = vmul.f32 %v5867_v25, %v5988_v49  ;;  %v1277_v11 = vrot.slane %v1177_v17, 1 }
  0x58   : > { %v1278_v12 = vrot.slane %v1178_v62, 1  ;;  %v1521_v19 = vrot.slane %v1421_v63, 2  ;;  %v1663_v20 = vmul.f32 %v5870_v26, %v6052_v1  ;;  %v1626_v5 = vadd.f32 %v1520_v43, %v1382_v0 }
  0x59   : > { %v1071_v28 = vadd.f32 %v967_v9, %v826_v3  ;;  %v1522_v29 = vrot.slane %v1422_v10, 2  ;;  %v1733_v30 = vmul.f32 %v5873_v27, %v6052_v1  ;;  %v1734_v32 = vmul.f32 %v5873_v27, %v6059_v22 }
  0x5a   : > { %v1279_v31 = vsel %vm709_vm3, %v1277_v11, %v1278_v12  ;;  %v1977_v4 = vmul.f32 %v5887_v36, %v6052_v1  ;;  %v1978_v33 = vmul.f32 %v5887_v36, %v6059_v22  ;;  %v1694_v35 = vadd.f32 %v1662_v40, %v1626_v5 }
  0x5b   : > { %v1139_v37 = vadd.f32 %v1107_v60, %v1071_v28  ;;  %v1523_v38 = vsel %vm954_vm4, %v1521_v19, %v1522_v29  ;;  %v1833_v41 = vrot.slane %v1733_v30, 1  ;;  %v1834_v42 = vrot.slane %v1734_v32, 1 }
  0x5c   : > { %v2077_v43 = vrot.slane %v1977_v4, 2  ;;  %v2078_v44 = vrot.slane %v1978_v33, 2  ;;  %v550_v46 = vmul.f32 %v5851_v13, %v5913_v18  ;;  %v1938_v48 = vadd.f32 %v1832_v34, %v1694_v35  ;;  %v6083_v34 = vld [vmem:[#allocation2 + $0x70] sm:$0x3] }
  0x5d   : > { %v1383_v51 = vadd.f32 %v1279_v31, %v1139_v37  ;;  %v621_v47 = vmul.f32 %v5854_v14, %v5944_v50  ;;  %v866_v24 = vmul.f32 %v5857_v15, %v5944_v50  ;;  %v1835_v40 = vsel %vm709_vm3, %v1833_v41, %v1834_v42 }
  0x5e   : > { %v2079_v53 = vsel %vm954_vm4, %v2077_v43, %v2078_v44  ;;  %v1108_v45 = vmul.f32 %v5860_v16, %v5988_v49  ;;  %v1179_v52 = vmul.f32 %v5864_v21, %v6015_v23  ;;  %v2182_v55 = vadd.f32 %v2076_v54, %v1938_v48 }
  0x5f   : > { %v1627_v18 = vadd.f32 %v1523_v38, %v1383_v51  ;;  %v723_v57 = vrot.slane %v621_v47, 1  ;;  %v968_v58 = vrot.slane %v866_v24, 2  ;;  %v1423_v50 = vmul.f32 %v5867_v25, %v6015_v23  ;;  %v6122_v47 = vld [vmem:[#allocation2 + $0x78] sm:$0xff] }
  0x60   : > { %v1280_v60 = vrot.slane %v1179_v52, 1  ;;  %v1664_v61 = vmul.f32 %v5870_v26, %v6059_v22  ;;  %v1735_v17 = vmul.f32 %v5873_v27, %v6083_v34  ;;  %5382 = vmatmul.mubr.msk.f32.gmra.mxu0 %vm331_vm1, %v2182_v55  ;;  %v1979_v0 = vmul.f32 %v5887_v36, %v6083_v34  ;;  %v6124_v55 = vld [vmem:[#allocation2 + $0x80] sm:$0xff] }
  0x61   : > { %v1695_v62 = vadd.f32 %v1663_v20, %v1627_v18  ;;  %v724_v54 = vsel %vm709_vm3, %v721_v56, %v723_v57  ;;  %v969_v63 = vsel %vm954_vm4, %v966_v59, %v968_v58  ;;  %v1524_v10 = vrot.slane %v1423_v50, 2 }
  0x62   : > { %v827_v3 = vadd.f32 %v724_v54, %v550_v46  ;;  %v1281_v9 = vsel %vm709_vm3, %v1278_v12, %v1280_v60  ;;  %v1836_v11 = vrot.slane %v1735_v17, 1  ;;  %v2080_v5 = vrot.slane %v1979_v0, 2 }
  0x63   : > { %v1939_v19 = vadd.f32 %v1835_v40, %v1695_v62  ;;  %v551_v28 = vmul.f32 %v5851_v13, %v5981_v39  ;;  %v622_v20 = vmul.f32 %v5854_v14, %v5981_v39  ;;  %v1525_v56 = vsel %vm954_vm4, %v1522_v29, %v1524_v10 }
  0x64   : > { %v1072_v30 = vadd.f32 %v969_v63, %v827_v3  ;;  %v1837_v59 = vsel %vm709_vm3, %v1834_v42, %v1836_v11  ;;  %v623_v31 = vmul.f32 %v5854_v14, %v5988_v49  ;;  %v2081_v12 = vsel %vm954_vm4, %v2078_v44, %v2080_v5 }
  0x65   : > { %v2183_v32 = vadd.f32 %v2079_v53, %v1939_v19  ;;  %v725_v4 = vrot.slane %v622_v20, 1  ;;  %v867_v33 = vmul.f32 %v5857_v15, %v5981_v39  ;;  %v868_v38 = vmul.f32 %v5857_v15, %v5988_v49 }
  0x66   : > { %v1140_v35 = vadd.f32 %v1108_v45, %v1072_v30  ;;  %v726_v37 = vrot.slane %v623_v31, 1  ;;  %v1109_v29 = vmul.f32 %v5860_v16, %v6052_v1  ;;  %v1180_v42 = vmul.f32 %v5864_v21, %v6052_v1 }
  0x67   : > { %5384 = vmatprep.mubr.msk.f32.mxu0 %vm331_vm1, %v2183_v32  ;;  %v970_v41 = vrot.slane %v867_v33, 2  ;;  %v1181_v43 = vmul.f32 %v5864_v21, %v6059_v22  ;;  %v1424_v39 = vmul.f32 %v5867_v25, %v6052_v1  ;;  %v971_v48 = vrot.slane %v868_v38, 2  ;;  %v6151_v38 = vld [vmem:[#allocation2 + $0x88] sm:$0x3] }
  0x68   : > { %v1384_v44 = vadd.f32 %v1281_v9, %v1140_v35  ;;  %v727_v46 = vsel %vm709_vm3, %v725_v4, %v726_v37  ;;  %v1425_v51 = vmul.f32 %v5867_v25, %v6059_v22  ;;  %v1282_v40 = vrot.slane %v1180_v42, 1 }
  0x69   : > { %v828_v24 = vadd.f32 %v727_v46, %v551_v28  ;;  %v1283_v53 = vrot.slane %v1181_v43, 1  ;;  %v1526_v45 = vrot.slane %v1424_v39, 2  ;;  %v972_v18 = vsel %vm954_vm4, %v970_v41, %v971_v48 }
  0x6a   : > { %v1628_v52 = vadd.f32 %v1525_v56, %v1384_v44  ;;  %v1527_v57 = vrot.slane %v1425_v51, 2  ;;  %v1665_v58 = vmul.f32 %v5870_v26, %v6122_v47  ;;  %v1736_v17 = vmul.f32 %v5873_v27, %v6122_v47 }
  0x6b   : > { %v1073_v60 = vadd.f32 %v972_v18, %v828_v24  ;;  %v1284_v50 = vsel %vm709_vm3, %v1282_v40, %v1283_v53  ;;  %v1737_v62 = vmul.f32 %v5873_v27, %v6124_v55  ;;  %v1980_v0 = vmul.f32 %v5887_v36, %v6122_v47 }
  0x6c   : > { %v1696_v54 = vadd.f32 %v1664_v61, %v1628_v52  ;;  %v1528_v63 = vsel %vm954_vm4, %v1526_v45, %v1527_v57  ;;  %v1981_v3 = vmul.f32 %v5887_v36, %v6124_v55  ;;  %v1838_v10 = vrot.slane %v1736_v17, 1 }
  0x6d   : > { %v1141_v9 = vadd.f32 %v1109_v29, %v1073_v60  ;;  %v1839_v11 = vrot.slane %v1737_v62, 1  ;;  %v552_v19 = vmul.f32 %v5851_v13, %v5988_v49  ;;  %v2082_v28 = vrot.slane %v1980_v0, 2 }
  0x6e   : > { %v1940_v5 = vadd.f32 %v1837_v59, %v1696_v54  ;;  %v2083_v20 = vrot.slane %v1981_v3, 2  ;;  %v624_v61 = vmul.f32 %v5854_v14, %v6015_v23  ;;  %v869_v31 = vmul.f32 %v5857_v15, %v6015_v23 }
  0x6f   : > { %v1385_v30 = vadd.f32 %v1284_v50, %v1141_v9  ;;  %v1840_v56 = vsel %vm709_vm3, %v1838_v10, %v1839_v11  ;;  %v1110_v32 = vmul.f32 %v5860_v16, %v6059_v22  ;;  %v1182_v49 = vmul.f32 %v5864_v21, %v6083_v34 }
  0x70   : > { %v2184_v4 = vadd.f32 %v2081_v12, %v1940_v5  ;;  %v2084_v33 = vsel %vm954_vm4, %v2082_v28, %v2083_v20  ;;  %v728_v35 = vrot.slane %v624_v61, 1  ;;  %v973_v29 = vrot.slane %v869_v31, 2  ;;  %v6183_v5 = vld [vmem:[#allocation2 + $0x90] sm:$0xff] }
  0x71   : > { %v1629_v59 = vadd.f32 %v1528_v63, %v1385_v30  ;;  %v1426_v41 = vmul.f32 %v5867_v25, %v6083_v34  ;;  %v1666_v23 = vmul.f32 %v5870_v26, %v6124_v55  ;;  %v1285_v42 = vrot.slane %v1182_v49, 1 }
  0x72   : > { %5385 = vmatmul.mubr.msk.f32.gmra.mxu0 %vm331_vm1, %v2184_v4  ;;  %v729_v12 = vsel %vm709_vm3, %v726_v37, %v728_v35  ;;  %v1738_v43 = vmul.f32 %v5873_v27, %v6151_v38  ;;  %v1982_v39 = vmul.f32 %v5887_v36, %v6151_v38  ;;  %v974_v51 = vsel %vm954_vm4, %v971_v48, %v973_v29  ;;  %v6194_v4 = vld [vmem:[#allocation2 + $0x98] sm:$0xff] }
  0x73   : > { %v1697_v44 = vadd.f32 %v1665_v58, %v1629_v59  ;;  %v829_v46 = vadd.f32 %v729_v12, %v552_v19  ;;  %v1529_v24 = vrot.slane %v1426_v41, 2  ;;  %v1286_v40 = vsel %vm709_vm3, %v1283_v53, %v1285_v42 }
  0x74   : > { %v1841_v45 = vrot.slane %v1738_v43, 1  ;;  %v2085_v52 = vrot.slane %v1982_v39, 2  ;;  %v553_v18 = vmul.f32 %v5851_v13, %v6052_v1  ;;  %v625_v17 = vmul.f32 %v5854_v14, %v6052_v1 }
  0x75   : > { %v1941_v37 = vadd.f32 %v1840_v56, %v1697_v44  ;;  %v1074_v60 = vadd.f32 %v974_v51, %v829_v46  ;;  %v1530_v50 = vsel %vm954_vm4, %v1527_v57, %v1529_v24  ;;  %v626_v48 = vmul.f32 %v5854_v14, %v6059_v22 }
  0x76   : > { %v1842_v58 = vsel %vm709_vm3, %v1839_v11, %v1841_v45  ;;  %v2086_v62 = vsel %vm954_vm4, %v2083_v20, %v2085_v52  ;;  %v870_v53 = vmul.f32 %v5857_v15, %v6052_v1  ;;  %v730_v0 = vrot.slane %v625_v17, 1 }
  0x77   : > { %v2185_v54 = vadd.f32 %v2084_v33, %v1941_v37  ;;  %v1142_v63 = vadd.f32 %v1110_v32, %v1074_v60  ;;  %v871_v3 = vmul.f32 %v5857_v15, %v6059_v22  ;;  %v731_v57 = vrot.slane %v626_v48, 1 }
  0x78   : > { %v975_v9 = vrot.slane %v870_v53, 2  ;;  %v1111_v10 = vmul.f32 %v5860_v16, %v6122_v47  ;;  %v1183_v11 = vmul.f32 %v5864_v21, %v6122_v47  ;;  %v1184_v28 = vmul.f32 %v5864_v21, %v6124_v55 }
  0x79   : > { %5387 = vmatprep.mubr.msk.f32.mxu0 %vm331_vm1, %v2185_v54  ;;  %v1386_v19 = vadd.f32 %v1286_v40, %v1142_v63  ;;  %v976_v1 = vrot.slane %v871_v3, 2  ;;  %v1427_v20 = vmul.f32 %v5867_v25, %v6122_v47  ;;  %v732_v61 = vsel %vm709_vm3, %v730_v0, %v731_v57 }
  0x7a   : > { %v1287_v30 = vrot.slane %v1183_v11, 1  ;;  %v1428_v56 = vmul.f32 %v5867_v25, %v6124_v55  ;;  %v1667_v31 = vmul.f32 %v5870_v26, %v6183_v5  ;;  %v830_v33 = vadd.f32 %v732_v61, %v553_v18 }
  0x7b   : > { %v1630_v32 = vadd.f32 %v1530_v50, %v1386_v19  ;;  %v977_v35 = vsel %vm954_vm4, %v975_v9, %v976_v1  ;;  %v1288_v49 = vrot.slane %v1184_v28, 1  ;;  %v1531_v59 = vrot.slane %v1427_v20, 2 }
  0x7c   : > { %v1532_v29 = vrot.slane %v1428_v56, 2  ;;  %v1739_v41 = vmul.f32 %v5873_v27, %v6183_v5  ;;  %v1740_v12 = vmul.f32 %v5873_v27, %v6194_v4  ;;  %v1075_v43 = vadd.f32 %v977_v35, %v830_v33 }
  0x7d   : > { %v1698_v42 = vadd.f32 %v1666_v23, %v1630_v32  ;;  %v1289_v39 = vsel %vm709_vm3, %v1287_v30, %v1288_v49  ;;  %v1983_v44 = vmul.f32 %v5887_v36, %v6183_v5  ;;  %v1984_v40 = vmul.f32 %v5887_v36, %v6194_v4 }
  0x7e   : > { %v1533_v46 = vsel %vm954_vm4, %v1531_v59, %v1532_v29  ;;  %v1843_v51 = vrot.slane %v1739_v41, 1  ;;  %v1844_v24 = vrot.slane %v1740_v12, 1  ;;  %v1143_v52 = vadd.f32 %v1111_v10, %v1075_v43 }
  0x7f   : > { %v1942_v45 = vadd.f32 %v1842_v58, %v1698_v42  ;;  %v2087_v18 = vrot.slane %v1983_v44, 2  ;;  %v554_v37 = vmul.f32 %v5851_v13, %v6059_v22  ;;  %v2088_v60 = vrot.slane %v1984_v40, 2  ;;  %v6219_v22 = vld [vmem:[#allocation2 + $0xa0] sm:$0x3] }
  0x80   : > { %v1845_v23 = vsel %vm709_vm3, %v1843_v51, %v1844_v24  ;;  %v627_v50 = vmul.f32 %v5854_v14, %v6083_v34  ;;  %v872_v17 = vmul.f32 %v5857_v15, %v6083_v34  ;;  %v1387_v53 = vadd.f32 %v1289_v39, %v1143_v52 }
  0x81   : > { %v2186_v48 = vadd.f32 %v2086_v62, %v1942_v45  ;;  %v1112_v54 = vmul.f32 %v5860_v16, %v6124_v55  ;;  %v1185_v58 = vmul.f32 %v5864_v21, %v6151_v38  ;;  %v2089_v63 = vsel %vm954_vm4, %v2087_v18, %v2088_v60 }
  0x82   : > { %v733_v0 = vrot.slane %v627_v50, 1  ;;  %v978_v3 = vrot.slane %v872_v17, 2  ;;  %v1429_v9 = vmul.f32 %v5867_v25, %v6151_v38  ;;  %v1631_v34 = vadd.f32 %v1533_v46, %v1387_v53  ;;  %v6261_v50 = vld [vmem:[#allocation2 + $0xa8] sm:$0xff] }
  0x83   : > { %5388 = vmatmul.mubr.msk.f32.gmra.mxu0 %vm331_vm1, %v2186_v48  ;;  %v1290_v62 = vrot.slane %v1185_v58, 1  ;;  %v1668_v10 = vmul.f32 %v5870_v26, %v6194_v4  ;;  %v1741_v11 = vmul.f32 %v5873_v27, %v6219_v22  ;;  %v1985_v61 = vmul.f32 %v5887_v36, %v6219_v22 }
  0x84   : > { %v734_v19 = vsel %vm709_vm3, %v731_v57, %v733_v0  ;;  %v979_v28 = vsel %vm954_vm4, %v976_v1, %v978_v3  ;;  %v1534_v20 = vrot.slane %v1429_v9, 2  ;;  %v1699_v30 = vadd.f32 %v1667_v31, %v1631_v34 }
  0x85   : > { %v831_v56 = vadd.f32 %v734_v19, %v554_v37  ;;  %v1291_v32 = vsel %vm709_vm3, %v1288_v49, %v1290_v62  ;;  %v1846_v33 = vrot.slane %v1741_v11, 1  ;;  %v2090_v59 = vrot.slane %v1985_v61, 2 }
  0x86   : > { %v1535_v35 = vsel %vm954_vm4, %v1532_v29, %v1534_v20  ;;  %v555_v41 = vmul.f32 %v5851_v13, %v6122_v47  ;;  %v628_v57 = vmul.f32 %v5854_v14, %v6122_v47  ;;  %v1943_v12 = vadd.f32 %v1845_v23, %v1699_v30 }
  0x87   : > { %v1076_v1 = vadd.f32 %v979_v28, %v831_v56  ;;  %v1847_v42 = vsel %vm709_vm3, %v1844_v24, %v1846_v33  ;;  %v629_v31 = vmul.f32 %v5854_v14, %v6124_v55  ;;  %v2091_v43 = vsel %vm954_vm4, %v2088_v60, %v2090_v59 }
  0x88   : > { %v735_v49 = vrot.slane %v628_v57, 1  ;;  %v873_v29 = vmul.f32 %v5857_v15, %v6122_v47  ;;  %v6246_v39 = vmul.f32 %v5857_v15, %v6124_v55  ;;  %v2187_v44 = vadd.f32 %v2089_v63, %v1943_v12  ;;  %v6264_v63 = vld [vmem:[#allocation2 + $0xb0] sm:$0xff] }
  0x89   : > { %v1144_v46 = vadd.f32 %v1112_v54, %v1076_v1  ;;  %v736_v51 = vrot.slane %v629_v31, 1  ;;  %v1113_v40 = vmul.f32 %v5860_v16, %v6183_v5  ;;  %v1186_v52 = vmul.f32 %v5864_v21, %v6183_v5 }
  0x8a   : > { %v980_v24 = vrot.slane %v873_v29, 2  ;;  %v981_v45 = vrot.slane %v6246_v39, 2  ;;  %v1187_v18 = vmul.f32 %v5864_v21, %v6194_v4  ;;  %5390 = vmatprep.mubr.msk.f32.mxu0 %vm331_vm1, %v2187_v44  ;;  %v1430_v23 = vmul.f32 %v5867_v25, %v6183_v5 }
  0x8b   : > { %v1388_v47 = vadd.f32 %v1291_v32, %v1144_v46  ;;  %v737_v37 = vsel %vm709_vm3, %v735_v49, %v736_v51  ;;  %v1431_v60 = vmul.f32 %v5867_v25, %v6194_v4  ;;  %v1292_v53 = vrot.slane %v1186_v52, 1  ;;  %v6290_v46 = vld [vmem:[#allocation2 + $0xb8] sm:$0x3]  ;;  %v401_v52 = vld [vmem:[%s5842_s16 + $0x70] sm:$0xff] }
  0x8c   : > { %v832_v17 = vadd.f32 %v737_v37, %v555_v41  ;;  %v982_v48 = vsel %vm954_vm4, %v980_v24, %v981_v45  ;;  %v1293_v54 = vrot.slane %v1187_v18, 1  ;;  %v1536_v0 = vrot.slane %v1430_v23, 2  ;;  %v402_v23 = vld [vmem:[%s5842_s16 + $0x78] sm:$0xff] }
  0x8d   : > { %v1632_v58 = vadd.f32 %v1535_v35, %v1388_v47  ;;  %v1537_v3 = vrot.slane %v1431_v60, 2  ;;  %v1669_v9 = vmul.f32 %v5870_v26, %v6261_v50  ;;  %v1742_v11 = vmul.f32 %v5873_v27, %v6261_v50 }
  0x8e   : > { %v1077_v34 = vadd.f32 %v982_v48, %v832_v17  ;;  %v1294_v62 = vsel %vm709_vm3, %v1292_v53, %v1293_v54  ;;  %v1743_v19 = vmul.f32 %v5873_v27, %v6264_v63  ;;  %v1986_v61 = vmul.f32 %v5887_v36, %v6261_v50 }
  0x8f   : > { %v1700_v28 = vadd.f32 %v1668_v10, %v1632_v58  ;;  %v1538_v20 = vsel %vm954_vm4, %v1536_v0, %v1537_v3  ;;  %v1987_v30 = vmul.f32 %v5887_v36, %v6264_v63  ;;  %v1848_v32 = vrot.slane %v1742_v11, 1 }
  0x90   : > { %v1145_v56 = vadd.f32 %v1113_v40, %v1077_v34  ;;  %v1849_v33 = vrot.slane %v1743_v19, 1  ;;  %v556_v35 = vmul.f32 %v5851_v13, %v6124_v55  ;;  %v2092_v41 = vrot.slane %v1986_v61, 2 }
  0x91   : > { %v1944_v59 = vadd.f32 %v1847_v42, %v1700_v28  ;;  %v2093_v57 = vrot.slane %v1987_v30, 2  ;;  %v630_v10 = vmul.f32 %v5854_v14, %v6151_v38  ;;  %v875_v31 = vmul.f32 %v5857_v15, %v6151_v38 }
  0x92   : > { %v1389_v12 = vadd.f32 %v1294_v62, %v1145_v56  ;;  %v1850_v1 = vsel %vm709_vm3, %v1848_v32, %v1849_v33  ;;  %v1114_v49 = vmul.f32 %v5860_v16, %v6194_v4  ;;  %v1188_v39 = vmul.f32 %v5864_v21, %v6219_v22 }
  0x93   : > { %v2188_v29 = vadd.f32 %v2091_v43, %v1944_v59  ;;  %v2094_v55 = vsel %vm954_vm4, %v2092_v41, %v2093_v57  ;;  %v738_v42 = vrot.slane %v630_v10, 1  ;;  %v983_v40 = vrot.slane %v875_v31, 2 }
  0x94   : > { %v1633_v44 = vadd.f32 %v1538_v20, %v1389_v12  ;;  %v1432_v24 = vmul.f32 %v5867_v25, %v6219_v22  ;;  %v1670_v38 = vmul.f32 %v5870_v26, %v6264_v63  ;;  %v1295_v18 = vrot.slane %v1188_v39, 1 }
  0x95   : > { %5391 = vmatmul.mubr.msk.f32.gmra.mxu0 %vm331_vm1, %v2188_v29  ;;  %v739_v43 = vsel %vm709_vm3, %v736_v51, %v738_v42  ;;  %v1744_v47 = vmul.f32 %v5873_v27, %v6290_v46  ;;  %v1988_v37 = vmul.f32 %v5887_v36, %v6290_v46  ;;  %v984_v48 = vsel %vm954_vm4, %v981_v45, %v983_v40 }
  0x96   : > { %v1701_v60 = vadd.f32 %v1669_v9, %v1633_v44  ;;  %v833_v17 = vadd.f32 %v739_v43, %v556_v35  ;;  %v1539_v53 = vrot.slane %v1432_v24, 2  ;;  %v1296_v58 = vsel %vm709_vm3, %v1293_v54, %v1295_v18 }
  0x97   : > { %v1851_v0 = vrot.slane %v1744_v47, 1  ;;  %v2095_v34 = vrot.slane %v1988_v37, 2  ;;  %v433_v62 = vmax.f32 %v401_v52, 0.0  ;;  %v434_v28 = vmax.f32 %v402_v23, 0.0 }
  0x98   : > { %v1945_v11 = vadd.f32 %v1850_v1, %v1701_v60  ;;  %v1078_v51 = vadd.f32 %v984_v48, %v833_v17  ;;  %v1540_v19 = vsel %vm954_vm4, %v1537_v3, %v1539_v53  ;;  %v557_v45 = vmul.f32 %v5851_v13, %v6183_v5 }
  0x99   : > { %v1852_v20 = vsel %vm709_vm3, %v1849_v33, %v1851_v0  ;;  %v2096_v61 = vsel %vm954_vm4, %v2093_v57, %v2095_v34  ;;  %466 = vst.msk [vmem:[#allocation2 + $0xc1] sm:$0xff] %vm331_vm1, %v433_v62  ;;  %v631_v54 = vmul.f32 %v5854_v14, %v6183_v5  ;;  %467 = vst.msk [vmem:[#allocation2 + $0xc9] sm:$0xff] %vm331_vm1, %v434_v28 }
  0x9a   : > { %v2189_v9 = vadd.f32 %v2094_v55, %v1945_v11  ;;  %v1146_v30 = vadd.f32 %v1114_v49, %v1078_v51  ;;  %v632_v3 = vmul.f32 %v5854_v14, %v6194_v4  ;;  %v876_v56 = vmul.f32 %v5857_v15, %v6183_v5 }
  0x9b   : > { %v740_v32 = vrot.slane %v631_v54, 1  ;;  %v877_v33 = vmul.f32 %v5857_v15, %v6194_v4  ;;  %v1115_v35 = vmul.f32 %v5860_v16, %v6261_v50  ;;  %v1189_v59 = vmul.f32 %v5864_v21, %v6261_v50 }
  0x9c   : > { %5393 = vmatprep.mubr.msk.f32.mxu0 %vm331_vm1, %v2189_v9  ;;  %v1390_v41 = vadd.f32 %v1296_v58, %v1146_v30  ;;  %v741_v57 = vrot.slane %v632_v3, 1  ;;  %v985_v10 = vrot.slane %v876_v56, 2  ;;  %v1190_v12 = vmul.f32 %v5864_v21, %v6264_v63  ;;  %v403_v56 = vld [vmem:[%s5842_s16 + $0x80] sm:$0xff] }
  0x9d   : > { %v986_v1 = vrot.slane %v877_v33, 2  ;;  %v1297_v5 = vrot.slane %v1189_v59, 1  ;;  %v1433_v31 = vmul.f32 %v5867_v25, %v6261_v50  ;;  %v6332_v49 = vmul.f32 %v5867_v25, %v6264_v63 }
  0x9e   : > { %v1634_v29 = vadd.f32 %v1540_v19, %v1390_v41  ;;  %v742_v55 = vsel %vm709_vm3, %v740_v32, %v741_v57  ;;  %v1298_v42 = vrot.slane %v1190_v12, 1  ;;  %v558_v39 = vmul.f32 %v5851_v13, %v6194_v4  ;;  %v404_v41 = vld [vmem:[%s5842_s16 + $0x88] sm:$0xff] }
  0x9f   : > { %v834_v44 = vadd.f32 %v742_v55, %v557_v45  ;;  %v987_v40 = vsel %vm954_vm4, %v985_v10, %v986_v1  ;;  %v1541_v24 = vrot.slane %v1433_v31, 2  ;;  %v1542_v52 = vrot.slane %v6332_v49, 2 }
  0xa0   : > { %v1702_v43 = vadd.f32 %v1670_v38, %v1634_v29  ;;  %v6339_v18 = vld [vmem:[#allocation2 + $0xc0] sm:$0xff]  ;;  %v1299_v47 = vsel %vm709_vm3, %v1297_v5, %v1298_v42  ;;  %v633_v37 = vmul.f32 %v5854_v14, %v6219_v22  ;;  %v878_v23 = vmul.f32 %v5857_v15, %v6219_v22  ;;  %v6346_v60 = vld [vmem:[#allocation2 + $0xc8] sm:$0xff] }
  0xa1   : > { %v1079_v4 = vadd.f32 %v987_v40, %v834_v44  ;;  %v1543_v17 = vsel %vm954_vm4, %v1541_v24, %v1542_v52  ;;  %v1671_v48 = vmul.f32 %v5870_v26, %v6339_v18  ;;  %v1745_v38 = vmul.f32 %v5873_v27, %v6339_v18 }
  0xa2   : > { %v1946_v53 = vadd.f32 %v1852_v20, %v1702_v43  ;;  %v1746_v58 = vmul.f32 %v5873_v27, %v6346_v60  ;;  %v1989_v0 = vmul.f32 %v5887_v36, %v6339_v18  ;;  %v1990_v22 = vmul.f32 %v5887_v36, %v6346_v60 }
  0xa3   : > { %v1147_v34 = vadd.f32 %v1115_v35, %v1079_v4  ;;  %v1853_v62 = vrot.slane %v1745_v38, 1  ;;  %v743_v11 = vrot.slane %v633_v37, 1  ;;  %v988_v51 = vrot.slane %v878_v23, 2  ;;  %v6367_v35 = vld [vmem:[#allocation2 + $0xd0] sm:$0x3] }
  0xa4   : > { %v2190_v19 = vadd.f32 %v2096_v61, %v1946_v53  ;;  %v1854_v28 = vrot.slane %v1746_v58, 1  ;;  %v2097_v45 = vrot.slane %v1989_v0, 2  ;;  %v2098_v54 = vrot.slane %v1990_v22, 2 }
  0xa5   : > { %v1391_v20 = vadd.f32 %v1299_v47, %v1147_v34  ;;  %v744_v9 = vsel %vm709_vm3, %v741_v57, %v743_v11  ;;  %v989_v30 = vsel %vm954_vm4, %v986_v1, %v988_v51  ;;  %v1116_v3 = vmul.f32 %v5860_v16, %v6264_v63 }
  0xa6   : > { %5394 = vmatmul.mubr.msk.f32.gmra.mxu0 %vm331_vm1, %v2190_v19  ;;  %v1855_v32 = vsel %vm709_vm3, %v1853_v62, %v1854_v28  ;;  %v2099_v33 = vsel %vm954_vm4, %v2097_v45, %v2098_v54  ;;  %v835_v61 = vadd.f32 %v744_v9, %v558_v39  ;;  %v1191_v59 = vmul.f32 %v5864_v21, %v6290_v46 }
  0xa7   : > { %v1635_v57 = vadd.f32 %v1543_v17, %v1391_v20  ;;  %v1435_v10 = vmul.f32 %v5867_v25, %v6290_v46  ;;  %v1672_v12 = vmul.f32 %v5870_v26, %v6346_v60  ;;  %v1747_v1 = vmul.f32 %v5873_v27, %v6367_v35 }
  0xa8   : > { %v1080_v5 = vadd.f32 %v989_v30, %v835_v61  ;;  %v1300_v31 = vrot.slane %v1191_v59, 1  ;;  %v1991_v49 = vmul.f32 %v5887_v36, %v6367_v35  ;;  %v435_v29 = vmax.f32 %v403_v56, 0.0 }
  0xa9   : > { %v1703_v55 = vadd.f32 %v1671_v48, %v1635_v57  ;;  %v1544_v39 = vrot.slane %v1435_v10, 2  ;;  %v1856_v44 = vrot.slane %v1747_v1, 1  ;;  %v436_v40 = vmax.f32 %v404_v41, 0.0 }
  0xaa   : > { %v1148_v24 = vadd.f32 %v1116_v3, %v1080_v5  ;;  %v1301_v43 = vsel %vm709_vm3, %v1298_v42, %v1300_v31  ;;  %v2100_v47 = vrot.slane %v1991_v49, 2  ;;  %468 = vst.msk [vmem:[#allocation2 + $0xd9] sm:$0xff] %vm331_vm1, %v435_v29  ;;  %v559_v37 = vmul.f32 %v5851_v13, %v6261_v50 }
  0xab   : > { %v1947_v23 = vadd.f32 %v1855_v32, %v1703_v55  ;;  %v1545_v4 = vsel %vm954_vm4, %v1542_v52, %v1544_v39  ;;  %v1857_v17 = vsel %vm709_vm3, %v1854_v28, %v1856_v44  ;;  %469 = vst.msk [vmem:[#allocation2 + $0xe1] sm:$0xff] %vm331_vm1, %v436_v40  ;;  %v634_v48 = vmul.f32 %v5854_v14, %v6261_v50 }
  0xac   : > { %v1392_v38 = vadd.f32 %v1301_v43, %v1148_v24  ;;  %v2101_v53 = vsel %vm954_vm4, %v2098_v54, %v2100_v47  ;;  %v635_v42 = vmul.f32 %v5854_v14, %v6264_v63  ;;  %v879_v58 = vmul.f32 %v5857_v15, %v6261_v50 }
  0xad   : > { %v2191_v0 = vadd.f32 %v2099_v33, %v1947_v23  ;;  %v745_v22 = vrot.slane %v634_v48, 1  ;;  %v880_v52 = vmul.f32 %v5857_v15, %v6264_v63  ;;  %v1117_v34 = vmul.f32 %v5860_v16, %v6339_v18 }
  0xae   : > { %v1636_v62 = vadd.f32 %v1545_v4, %v1392_v38  ;;  %v746_v11 = vrot.slane %v635_v42, 1  ;;  %v990_v51 = vrot.slane %v879_v58, 2  ;;  %v1192_v19 = vmul.f32 %v5864_v21, %v6339_v18 }
  0xaf   : > { %5396 = vmatprep.mubr.msk.f32.mxu0 %vm331_vm1, %v2191_v0  ;;  %v991_v28 = vrot.slane %v880_v52, 2  ;;  %v1193_v50 = vmul.f32 %v5864_v21, %v6346_v60  ;;  %v1436_v45 = vmul.f32 %v5867_v25, %v6339_v18  ;;  %v1437_v54 = vmul.f32 %v5867_v25, %v6346_v60 }
  0xb0   : > { %v1704_v20 = vadd.f32 %v1672_v12, %v1636_v62  ;;  %v747_v9 = vsel %vm709_vm3, %v745_v22, %v746_v11  ;;  %v1302_v30 = vrot.slane %v1192_v19, 1  ;;  %v560_v3 = vmul.f32 %v5851_v13, %v6264_v63 }
  0xb1   : > { %v6410_v56 = vld [vmem:[#allocation2 + $0xd8] sm:$0xff]  ;;  %v836_v32 = vadd.f32 %v747_v9, %v559_v37  ;;  %v992_v33 = vsel %vm954_vm4, %v990_v51, %v991_v28  ;;  %v1303_v61 = vrot.slane %v1193_v50, 1  ;;  %v1546_v59 = vrot.slane %v1436_v45, 2 }
  0xb2   : > { %v1948_v41 = vadd.f32 %v1857_v17, %v1704_v20  ;;  %v6413_v57 = vld [vmem:[#allocation2 + $0xe0] sm:$0xff]  ;;  %v1547_v10 = vrot.slane %v1437_v54, 2  ;;  %v1673_v12 = vmul.f32 %v5870_v26, %v6410_v56  ;;  %v1748_v1 = vmul.f32 %v5873_v27, %v6410_v56  ;;  %v6440_v0 = vld [vmem:[#allocation2 + $0xe8] sm:$0x3]  ;;  %v406_v45 = vld [vmem:[%s5842_s16 + $0x98] sm:$0xff] }
  0xb3   : > { %v1081_v5 = vadd.f32 %v992_v33, %v836_v32  ;;  %v1304_v63 = vsel %vm709_vm3, %v1302_v30, %v1303_v61  ;;  %v1749_v31 = vmul.f32 %v5873_v27, %v6413_v57  ;;  %v1992_v49 = vmul.f32 %v5887_v36, %v6410_v56 }
  0xb4   : > { %v2192_v29 = vadd.f32 %v2101_v53, %v1948_v41  ;;  %v1548_v55 = vsel %vm954_vm4, %v1546_v59, %v1547_v10  ;;  %v1858_v39 = vrot.slane %v1748_v1, 1  ;;  %v1993_v44 = vmul.f32 %v5887_v36, %v6413_v57 }
  0xb5   : > { %v1149_v40 = vadd.f32 %v1117_v34, %v1081_v5  ;;  %v1859_v24 = vrot.slane %v1749_v31, 1  ;;  %v2102_v43 = vrot.slane %v1992_v49, 2  ;;  %v636_v47 = vmul.f32 %v5854_v14, %v6290_v46  ;;  %v405_v34 = vld [vmem:[%s5842_s16 + $0x90] sm:$0xff] }
  0xb6   : > { %5397 = vmatmul.mubr.msk.f32.gmra.mxu0 %vm331_vm1, %v2192_v29  ;;  %v2103_v37 = vrot.slane %v1993_v44, 2  ;;  %v881_v23 = vmul.f32 %v5857_v15, %v6290_v46  ;;  %v1118_v4 = vmul.f32 %v5860_v16, %v6346_v60  ;;  %v1194_v17 = vmul.f32 %v5864_v21, %v6367_v35 }
  0xb7   : > { %v1393_v48 = vadd.f32 %v1304_v63, %v1149_v40  ;;  %v1860_v38 = vsel %vm709_vm3, %v1858_v39, %v1859_v24  ;;  %v748_v53 = vrot.slane %v636_v47, 1  ;;  %v1438_v42 = vmul.f32 %v5867_v25, %v6367_v35 }
  0xb8   : > { %v2104_v58 = vsel %vm954_vm4, %v2102_v43, %v2103_v37  ;;  %v993_v22 = vrot.slane %v881_v23, 2  ;;  %v1305_v46 = vrot.slane %v1194_v17, 1  ;;  %v1674_v52 = vmul.f32 %v5870_v26, %v6413_v57 }
  0xb9   : > { %v1637_v62 = vadd.f32 %v1548_v55, %v1393_v48  ;;  %v749_v51 = vsel %vm709_vm3, %v746_v11, %v748_v53  ;;  %v1549_v19 = vrot.slane %v1438_v42, 2  ;;  %v1750_v50 = vmul.f32 %v5873_v27, %v6440_v0 }
  0xba   : > { %v837_v54 = vadd.f32 %v749_v51, %v560_v3  ;;  %v994_v20 = vsel %vm954_vm4, %v991_v28, %v993_v22  ;;  %v1306_v9 = vsel %vm709_vm3, %v1303_v61, %v1305_v46  ;;  %v1994_v30 = vmul.f32 %v5887_v36, %v6440_v0 }
  0xbb   : > { %v1705_v32 = vadd.f32 %v1673_v12, %v1637_v62  ;;  %v1550_v33 = vsel %vm954_vm4, %v1547_v10, %v1549_v19  ;;  %v1861_v59 = vrot.slane %v1750_v50, 1  ;;  %v437_v41 = vmax.f32 %v405_v34, 0.0 }
  0xbc   : > { %v1082_v1 = vadd.f32 %v994_v20, %v837_v54  ;;  %v2105_v11 = vrot.slane %v1994_v30, 2  ;;  %v438_v5 = vmax.f32 %v406_v45, 0.0  ;;  %v561_v63 = vmul.f32 %v5851_v13, %v6339_v18 }
  0xbd   : > { %v1949_v31 = vadd.f32 %v1860_v38, %v1705_v32  ;;  %v1862_v3 = vsel %vm709_vm3, %v1859_v24, %v1861_v59  ;;  %470 = vst.msk [vmem:[#allocation2 + $0xf1] sm:$0xff] %vm331_vm1, %v437_v41  ;;  %v637_v28 = vmul.f32 %v5854_v14, %v6339_v18  ;;  %v638_v61 = vmul.f32 %v5854_v14, %v6346_v60 }
  0xbe   : > { %v1150_v10 = vadd.f32 %v1118_v4, %v1082_v1  ;;  %v2106_v12 = vsel %vm954_vm4, %v2103_v37, %v2105_v11  ;;  %471 = vst.msk [vmem:[#allocation2 + $0xf9] sm:$0xff] %vm331_vm1, %v438_v5  ;;  %v882_v49 = vmul.f32 %v5857_v15, %v6339_v18  ;;  %v883_v29 = vmul.f32 %v5857_v15, %v6346_v60 }
  0xbf   : > { %v2193_v55 = vadd.f32 %v2104_v58, %v1949_v31  ;;  %v750_v39 = vrot.slane %v637_v28, 1  ;;  %v751_v44 = vrot.slane %v638_v61, 1  ;;  %v1119_v40 = vmul.f32 %v5860_v16, %v6410_v56 }
  0xc0   : > { %v1394_v24 = vadd.f32 %v1306_v9, %v1150_v10  ;;  %v995_v43 = vrot.slane %v882_v49, 2  ;;  %v996_v47 = vrot.slane %v883_v29, 2  ;;  %v1195_v37 = vmul.f32 %v5864_v21, %v6410_v56 }
  0xc1   : > { %5399 = vmatprep.mubr.msk.f32.mxu0 %vm331_vm1, %v2193_v55  ;;  %v752_v23 = vsel %vm709_vm3, %v750_v39, %v751_v44  ;;  %v1196_v18 = vmul.f32 %v5864_v21, %v6413_v57  ;;  %v1439_v4 = vmul.f32 %v5867_v25, %v6410_v56  ;;  %v1440_v17 = vmul.f32 %v5867_v25, %v6413_v57 }
  0xc2   : > { %v1638_v48 = vadd.f32 %v1550_v33, %v1394_v24  ;;  %v838_v38 = vadd.f32 %v752_v23, %v561_v63  ;;  %v997_v53 = vsel %vm954_vm4, %v995_v43, %v996_v47  ;;  %v1307_v42 = vrot.slane %v1195_v37, 1  ;;  %v407_v24 = vld [vmem:[%s5842_s16 + $0xa0] sm:$0xff]  ;;  %v408_v43 = vld [vmem:[%s5842_s16 + $0xa8] sm:$0xff] }
  0xc3   : > { %v1308_v58 = vrot.slane %v1196_v18, 1  ;;  %v1551_v22 = vrot.slane %v1439_v4, 2  ;;  %v1552_v46 = vrot.slane %v1440_v17, 2  ;;  %v562_v34 = vmul.f32 %v5851_v13, %v6346_v60 }
  0xc4   : > { %v1706_v62 = vadd.f32 %v1674_v52, %v1638_v48  ;;  %v6483_v51 = vld [vmem:[#allocation2 + $0xf0] sm:$0xff]  ;;  %v1083_v19 = vadd.f32 %v997_v53, %v838_v38  ;;  %v639_v50 = vmul.f32 %v5854_v14, %v6367_v35  ;;  %v884_v45 = vmul.f32 %v5857_v15, %v6367_v35 }
  0xc5   : > { %v6489_v54 = vld [vmem:[#allocation2 + $0xf8] sm:$0xff]  ;;  %v1309_v20 = vsel %vm709_vm3, %v1307_v42, %v1308_v58  ;;  %v1553_v9 = vsel %vm954_vm4, %v1551_v22, %v1552_v46  ;;  %v1675_v30 = vmul.f32 %v5870_v26, %v6483_v51  ;;  %v1751_v60 = vmul.f32 %v5873_v27, %v6483_v51  ;;  %v6509_v39 = vld [vmem:[#allocation2 + $0x100] sm:$0x3] }
  0xc6   : > { %v1950_v52 = vadd.f32 %v1862_v3, %v1706_v62  ;;  %v1151_v32 = vadd.f32 %v1119_v40, %v1083_v19  ;;  %v1752_v33 = vmul.f32 %v5873_v27, %v6489_v54  ;;  %v1995_v35 = vmul.f32 %v5887_v36, %v6483_v51 }
  0xc7   : > { %v1863_v59 = vrot.slane %v1751_v60, 1  ;;  %v1996_v41 = vmul.f32 %v5887_v36, %v6489_v54  ;;  %v753_v1 = vrot.slane %v639_v50, 1  ;;  %v998_v11 = vrot.slane %v884_v45, 2 }
  0xc8   : > { %v2194_v5 = vadd.f32 %v2106_v12, %v1950_v52  ;;  %v1395_v63 = vadd.f32 %v1309_v20, %v1151_v32  ;;  %v1864_v31 = vrot.slane %v1752_v33, 1  ;;  %v2107_v28 = vrot.slane %v1995_v35, 2 }
  0xc9   : > { %v2108_v3 = vrot.slane %v1996_v41, 2  ;;  %v754_v61 = vsel %vm709_vm3, %v751_v44, %v753_v1  ;;  %v999_v10 = vsel %vm954_vm4, %v996_v47, %v998_v11  ;;  %v1120_v49 = vmul.f32 %v5860_v16, %v6413_v57 }
  0xca   : > { %5400 = vmatmul.mubr.msk.f32.gmra.mxu0 %vm331_vm1, %v2194_v5  ;;  %v1639_v29 = vadd.f32 %v1553_v9, %v1395_v63  ;;  %v1865_v55 = vsel %vm709_vm3, %v1863_v59, %v1864_v31  ;;  %v839_v40 = vadd.f32 %v754_v61, %v562_v34  ;;  %v1197_v12 = vmul.f32 %v5864_v21, %v6440_v0 }
  0xcb   : > { %v2109_v44 = vsel %vm954_vm4, %v2107_v28, %v2108_v3  ;;  %v1441_v47 = vmul.f32 %v5867_v25, %v6440_v0  ;;  %v1676_v37 = vmul.f32 %v5870_v26, %v6489_v54  ;;  %v1753_v23 = vmul.f32 %v5873_v27, %v6509_v39 }
  0xcc   : > { %v1707_v18 = vadd.f32 %v1675_v30, %v1639_v29  ;;  %v1084_v4 = vadd.f32 %v999_v10, %v839_v40  ;;  %v1310_v17 = vrot.slane %v1197_v12, 1  ;;  %v1997_v48 = vmul.f32 %v5887_v36, %v6509_v39 }
  0xcd   : > { %v1554_v38 = vrot.slane %v1441_v47, 2  ;;  %v1866_v53 = vrot.slane %v1753_v23, 1  ;;  %v439_v42 = vmax.f32 %v407_v24, 0.0  ;;  %v440_v22 = vmax.f32 %v408_v43, 0.0 }
  0xce   : > { %v1951_v34 = vadd.f32 %v1865_v55, %v1707_v18  ;;  %v1152_v62 = vadd.f32 %v1120_v49, %v1084_v4  ;;  %v1311_v19 = vsel %vm709_vm3, %v1308_v58, %v1310_v17  ;;  %v2110_v50 = vrot.slane %v1997_v48, 2 }
  0xcf   : > { %v1555_v45 = vsel %vm954_vm4, %v1552_v46, %v1554_v38  ;;  %v1867_v20 = vsel %vm709_vm3, %v1864_v31, %v1866_v53  ;;  %472 = vst.msk [vmem:[#allocation2 + $0x109] sm:$0xff] %vm331_vm1, %v439_v42  ;;  %473 = vst.msk [vmem:[#allocation2 + $0x111] sm:$0xff] %vm331_vm1, %v440_v22  ;;  %v563_v9 = vmul.f32 %v5851_v13, %v6410_v56 }
  0xd0   : > { %v640_v30 = vmul.f32 %v5854_v14, %v6410_v56  ;;  %v2195_v60 = vadd.f32 %v2109_v44, %v1951_v34  ;;  %v1396_v52 = vadd.f32 %v1311_v19, %v1152_v62  ;;  %v2111_v32 = vsel %vm954_vm4, %v2108_v3, %v2110_v50 }
  0xd1   : > { %v641_v58 = vmul.f32 %v5854_v14, %v6413_v57  ;;  %v885_v33 = vmul.f32 %v5857_v15, %v6410_v56  ;;  %v886_v35 = vmul.f32 %v5857_v15, %v6413_v57  ;;  %v1121_v59 = vmul.f32 %v5860_v16, %v6483_v51 }
  0xd2   : > { %v755_v46 = vrot.slane %v640_v30, 1  ;;  %5402 = vmatprep.mubr.msk.f32.mxu0 %vm331_vm1, %v2195_v60  ;;  %v1640_v41 = vadd.f32 %v1555_v45, %v1396_v52  ;;  %v1198_v11 = vmul.f32 %v5864_v21, %v6483_v51  ;;  %v1199_v5 = vmul.f32 %v5864_v21, %v6489_v54 }
  0xd3   : > { %v756_v1 = vrot.slane %v641_v58, 1  ;;  %v1000_v63 = vrot.slane %v885_v33, 2  ;;  %v1001_v31 = vrot.slane %v886_v35, 2  ;;  %v1442_v56 = vmul.f32 %v5867_v25, %v6483_v51  ;;  %v409_v35 = vld [vmem:[%s5842_s16 + $0xb0] sm:$0xff] }
  0xd4   : > { %v1443_v28 = vmul.f32 %v5867_v25, %v6489_v54  ;;  %v1708_v3 = vadd.f32 %v1676_v37, %v1640_v41  ;;  %v1312_v10 = vrot.slane %v1198_v11, 1  ;;  %v1313_v49 = vrot.slane %v1199_v5, 1 }
  0xd5   : > { %v757_v61 = vsel %vm709_vm3, %v755_v46, %v756_v1  ;;  %v1002_v55 = vsel %vm954_vm4, %v1000_v63, %v1001_v31  ;;  %v1556_v40 = vrot.slane %v1442_v56, 2  ;;  %v564_v47 = vmul.f32 %v5851_v13, %v6413_v57 }
  0xd6   : > { %v840_v29 = vadd.f32 %v757_v61, %v563_v9  ;;  %v1557_v12 = vrot.slane %v1443_v28, 2  ;;  %v1952_v24 = vadd.f32 %v1867_v20, %v1708_v3  ;;  %v6553_v43 = vld [vmem:[#allocation2 + $0x108] sm:$0xff]  ;;  %v1314_v44 = vsel %vm709_vm3, %v1312_v10, %v1313_v49  ;;  %v6560_v23 = vld [vmem:[#allocation2 + $0x110] sm:$0xff]  ;;  %v6587_v11 = vld [vmem:[#allocation2 + $0x118] sm:$0x3] }
  0xd7   : > { %v642_v37 = vmul.f32 %v5854_v14, %v6440_v0  ;;  %v1677_v17 = vmul.f32 %v5870_v26, %v6553_v43  ;;  %v1754_v48 = vmul.f32 %v5873_v27, %v6553_v43  ;;  %v1755_v53 = vmul.f32 %v5873_v27, %v6560_v23 }
  0xd8   : > { %v1085_v18 = vadd.f32 %v1002_v55, %v840_v29  ;;  %v1558_v4 = vsel %vm954_vm4, %v1556_v40, %v1557_v12  ;;  %v2196_v38 = vadd.f32 %v2111_v32, %v1952_v24  ;;  %v1998_v57 = vmul.f32 %v5887_v36, %v6553_v43 }
  0xd9   : > { %v1999_v42 = vmul.f32 %v5887_v36, %v6560_v23  ;;  %v1868_v34 = vrot.slane %v1754_v48, 1  ;;  %v758_v62 = vrot.slane %v642_v37, 1  ;;  %v887_v19 = vmul.f32 %v5857_v15, %v6440_v0 }
  0xda   : > { %v1153_v22 = vadd.f32 %v1121_v59, %v1085_v18  ;;  %5403 = vmatmul.mubr.msk.f32.gmra.mxu0 %vm331_vm1, %v2196_v38  ;;  %v1869_v50 = vrot.slane %v1755_v53, 1  ;;  %v2112_v45 = vrot.slane %v1998_v57, 2  ;;  %v1122_v9 = vmul.f32 %v5860_v16, %v6489_v54  ;;  %v410_v59 = vld [vmem:[%s5842_s16 + $0xb8] sm:$0xff] }
  0xdb   : > { %v2113_v20 = vrot.slane %v1999_v42, 2  ;;  %v759_v60 = vsel %vm709_vm3, %v756_v1, %v758_v62  ;;  %v1003_v52 = vrot.slane %v887_v19, 2  ;;  %v1200_v32 = vmul.f32 %v5864_v21, %v6509_v39 }
  0xdc   : > { %v1397_v30 = vadd.f32 %v1314_v44, %v1153_v22  ;;  %v1870_v58 = vsel %vm709_vm3, %v1868_v34, %v1869_v50  ;;  %v841_v0 = vadd.f32 %v759_v60, %v564_v47  ;;  %v1444_v33 = vmul.f32 %v5867_v25, %v6509_v39 }
  0xdd   : > { %v2114_v46 = vsel %vm954_vm4, %v2112_v45, %v2113_v20  ;;  %v1004_v5 = vsel %vm954_vm4, %v1001_v31, %v1003_v52  ;;  %v1315_v1 = vrot.slane %v1200_v32, 1  ;;  %v1678_v63 = vmul.f32 %v5870_v26, %v6560_v23 }
  0xde   : > { %v1641_v41 = vadd.f32 %v1558_v4, %v1397_v30  ;;  %v1086_v56 = vadd.f32 %v1004_v5, %v841_v0  ;;  %v1559_v28 = vrot.slane %v1444_v33, 2  ;;  %v1756_v3 = vmul.f32 %v5873_v27, %v6587_v11 }
  0xdf   : > { %v2000_v61 = vmul.f32 %v5887_v36, %v6587_v11  ;;  %v1316_v29 = vsel %vm709_vm3, %v1313_v49, %v1315_v1  ;;  %v441_v55 = vmax.f32 %v409_v35, 0.0  ;;  %v442_v40 = vmax.f32 %v410_v59, 0.0 }
  0xe0   : > { %v1709_v10 = vadd.f32 %v1677_v17, %v1641_v41  ;;  %v1154_v24 = vadd.f32 %v1122_v9, %v1086_v56  ;;  %v1560_v31 = vsel %vm954_vm4, %v1557_v12, %v1559_v28  ;;  %v1871_v44 = vrot.slane %v1756_v3, 1 }
  0xe1   : > { %v2115_v47 = vrot.slane %v2000_v61, 2  ;;  %474 = vst.msk [vmem:[#allocation2 + $0x121] sm:$0xff] %vm331_vm1, %v441_v55  ;;  %475 = vst.msk [vmem:[#allocation2 + $0x129] sm:$0xff] %vm331_vm1, %v442_v40  ;;  %v565_v18 = vmul.f32 %v5851_v13, %v6483_v51  ;;  %v643_v4 = vmul.f32 %v5854_v14, %v6483_v51  ;;  %v644_v49 = vmul.f32 %v5854_v14, %v6489_v54 }
  0xe2   : > { %v1953_v37 = vadd.f32 %v1870_v58, %v1709_v10  ;;  %v1398_v17 = vadd.f32 %v1316_v29, %v1154_v24  ;;  %v1872_v48 = vsel %vm709_vm3, %v1869_v50, %v1871_v44  ;;  %v888_v38 = vmul.f32 %v5857_v15, %v6483_v51 }
  0xe3   : > { %v2116_v12 = vsel %vm954_vm4, %v2113_v20, %v2115_v47  ;;  %v760_v57 = vrot.slane %v643_v4, 1  ;;  %v761_v42 = vrot.slane %v644_v49, 1  ;;  %v889_v22 = vmul.f32 %v5857_v15, %v6489_v54 }
  0xe4   : > { %v2197_v53 = vadd.f32 %v2114_v46, %v1953_v37  ;;  %v1642_v34 = vadd.f32 %v1560_v31, %v1398_v17  ;;  %v1005_v62 = vrot.slane %v888_v38, 2  ;;  %v1123_v19 = vmul.f32 %v5860_v16, %v6553_v43 }
  0xe5   : > { %v1201_v45 = vmul.f32 %v5864_v21, %v6553_v43  ;;  %v762_v50 = vsel %vm709_vm3, %v760_v57, %v761_v42  ;;  %v1006_v20 = vrot.slane %v889_v22, 2  ;;  %v1202_v51 = vmul.f32 %v5864_v21, %v6560_v23 }
  0xe6   : > { %5405 = vmatprep.mubr.msk.f32.mxu0 %vm331_vm1, %v2197_v53  ;;  %v1445_v9 = vmul.f32 %v5867_v25, %v6553_v43  ;;  %v1710_v30 = vadd.f32 %v1678_v63, %v1642_v34  ;;  %v842_v60 = vadd.f32 %v762_v50, %v565_v18  ;;  %v1446_v32 = vmul.f32 %v5867_v25, %v6560_v23  ;;  %v411_v34 = vld [vmem:[%s5842_s16 + $0xc0] sm:$0xff]  ;;  %v412_v50 = vld [vmem:[%s5842_s16 + $0xc8] sm:$0xff] }
  0xe7   : > { %v1317_v52 = vrot.slane %v1201_v45, 1  ;;  %v1007_v58 = vsel %vm954_vm4, %v1005_v62, %v1006_v20  ;;  %v1318_v46 = vrot.slane %v1202_v51, 1  ;;  %v566_v33 = vmul.f32 %v5851_v13, %v6489_v54 }
  0xe8   : > { %v1561_v0 = vrot.slane %v1445_v9, 2  ;;  %v1954_v35 = vadd.f32 %v1872_v48, %v1710_v30  ;;  %v6627_v59 = vld [vmem:[#allocation2 + $0x120] sm:$0xff]  ;;  %v6629_v41 = vld [vmem:[#allocation2 + $0x128] sm:$0xff]  ;;  %v1087_v5 = vadd.f32 %v1007_v58, %v842_v60  ;;  %v1562_v1 = vrot.slane %v1446_v32, 2  ;;  %v6654_v53 = vld [vmem:[#allocation2 + $0x130] sm:$0x3] }
  0xe9   : > { %v645_v63 = vmul.f32 %v5854_v14, %v6509_v39  ;;  %v1319_v56 = vsel %vm709_vm3, %v1317_v52, %v1318_v46  ;;  %v1679_v28 = vmul.f32 %v5870_v26, %v6627_v59  ;;  %v1757_v3 = vmul.f32 %v5873_v27, %v6627_v59 }
  0xea   : > { %v1758_v54 = vmul.f32 %v5873_v27, %v6629_v41  ;;  %v2198_v61 = vadd.f32 %v2116_v12, %v1954_v35  ;;  %v1155_v10 = vadd.f32 %v1123_v19, %v1087_v5  ;;  %v1563_v29 = vsel %vm954_vm4, %v1561_v0, %v1562_v1 }
  0xeb   : > { %v2001_v55 = vmul.f32 %v5887_v36, %v6627_v59  ;;  %v1873_v40 = vrot.slane %v1757_v3, 1  ;;  %v2002_v31 = vmul.f32 %v5887_v36, %v6629_v41  ;;  %v763_v44 = vrot.slane %v645_v63, 1 }
  0xec   : > { %v1874_v24 = vrot.slane %v1758_v54, 1  ;;  %5406 = vmatmul.mubr.msk.f32.gmra.mxu0 %vm331_vm1, %v2198_v61  ;;  %v1399_v47 = vadd.f32 %v1319_v56, %v1155_v10  ;;  %v890_v18 = vmul.f32 %v5857_v15, %v6509_v39  ;;  %v1124_v4 = vmul.f32 %v5860_v16, %v6560_v23 }
  0xed   : > { %v2117_v37 = vrot.slane %v2001_v55, 2  ;;  %v2118_v17 = vrot.slane %v2002_v31, 2  ;;  %v764_v48 = vsel %vm709_vm3, %v761_v42, %v763_v44  ;;  %v1203_v12 = vmul.f32 %v5864_v21, %v6587_v11 }
  0xee   : > { %v1875_v49 = vsel %vm709_vm3, %v1873_v40, %v1874_v24  ;;  %v1643_v38 = vadd.f32 %v1563_v29, %v1399_v47  ;;  %v843_v57 = vadd.f32 %v764_v48, %v566_v33  ;;  %v1008_v22 = vrot.slane %v890_v18, 2 }
  0xef   : > { %v1447_v39 = vmul.f32 %v5867_v25, %v6587_v11  ;;  %v2119_v62 = vsel %vm954_vm4, %v2117_v37, %v2118_v17  ;;  %v1320_v19 = vrot.slane %v1203_v12, 1  ;;  %v1680_v45 = vmul.f32 %v5870_v26, %v6629_v41 }
  0xf0   : > { %v1759_v42 = vmul.f32 %v5873_v27, %v6654_v53  ;;  %v1711_v51 = vadd.f32 %v1679_v28, %v1643_v38  ;;  %v1009_v9 = vsel %vm954_vm4, %v1006_v20, %v1008_v22  ;;  %v2003_v60 = vmul.f32 %v5887_v36, %v6654_v53 }
  0xf1   : > { %v1564_v30 = vrot.slane %v1447_v39, 2  ;;  %v1088_v52 = vadd.f32 %v1009_v9, %v843_v57  ;;  %v1321_v32 = vsel %vm709_vm3, %v1318_v46, %v1320_v19  ;;  %v443_v0 = vmax.f32 %v411_v34, 0.0 }
  0xf2   : > { %v1876_v58 = vrot.slane %v1759_v42, 1  ;;  %v1955_v33 = vadd.f32 %v1875_v49, %v1711_v51  ;;  %v2120_v5 = vrot.slane %v2003_v60, 2  ;;  %v444_v63 = vmax.f32 %v412_v50, 0.0 }
  0xf3   : > { %v1565_v35 = vsel %vm954_vm4, %v1562_v1, %v1564_v30  ;;  %v1156_v56 = vadd.f32 %v1124_v4, %v1088_v52  ;;  %476 = vst.msk [vmem:[#allocation2 + $0x139] sm:$0xff] %vm331_vm1, %v443_v0  ;;  %v567_v20 = vmul.f32 %v5851_v13, %v6553_v43  ;;  %v646_v28 = vmul.f32 %v5854_v14, %v6553_v43 }
  0xf4   : > { %v1877_v3 = vsel %vm709_vm3, %v1874_v24, %v1876_v58  ;;  %v2199_v54 = vadd.f32 %v2119_v62, %v1955_v33  ;;  %v2121_v46 = vsel %vm954_vm4, %v2118_v17, %v2120_v5  ;;  %477 = vst.msk [vmem:[#allocation2 + $0x141] sm:$0xff] %vm331_vm1, %v444_v63  ;;  %v647_v1 = vmul.f32 %v5854_v14, %v6560_v23 }
  0xf5   : > { %v891_v61 = vmul.f32 %v5857_v15, %v6553_v43  ;;  %v1400_v10 = vadd.f32 %v1321_v32, %v1156_v56  ;;  %v765_v29 = vrot.slane %v646_v28, 1  ;;  %v892_v55 = vmul.f32 %v5857_v15, %v6560_v23 }
  0xf6   : > { %v1125_v40 = vmul.f32 %v5860_v16, %v6627_v59  ;;  %5408 = vmatprep.mubr.msk.f32.mxu0 %vm331_vm1, %v2199_v54  ;;  %v766_v24 = vrot.slane %v647_v1, 1  ;;  %v1204_v44 = vmul.f32 %v5864_v21, %v6627_v59  ;;  %v1205_v47 = vmul.f32 %v5864_v21, %v6629_v41 }
  0xf7   : > { %v1010_v31 = vrot.slane %v891_v61, 2  ;;  %v1644_v37 = vadd.f32 %v1565_v35, %v1400_v10  ;;  %v1011_v43 = vrot.slane %v892_v55, 2  ;;  %v1448_v18 = vmul.f32 %v5867_v25, %v6627_v59 }
  0xf8   : > { %v6695_v4 = vmul.f32 %v5867_v25, %v6629_v41  ;;  %v767_v49 = vsel %vm709_vm3, %v765_v29, %v766_v24  ;;  %v1322_v17 = vrot.slane %v1204_v44, 1  ;;  %v1323_v48 = vrot.slane %v1205_v47, 1 }
  0xf9   : > { %v568_v12 = vmul.f32 %v5851_v13, %v6560_v23  ;;  %v1712_v38 = vadd.f32 %v1680_v45, %v1644_v37  ;;  %v844_v57 = vadd.f32 %v767_v49, %v567_v20  ;;  %v1012_v22 = vsel %vm954_vm4, %v1010_v31, %v1011_v43 }
  0xfa   : > { %v1566_v39 = vrot.slane %v1448_v18, 2  ;;  %v6701_v34 = vld [vmem:[#allocation2 + $0x138] sm:$0xff]  ;;  %v1324_v62 = vsel %vm709_vm3, %v1322_v17, %v1323_v48  ;;  %v1567_v19 = vrot.slane %v6695_v4, 2  ;;  %v648_v42 = vmul.f32 %v5854_v14, %v6587_v11 }
  0xfb   : > { %v893_v50 = vmul.f32 %v5857_v15, %v6587_v11  ;;  %v1956_v51 = vadd.f32 %v1877_v3, %v1712_v38  ;;  %v6709_v9 = vld [vmem:[#allocation2 + $0x140] sm:$0xff]  ;;  %v1089_v23 = vadd.f32 %v1012_v22, %v844_v57  ;;  %v1681_v45 = vmul.f32 %v5870_v26, %v6701_v34  ;;  %v6733_v44 = vld [vmem:[#allocation2 + $0x148] sm:$0x3] }
  0xfc   : > { %v1760_v30 = vmul.f32 %v5873_v27, %v6701_v34  ;;  %v1568_v60 = vsel %vm954_vm4, %v1566_v39, %v1567_v19  ;;  %v1761_v52 = vmul.f32 %v5873_v27, %v6709_v9  ;;  %v2004_v32 = vmul.f32 %v5887_v36, %v6701_v34  ;;  %v6747_v22 = vld [vmem:[%s9014_s5] sm:$0xff] }
  0xfd   : > { %v2005_v11 = vmul.f32 %v5887_v36, %v6709_v9  ;;  %v2200_v58 = vadd.f32 %v2121_v46, %v1956_v51  ;;  %v1157_v0 = vadd.f32 %v1125_v40, %v1089_v23  ;;  %v768_v35 = vrot.slane %v648_v42, 1  ;;  %v413_v46 = vld [vmem:[%s5842_s16 + $0xd0] sm:$0xff]  ;;  %v414_v40 = vld [vmem:[%s5842_s16 + $0xd8] sm:$0xff]  ;;  %5426 = vmatprep.subr.mxu1 %v6747_v22 }
  0xfe   : > { %v1878_v33 = vrot.slane %v1760_v30, 1  ;;  %v1879_v5 = vrot.slane %v1761_v52, 1  ;;  %v2122_v63 = vrot.slane %v2004_v32, 2  ;;  %v1013_v3 = vrot.slane %v893_v50, 2 }
  0xff   : > { %v2123_v56 = vrot.slane %v2005_v11, 2  ;;  %5409 = vmatmul.mubr.msk.f32.gmra.mxu0 %vm331_vm1, %v2200_v58  ;;  %v1401_v20 = vadd.f32 %v1324_v62, %v1157_v0  ;;  %v769_v28 = vsel %vm709_vm3, %v766_v24, %v768_v35  ;;  %v1126_v54 = vmul.f32 %v5860_v16, %v6629_v41 }
 0x100   : > { %v1206_v1 = vmul.f32 %v5864_v21, %v6654_v53  ;;  %v1880_v61 = vsel %vm709_vm3, %v1878_v33, %v1879_v5  ;;  %v845_v29 = vadd.f32 %v769_v28, %v568_v12  ;;  %v1014_v55 = vsel %vm954_vm4, %v1011_v43, %v1013_v3 }
 0x101   : > { %v2124_v10 = vsel %vm954_vm4, %v2122_v63, %v2123_v56  ;;  %v1645_v31 = vadd.f32 %v1568_v60, %v1401_v20  ;;  %v1450_v24 = vmul.f32 %v5867_v25, %v6654_v53  ;;  %v1682_v37 = vmul.f32 %v5870_v26, %v6709_v9 }
 0x102   : > { %v1325_v47 = vrot.slane %v1206_v1, 1  ;;  %v1090_v18 = vadd.f32 %v1014_v55, %v845_v29  ;;  %v1762_v4 = vmul.f32 %v5873_v27, %v6733_v44  ;;  %v2006_v49 = vmul.f32 %v5887_v36, %v6733_v44 }
 0x103   : > { %v445_v17 = vmax.f32 %v413_v46, 0.0  ;;  %v1713_v43 = vadd.f32 %v1681_v45, %v1645_v31  ;;  %v1569_v38 = vrot.slane %v1450_v24, 2  ;;  %v446_v57 = vmax.f32 %v414_v40, 0.0 }
 0x104   : > { %v1326_v12 = vsel %vm709_vm3, %v1323_v48, %v1325_v47  ;;  %v1158_v39 = vadd.f32 %v1126_v54, %v1090_v18  ;;  %v1881_v62 = vrot.slane %v1762_v4, 1  ;;  %v2125_v42 = vrot.slane %v2006_v49, 2 }
 0x105   : > { %478 = vst.msk [vmem:[#allocation2 + $0x151] sm:$0xff] %vm331_vm1, %v445_v17  ;;  %v569_v50 = vmul.f32 %v5851_v13, %v6627_v59  ;;  %v1957_v51 = vadd.f32 %v1880_v61, %v1713_v43  ;;  %v1570_v48 = vsel %vm954_vm4, %v1567_v19, %v1569_v38  ;;  %479 = vst.msk [vmem:[#allocation2 + $0x159] sm:$0xff] %vm331_vm1, %v446_v57 }
 0x106   : > { %v649_v23 = vmul.f32 %v5854_v14, %v6627_v59  ;;  %v650_v45 = vmul.f32 %v5854_v14, %v6629_v41  ;;  %v1402_v30 = vadd.f32 %v1326_v12, %v1158_v39  ;;  %v1882_v60 = vsel %vm709_vm3, %v1879_v5, %v1881_v62 }
 0x107   : > { %v2126_v52 = vsel %vm954_vm4, %v2123_v56, %v2125_v42  ;;  %v894_v32 = vmul.f32 %v5857_v15, %v6627_v59  ;;  %v2201_v11 = vadd.f32 %v2124_v10, %v1957_v51  ;;  %v895_v19 = vmul.f32 %v5857_v15, %v6629_v41 }
 0x108   : > { %v770_v58 = vrot.slane %v649_v23, 1  ;;  %v771_v0 = vrot.slane %v650_v45, 1  ;;  %v1646_v33 = vadd.f32 %v1570_v48, %v1402_v30  ;;  %v1127_v63 = vmul.f32 %v5860_v16, %v6701_v34 }
 0x109   : > { %v1015_v35 = vrot.slane %v894_v32, 2  ;;  %v1207_v3 = vmul.f32 %v5864_v21, %v6701_v34  ;;  %5411 = vmatprep.mubr.msk.f32.mxu0 %vm331_vm1, %v2201_v11  ;;  %v1016_v56 = vrot.slane %v895_v19, 2  ;;  %v1208_v59 = vmul.f32 %v5864_v21, %v6709_v9 }
 0x10a   : > { %v772_v5 = vsel %vm709_vm3, %v770_v58, %v771_v0  ;;  %v1451_v20 = vmul.f32 %v5867_v25, %v6701_v34  ;;  %v1714_v28 = vadd.f32 %v1682_v37, %v1646_v33  ;;  %v1452_v46 = vmul.f32 %v5867_v25, %v6709_v9 }
 0x10b   : > { %v846_v54 = vadd.f32 %v772_v5, %v569_v50  ;;  %v1327_v1 = vrot.slane %v1207_v3, 1  ;;  %v1017_v10 = vsel %vm954_vm4, %v1015_v35, %v1016_v56  ;;  %v1328_v29 = vrot.slane %v1208_v59, 1  ;;  %v415_v35 = vld [vmem:[%s5842_s16 + $0xe0] sm:$0xff] }
 0x10c   : > { %v6777_v61 = vld [vmem:[#allocation2 + $0x150] sm:$0xff]  ;;  %v1571_v55 = vrot.slane %v1451_v20, 2  ;;  %v570_v40 = vmul.f32 %v5851_v13, %v6629_v41  ;;  %v1958_v31 = vadd.f32 %v1882_v60, %v1714_v28  ;;  %v6782_v47 = vld [vmem:[#allocation2 + $0x158] sm:$0xff]  ;;  %v1572_v18 = vrot.slane %v1452_v46, 2  ;;  %v6809_v19 = vld [vmem:[#allocation2 + $0x160] sm:$0x3] }
 0x10d   : > { %v1091_v24 = vadd.f32 %v1017_v10, %v846_v54  ;;  %v1683_v37 = vmul.f32 %v5870_v26, %v6777_v61  ;;  %v1329_v4 = vsel %vm709_vm3, %v1327_v1, %v1328_v29  ;;  %v1763_v49 = vmul.f32 %v5873_v27, %v6777_v61  ;;  %v416_v20 = vld [vmem:[%s5842_s16 + $0xe8] sm:$0xff]  ;;  %v417_v10 = vld [vmem:[%s5842_s16 + $0xf0] sm:$0xff] }
 0x10e   : > { %v1764_v17 = vmul.f32 %v5873_v27, %v6782_v47  ;;  %v2007_v43 = vmul.f32 %v5887_v36, %v6777_v61  ;;  %v2202_v41 = vadd.f32 %v2126_v52, %v1958_v31  ;;  %v1573_v38 = vsel %vm954_vm4, %v1571_v55, %v1572_v18  ;;  %v418_v55 = vld [vmem:[%s5842_s16 + $0xf8] sm:$0xff] }
 0x10f   : > { %v1159_v12 = vadd.f32 %v1127_v63, %v1091_v24  ;;  %v2008_v57 = vmul.f32 %v5887_v36, %v6782_v47  ;;  %v1883_v39 = vrot.slane %v1763_v49, 1  ;;  %v651_v50 = vmul.f32 %v5854_v14, %v6654_v53 }
 0x110   : > { %v1884_v62 = vrot.slane %v1764_v17, 1  ;;  %v2127_v42 = vrot.slane %v2007_v43, 2  ;;  %5412 = vmatmul.mubr.msk.f32.gmra.mxu0 %vm331_vm1, %v2202_v41  ;;  %v896_v23 = vmul.f32 %v5857_v15, %v6654_v53  ;;  %v1128_v45 = vmul.f32 %v5860_v16, %v6709_v9 }
 0x111   : > { %v1403_v51 = vadd.f32 %v1329_v4, %v1159_v12  ;;  %v2128_v48 = vrot.slane %v2008_v57, 2  ;;  %v773_v60 = vrot.slane %v651_v50, 1  ;;  %v1209_v52 = vmul.f32 %v5864_v21, %v6733_v44 }
 0x112   : > { %v1885_v30 = vsel %vm709_vm3, %v1883_v39, %v1884_v62  ;;  %v1453_v32 = vmul.f32 %v5867_v25, %v6733_v44  ;;  %v1018_v53 = vrot.slane %v896_v23, 2  ;;  %v1684_v33 = vmul.f32 %v5870_v26, %v6782_v47 }
 0x113   : > { %v1647_v11 = vadd.f32 %v1573_v38, %v1403_v51  ;;  %v2129_v58 = vsel %vm954_vm4, %v2127_v42, %v2128_v48  ;;  %v774_v63 = vsel %vm709_vm3, %v771_v0, %v773_v60  ;;  %v1330_v3 = vrot.slane %v1209_v52, 1 }
 0x114   : > { %v1574_v5 = vrot.slane %v1453_v32, 2  ;;  %v1765_v59 = vmul.f32 %v5873_v27, %v6809_v19  ;;  %v847_v54 = vadd.f32 %v774_v63, %v570_v40  ;;  %v1019_v1 = vsel %vm954_vm4, %v1016_v56, %v1018_v53 }
 0x115   : > { %v1715_v28 = vadd.f32 %v1683_v37, %v1647_v11  ;;  %v2009_v46 = vmul.f32 %v5887_v36, %v6809_v19  ;;  %v1331_v31 = vsel %vm709_vm3, %v1328_v29, %v1330_v3  ;;  %v447_v4 = vmax.f32 %v415_v35, 0.0 }
 0x116   : > { %v1575_v24 = vsel %vm954_vm4, %v1572_v18, %v1574_v5  ;;  %v1886_v0 = vrot.slane %v1765_v59, 1  ;;  %v1092_v17 = vadd.f32 %v1019_v1, %v847_v54  ;;  %v448_v41 = vmax.f32 %v416_v20, 0.0 }
 0x117   : > { %v1959_v49 = vadd.f32 %v1885_v30, %v1715_v28  ;;  %v2130_v43 = vrot.slane %v2009_v46, 2  ;;  %v449_v40 = vmax.f32 %v417_v10, 0.0  ;;  %v450_v12 = vmax.f32 %v418_v55, 0.0  ;;  %480 = vst.msk [vmem:[#allocation2 + $0x169] sm:$0xff] %vm331_vm1, %v447_v4 }
 0x118   : > { %v1887_v37 = vsel %vm709_vm3, %v1884_v62, %v1886_v0  ;;  %v573_v56 = vmul.f32 %v5851_v13, %v6777_v61  ;;  %v1160_v57 = vadd.f32 %v1128_v45, %v1092_v17  ;;  %481 = vst.msk [vmem:[#allocation2 + $0x171] sm:$0xff] %vm331_vm1, %v448_v41  ;;  %v655_v18 = vmul.f32 %v5854_v14, %v6777_v61 }
 0x119   : > { %v2203_v38 = vadd.f32 %v2129_v58, %v1959_v49  ;;  %v2131_v29 = vsel %vm954_vm4, %v2128_v48, %v2130_v43  ;;  %482 = vst.msk [vmem:[#allocation2 + $0x181] sm:$0xff] %vm331_vm1, %v449_v40  ;;  %483 = vst.msk [vmem:[#allocation2 + $0x189] sm:$0xff] %vm331_vm1, %v450_v12  ;;  %v6837_v39 = vmul.f32 %v5854_v14, %v6782_v47 }
 0x11a   : > { %v900_v62 = vmul.f32 %v5857_v15, %v6777_v61  ;;  %v6843_v42 = vmul.f32 %v5857_v15, %v6782_v47  ;;  %v571_v50 = vmul.f32 %v5851_v13, %v6701_v34  ;;  %v1404_v51 = vadd.f32 %v1331_v31, %v1160_v57 }
 0x11b   : > { %5414 = vmatprep.mubr.msk.f32.mxu0 %vm331_vm1, %v2203_v38  ;;  %v780_v48 = vrot.slane %v655_v18, 1  ;;  %v652_v23 = vmul.f32 %v5854_v14, %v6701_v34  ;;  %v6852_v45 = vmul.f32 %v5854_v14, %v6709_v9  ;;  %v781_v30 = vrot.slane %v6837_v39, 1 }
 0x11c   : > { %v1025_v60 = vrot.slane %v900_v62, 2  ;;  %v1026_v52 = vrot.slane %v6843_v42, 2  ;;  %v897_v32 = vmul.f32 %v5857_v15, %v6701_v34  ;;  %v1648_v11 = vadd.f32 %v1575_v24, %v1404_v51 }
 0x11d   : > { %v775_v58 = vrot.slane %v652_v23, 1  ;;  %v776_v53 = vrot.slane %v6852_v45, 1  ;;  %v6861_v35 = vmul.f32 %v5857_v15, %v6709_v9  ;;  %v782_v63 = vsel %vm709_vm3, %v780_v48, %v781_v30 }
 0x11e   : > { %v1027_v3 = vsel %vm954_vm4, %v1025_v60, %v1026_v52  ;;  %v1020_v5 = vrot.slane %v897_v32, 2  ;;  %v1129_v34 = vmul.f32 %v5860_v16, %v6777_v61  ;;  %v1716_v59 = vadd.f32 %v1684_v33, %v1648_v11  ;;  %v6871_v20 = vld [vmem:[#allocation2 + $0x168] sm:$0xff] }
 0x11f   : > { %v850_v28 = vadd.f32 %v782_v63, %v573_v56  ;;  %v777_v54 = vsel %vm709_vm3, %v775_v58, %v776_v53  ;;  %v1021_v1 = vrot.slane %v6861_v35, 2  ;;  %v6877_v46 = vld [vmem:[#allocation2 + $0x170] sm:$0xff]  ;;  %v1131_v10 = vmul.f32 %v5860_v16, %v6871_v20  ;;  %v4971_v35 = vld [vmem:[%s9016_s7] sm:$0xf] }
 0x120   : > { %v1213_v55 = vmul.f32 %v5864_v21, %v6871_v20  ;;  %v1457_v33 = vmul.f32 %v5867_v25, %v6871_v20  ;;  %v848_v31 = vadd.f32 %v777_v54, %v571_v50  ;;  %v1960_v24 = vadd.f32 %v1887_v37, %v1716_v59  ;;  %v6885_v0 = vld [vmem:[#allocation2 + $0x180] sm:$0xff]  ;;  %v6887_v4 = vld [vmem:[#allocation2 + $0x188] sm:$0xff]  ;;  %v6971_v2 = vld [vmem:[#allocation2 + $0x190] sm:$0x3]  ;;  %5476 = vmatprep.subr.msk.mxu0 %vm2315_vm0, %v4971_v35 }
 0x121   : > { %v1095_v49 = vadd.f32 %v1027_v3, %v850_v28  ;;  %v6891_v17 = vmul.f32 %v5864_v21, %v6877_v46  ;;  %v6895_v43 = vmul.f32 %v5867_v25, %v6877_v46  ;;  %v1687_v12 = vmul.f32 %v5870_v26, %v6885_v0  ;;  %5477 = vmatpush3.msk.msra.mxu0 %vm2315_vm0, %v4971_v35 }
 0x122   : > { %v1337_v41 = vrot.slane %v1213_v55, 1  ;;  %v1581_v40 = vrot.slane %v1457_v33, 2  ;;  %v1769_v37 = vmul.f32 %v5873_v27, %v6885_v0  ;;  %v2204_v56 = vadd.f32 %v2131_v29, %v1960_v24 }
 0x123   : > { %v1163_v38 = vadd.f32 %v1131_v10, %v1095_v49  ;;  %v1338_v57 = vrot.slane %v6891_v17, 1  ;;  %v1582_v18 = vrot.slane %v6895_v43, 2  ;;  %v6905_v62 = vmul.f32 %v5873_v27, %v6887_v4 }
 0x124   : > { %v1893_v50 = vrot.slane %v1769_v37, 1  ;;  %v2013_v51 = vmul.f32 %v5887_v36, %v6885_v0  ;;  %v6911_v48 = vmul.f32 %v5887_v36, %v6887_v4  ;;  %5415 = vmatmul.mubr.msk.f32.gmra.mxu0 %vm331_vm1, %v2204_v56  ;;  %v1022_v60 = vsel %vm954_vm4, %v1020_v5, %v1021_v1 }
 0x125   : > { %v1339_v29 = vsel %vm709_vm3, %v1337_v41, %v1338_v57  ;;  %v1583_v23 = vsel %vm954_vm4, %v1581_v40, %v1582_v18  ;;  %v1210_v32 = vmul.f32 %v5864_v21, %v6777_v61  ;;  %v1894_v58 = vrot.slane %v6905_v62, 1 }
 0x126   : > { %v1407_v11 = vadd.f32 %v1339_v29, %v1163_v38  ;;  %v2137_v63 = vrot.slane %v2013_v51, 2  ;;  %v2138_v3 = vrot.slane %v6911_v48, 2  ;;  %v1093_v59 = vadd.f32 %v1022_v60, %v848_v31 }
 0x127   : > { %v6929_v28 = vmul.f32 %v5864_v21, %v6782_v47  ;;  %v1332_v54 = vrot.slane %v1210_v32, 1  ;;  %v1454_v10 = vmul.f32 %v5867_v25, %v6777_v61  ;;  %v1895_v5 = vsel %vm709_vm3, %v1893_v50, %v1894_v58  ;;  %v6965_v32 = vld [vmem:[#allocation2 + $0x178] sm:$0x3] }
 0x128   : > { %v1651_v55 = vadd.f32 %v1583_v23, %v1407_v11  ;;  %v6938_v33 = vmul.f32 %v5867_v25, %v6782_v47  ;;  %v2139_v31 = vsel %vm954_vm4, %v2137_v63, %v2138_v3  ;;  %v1161_v24 = vadd.f32 %v1129_v34, %v1093_v59 }
 0x129   : > { %v1333_v49 = vrot.slane %v6929_v28, 1  ;;  %v1576_v41 = vrot.slane %v1454_v10, 2  ;;  %v1766_v37 = vmul.f32 %v5873_v27, %v6871_v20  ;;  %v6949_v56 = vmul.f32 %v5873_v27, %v6877_v46 }
 0x12a   : > { %v1719_v40 = vadd.f32 %v1687_v12, %v1651_v55  ;;  %v1577_v61 = vrot.slane %v6938_v33, 2  ;;  %v1685_v34 = vmul.f32 %v5870_v26, %v6871_v20  ;;  %v2010_v50 = vmul.f32 %v5887_v36, %v6871_v20 }
 0x12b   : > { %v1334_v38 = vsel %vm709_vm3, %v1332_v54, %v1333_v49  ;;  %v6960_v12 = vmul.f32 %v5887_v36, %v6877_v46  ;;  %v1888_v60 = vrot.slane %v1766_v37, 1  ;;  %v9022_v11 = vrot.slane %v6949_v56, 1 }
 0x12c   : > { %v1963_v51 = vadd.f32 %v1895_v5, %v1719_v40  ;;  %v1405_v29 = vadd.f32 %v1334_v38, %v1161_v24  ;;  %v1578_v23 = vsel %vm954_vm4, %v1576_v41, %v1577_v61  ;;  %v2132_v63 = vrot.slane %v2010_v50, 2 }
 0x12d   : > { %v9021_v59 = vrot.slane %v6960_v12, 2  ;;  %v657_v54 = vmul.f32 %v5854_v14, %v6809_v19  ;;  %v574_v5 = vmul.f32 %v5851_v13, %v6782_v47  ;;  %v902_v24 = vmul.f32 %v5857_v15, %v6809_v19 }
 0x12e   : > { %v2207_v10 = vadd.f32 %v2139_v31, %v1963_v51  ;;  %v1649_v55 = vadd.f32 %v1578_v23, %v1405_v29  ;;  %v1890_v41 = vsel %vm709_vm3, %v1888_v60, %v9022_v11  ;;  %v1132_v37 = vmul.f32 %v5860_v16, %v6877_v46 }
 0x12f   : > { %v783_v40 = vrot.slane %v657_v54, 1  ;;  %v1215_v31 = vmul.f32 %v5864_v21, %v6965_v32  ;;  %v2134_v50 = vsel %vm954_vm4, %v2132_v63, %v9021_v59  ;;  %v1028_v51 = vrot.slane %v902_v24, 2 }
 0x130   : > { %5420 = vmatprep.mubr.msk.f32.mxu1 %vm331_vm1, %v2207_v10  ;;  %v1717_v38 = vadd.f32 %v1685_v34, %v1649_v55  ;;  %v1459_v29 = vmul.f32 %v5867_v25, %v6965_v32  ;;  %v1771_v54 = vmul.f32 %v5873_v27, %v6971_v2  ;;  %v2015_v10 = vmul.f32 %v5887_v36, %v6971_v2 }
 0x131   : > { %v784_v23 = vsel %vm709_vm3, %v781_v30, %v783_v40  ;;  %v1340_v60 = vrot.slane %v1215_v31, 1  ;;  %v1029_v63 = vsel %vm954_vm4, %v1026_v52, %v1028_v51  ;;  %v1688_v30 = vmul.f32 %v5870_v26, %v6887_v4 }
 0x132   : > { %v1961_v34 = vadd.f32 %v1890_v41, %v1717_v38  ;;  %v851_v55 = vadd.f32 %v784_v23, %v574_v5  ;;  %v1584_v24 = vrot.slane %v1459_v29, 2  ;;  %v1896_v40 = vrot.slane %v1771_v54, 1  ;;  %v7009_v5 = vpop.f32.mrf.mxu0 }
 0x133   : > { %v1341_v39 = vsel %vm709_vm3, %v1338_v57, %v1340_v60  ;;  %v2140_v31 = vrot.slane %v2015_v10, 2  ;;  %v572_v41 = vmul.f32 %v5851_v13, %v6709_v9  ;;  %v654_v42 = vmul.f32 %v5854_v14, %v6733_v44 }
 0x134   : > { %v2205_v59 = vadd.f32 %v2134_v50, %v1961_v34  ;;  %v1096_v11 = vadd.f32 %v1029_v63, %v851_v55  ;;  %v1585_v52 = vsel %vm954_vm4, %v1582_v18, %v1584_v24  ;;  %v1897_v17 = vsel %vm709_vm3, %v1894_v58, %v1896_v40  ;;  %v7036_v51 = vpop.f32.mrf.mxu0 }
 0x135   : > { %v2141_v57 = vsel %vm954_vm4, %v2138_v3, %v2140_v31  ;;  %v899_v9 = vmul.f32 %v5857_v15, %v6733_v44  ;;  %v778_v50 = vrot.slane %v654_v42, 1  ;;  %v1212_v43 = vmul.f32 %v5864_v21, %v6809_v19 }
 0x136   : > { %5417 = vmatprep.mubr.msk.f32.mxu0 %vm331_vm1, %v2205_v59  ;;  %v1164_v38 = vadd.f32 %v1132_v37, %v1096_v11  ;;  %v1456_v18 = vmul.f32 %v5867_v25, %v6809_v19  ;;  %v1130_v58 = vmul.f32 %v5860_v16, %v6782_v47  ;;  %v1768_v48 = vmul.f32 %v5873_v27, %v6965_v32  ;;  %v7049_v10 = vpop.f32.mrf.mxu0 }
 0x137   : > { %v1023_v62 = vrot.slane %v899_v9, 2  ;;  %v2012_v44 = vmul.f32 %v5887_v36, %v6965_v32  ;;  %v779_v11 = vsel %vm709_vm3, %v776_v53, %v778_v50  ;;  %v1335_v59 = vrot.slane %v1212_v43, 1  ;;  %v536_v50 = vld [vmem:[#allocation2 + $0x1a0] sm:$0xff] }
 0x138   : > { %v1408_v3 = vadd.f32 %v1341_v39, %v1164_v38  ;;  %v1579_v37 = vrot.slane %v1456_v18, 2  ;;  %v849_v19 = vadd.f32 %v779_v11, %v572_v41  ;;  %v1686_v29 = vmul.f32 %v5870_v26, %v6877_v46  ;;  %v535_v38 = vld [vmem:[#allocation2 + $0x198] sm:$0xff] }
 0x139   : > { %v1024_v47 = vsel %vm954_vm4, %v1021_v1, %v1023_v62  ;;  %v1891_v23 = vrot.slane %v1768_v48, 1  ;;  %v1336_v45 = vsel %vm709_vm3, %v1333_v49, %v1335_v59  ;;  %v2135_v54 = vrot.slane %v2012_v44, 2 }
 0x13a   : > { %v1652_v60 = vadd.f32 %v1585_v52, %v1408_v3  ;;  %v1580_v53 = vsel %vm954_vm4, %v1577_v61, %v1579_v37  ;;  %v1094_v1 = vadd.f32 %v1024_v47, %v849_v19  ;;  %v9025_v34 = vrot.slane %v6949_v56, 1  ;;  %v7079_v52 = vpop.f32.mrf.mxu0 }
 0x13b   : > { %v575_v28 = vmul.f32 %v5851_v13, %v6871_v20  ;;  %v658_v33 = vmul.f32 %v5854_v14, %v6871_v20  ;;  %v7064_v61 = vmul.f32 %v5854_v14, %v6877_v46  ;;  %v903_v63 = vmul.f32 %v5857_v15, %v6871_v20 }
 0x13c   : > { %v1892_v55 = vsel %vm709_vm3, %v9025_v34, %v1891_v23  ;;  %v1720_v49 = vadd.f32 %v1688_v30, %v1652_v60  ;;  %v7070_v56 = vmul.f32 %v5857_v15, %v6877_v46  ;;  %v1162_v24 = vadd.f32 %v1130_v58, %v1094_v1  ;;  %v7097_v60 = vpop.f32.mrf.mxu0 }
 0x13d   : > { %v785_v39 = vrot.slane %v658_v33, 1  ;;  %v1133_v40 = vmul.f32 %v5860_v16, %v6885_v0  ;;  %v1216_v30 = vmul.f32 %v5864_v21, %v6885_v0  ;;  %v786_v41 = vrot.slane %v7064_v61, 1 }
 0x13e   : > { %v1964_v31 = vadd.f32 %v1897_v17, %v1720_v49  ;;  %v1030_v42 = vrot.slane %v903_v63, 2  ;;  %v1031_v20 = vrot.slane %v7070_v56, 2  ;;  %v1406_v9 = vadd.f32 %v1336_v45, %v1162_v24  ;;  %v537_v56 = vld [vmem:[#allocation2 + $0x1a8] sm:$0x3] }
 0x13f   : > { %v1217_v43 = vmul.f32 %v5864_v21, %v6887_v4  ;;  %v1342_v18 = vrot.slane %v1216_v30, 1  ;;  %v1460_v62 = vmul.f32 %v5867_v25, %v6885_v0  ;;  %v787_v17 = vsel %vm709_vm3, %v785_v39, %v786_v41  ;;  %v7115_v30 = vpop.f32.mrf.mxu0 }
 0x140   : > { %v2208_v58 = vadd.f32 %v2141_v57, %v1964_v31  ;;  %v1032_v48 = vsel %vm954_vm4, %v1030_v42, %v1031_v20  ;;  %v1461_v44 = vmul.f32 %v5867_v25, %v6887_v4  ;;  %v1650_v3 = vadd.f32 %v1580_v53, %v1406_v9 }
 0x141   : > { %v852_v11 = vadd.f32 %v787_v17, %v575_v28  ;;  %v1343_v59 = vrot.slane %v1217_v43, 1  ;;  %v1586_v37 = vrot.slane %v1460_v62, 2  ;;  %v9026_v19 = vrot.slane %v6960_v12, 2  ;;  %v7138_v43 = vld [vmem:[%s9012_s3] ss:$0 sm:$0xff] }
 0x142   : > { %5421 = vmatmul.mubr.msk.f32.vlgmr.msra.gmra.mxu1 %vm331_vm1, %v2208_v58  ;;  %v1587_v23 = vrot.slane %v1461_v44, 2  ;;  %v1772_v0 = vmul.f32 %v5873_v27, %v535_v38  ;;  %v7095_v57 = vmul.f32 %v5873_v27, %v536_v50  ;;  %v1718_v45 = vadd.f32 %v1686_v29, %v1650_v3 }
 0x143   : > { %v2136_v47 = vsel %vm954_vm4, %v9026_v19, %v2135_v54  ;;  %v1097_v35 = vadd.f32 %v1032_v48, %v852_v11  ;;  %v1689_v53 = vmul.f32 %v5870_v26, %v535_v38  ;;  %v2016_v1 = vmul.f32 %v5887_v36, %v535_v38  ;;  %5427 = vmatpush3.msra.mxu1 %v6747_v22 }
 0x144   : > { %v1344_v12 = vsel %vm709_vm3, %v1342_v18, %v1343_v59  ;;  %v1898_v34 = vrot.slane %v1772_v0, 1  ;;  %v1899_v54 = vrot.slane %v7095_v57, 1  ;;  %v7105_v28 = vmul.f32 %v5887_v36, %v536_v50  ;;  %v7143_v18 = vpop.f32.mrf.mxu0 }
 0x145   : > { %v1962_v33 = vadd.f32 %v1892_v55, %v1718_v45  ;;  %v1165_v49 = vadd.f32 %v1133_v40, %v1097_v35  ;;  %v1588_v61 = vsel %vm954_vm4, %v1586_v37, %v1587_v23  ;;  %v2142_v29 = vrot.slane %v2016_v1, 2 }
 0x146   : > { %v2143_v63 = vrot.slane %v7105_v28, 2  ;;  %v576_v24 = vmul.f32 %v5851_v13, %v6877_v46  ;;  %v660_v22 = vmul.f32 %v5854_v14, %v6965_v32  ;;  %v905_v39 = vmul.f32 %v5857_v15, %v6965_v32  ;;  %v2415_v37 = vpop.f32.mrf.mxu0 }
 0x147   : > { %v2206_v31 = vadd.f32 %v2136_v47, %v1962_v33  ;;  %v1409_v55 = vadd.f32 %v1344_v12, %v1165_v49  ;;  %v1900_v40 = vsel %vm709_vm3, %v1898_v34, %v1899_v54  ;;  %v1218_v42 = vmul.f32 %v5864_v21, %v6971_v2 }
 0x148   : > { %v788_v9 = vrot.slane %v660_v22, 1  ;;  %v1033_v38 = vrot.slane %v905_v39, 2  ;;  %v7124_v13 = vmul.f32 %v5860_v16, %v6887_v4  ;;  %v1462_v14 = vmul.f32 %v5867_v25, %v6971_v2 }
 0x149   : > { %5418 = vmatmul.mubr.msk.f32.gmra.mxu0 %vm331_vm1, %v2206_v31  ;;  %v1653_v15 = vadd.f32 %v1588_v61, %v1409_v55  ;;  %v7132_v46 = vsel %vm954_vm4, %v2142_v29, %v2143_v63  ;;  %v1345_v32 = vrot.slane %v1218_v42, 1  ;;  %v1774_v21 = vmul.f32 %v5873_v27, %v537_v56 }
 0x14a   : > { %v789_v16 = vsel %vm709_vm3, %v786_v41, %v788_v9  ;;  %v1034_v2 = vsel %vm954_vm4, %v1031_v20, %v1033_v38  ;;  %v1589_v25 = vrot.slane %v1462_v14, 2  ;;  %v2018_v4 = vmul.f32 %v5887_v36, %v537_v56 }
 0x14b   : > { %v1721_v62 = vadd.f32 %v1689_v53, %v1653_v15  ;;  %v853_v58 = vadd.f32 %v789_v16, %v576_v24  ;;  %v7146_v17 = vmul.f32 %v5870_v26, %v536_v50  ;;  %v1901_v27 = vrot.slane %v1774_v21, 1  ;;  %v2719_v53 = vld [vmem:[%s9013_s4] sm:$0x7] }
 0x14c   : > { %v7149_v48 = vsel %vm709_vm3, %v1343_v59, %v1345_v32  ;;  %v2145_v44 = vrot.slane %v2018_v4, 2  ;;  %v7153_v41 = vadd.f32 %v7009_v5, %v7138_v43  ;;  %v7160_v3 = vsel %vm954_vm4, %v1587_v23, %v1589_v25 }
 0x14d   : > { %v7155_v20 = vadd.f32 %v1900_v40, %v1721_v62  ;;  %v7157_v36 = vadd.f32 %v1034_v2, %v853_v58  ;;  %v9027_v26 = vmov 0.0   ;;  %v7237_v5 = vsel %vm709_vm3, %v1899_v54, %v1901_v27 }
 0x14e   : > { %2550 = vst.msk [vmem:[#allocation3 + $0x20] sm:$0xff] %vm2544_vm5, %v9027_v26  ;;  %2545 = vst.msk [vmem:[#allocation3] sm:$0xff] %vm2544_vm5, %v9027_v26  ;;  %v7242_v50 = vsel %vm954_vm4, %v2143_v63, %v2145_v44  ;;  %v2601_v11 = vmax.f32 %v7153_v41, 0.0  ;;  %v2386_v59 = vadd.f32 %v7138_v43, %v7036_v51  ;;  %v2401_v23 = vadd.f32 %v7049_v10, %v7138_v43 }
 0x14f   : > { %2546 = vst.msk [vmem:[#allocation3 + $0x8] sm:$0xff] %vm2544_vm5, %v9027_v26  ;;  %2549 = vst.msk [vmem:[#allocation3 + $0x18] sm:$0xff] %vm2544_vm5, %v9027_v26  ;;  %v2209_v19 = vadd.f32 %v7132_v46, %v7155_v20  ;;  %v1166_v47 = vadd.f32 %v7124_v13, %v7157_v36  ;;  %v2396_v0 = vadd.f32 %v7138_v43, %v7079_v52  ;;  %v5600_v38 = vmov -inf  }
 0x150   : > { %2552 = vst.msk [vmem:[#allocation3 + $0x30] sm:$0xff] %vm2544_vm5, %v9027_v26  ;;  %2553 = vst.msk [vmem:[#allocation3 + $0x38] sm:$0xff] %vm2544_vm5, %v9027_v26  ;;  %v2600_v57 = vmax.f32 %v2386_v59, 0.0  ;;  %v2411_v45 = vadd.f32 %v7097_v60, %v7138_v43  ;;  %v2406_v51 = vadd.f32 %v7138_v43, %v7115_v30  ;;  %v2421_v35 = vadd.f32 %v7143_v18, %v7138_v43  ;;  %v2720_v60 = vld [vmem:[%s9013_s4 + $0x4] sm:$0x7] }
 0x151   : > { %2555 = vst.msk [vmem:[#allocation3 + $0x48] sm:$0xff] %vm2544_vm5, %v9027_v26  ;;  %2556 = vst.msk [vmem:[#allocation3 + $0x50] sm:$0xff] %vm2544_vm5, %v9027_v26  ;;  %5423 = vmatprep.mubr.msk.f32.mxu1 %vm331_vm1, %v2209_v19  ;;  %v1410_v10 = vadd.f32 %v7149_v48, %v1166_v47  ;;  %v2603_v52 = vmax.f32 %v2401_v23, 0.0  ;;  %v2602_v1 = vmax.f32 %v2396_v0, 0.0  ;;  %v2416_v12 = vadd.f32 %v7138_v43, %v2415_v37 }
 0x152   : > { %2558 = vst.msk [vmem:[#allocation3 + $0x60] sm:$0xff] %vm2544_vm5, %v9027_v26  ;;  %2559 = vst.msk [vmem:[#allocation3 + $0x68] sm:$0xff] %vm2544_vm5, %v9027_v26  ;;  %v2605_v34 = vmax.f32 %v2411_v45, 0.0  ;;  %v2604_v54 = vmax.f32 %v2406_v51, 0.0  ;;  %v2607_v28 = vmax.f32 %v2421_v35, 0.0  ;;  %v7309_v33 = vrot.slane %v2719_v53, %v5833_v6 }
 0x153   : > { %2561 = vst.msk [vmem:[#allocation3 + $0x78] sm:$0xff] %vm2544_vm5, %v9027_v26  ;;  %2562 = vst.msk [vmem:[#allocation3 + $0x80] sm:$0xff] %vm2544_vm5, %v9027_v26  ;;  %v1654_v49 = vadd.f32 %v7160_v3, %v1410_v10  ;;  %v2606_v61 = vmax.f32 %v2416_v12, 0.0  ;;  %v7315_v29 = vrot.slane %v2719_v53, %v5835_v7  ;;  %v7318_v63 = vrot.slane %v2719_v53, %v5837_v8  ;;  %v2721_v3 = vld [vmem:[%s9013_s4 + $0x8] sm:$0x7] }
 0x154   : > { %2564 = vst.msk [vmem:[#allocation3 + $0x90] sm:$0xff] %vm2544_vm5, %v9027_v26  ;;  %2565 = vst.msk [vmem:[#allocation3 + $0x98] sm:$0xff] %vm2544_vm5, %v9027_v26  ;;  %v7326_v22 = vrot.slane %v2720_v60, %v5833_v6  ;;  %v7329_v39 = vrot.slane %v2720_v60, %v5835_v7  ;;  %v7332_v30 = vrot.slane %v2720_v60, %v5837_v8 }
 0x155   : > { %2567 = vst.msk [vmem:[#allocation3 + $0xa8] sm:$0xff] %vm2544_vm5, %v9027_v26  ;;  %2568 = vst.msk [vmem:[#allocation3 + $0xb0] sm:$0xff] %vm2544_vm5, %v9027_v26  ;;  %v2665_v56 = vld [vmem:[#allocation3] sm:$0xff]  ;;  %v1722_v31 = vadd.f32 %v7146_v17, %v1654_v49  ;;  %v5392_v13 = vpop.f32.mrf.mxu0  ;;  %v7376_v47 = vrot.slane %v2721_v3, %v5833_v6 }
 0x156   : > { %2570 = vst.msk [vmem:[#allocation3 + $0xc0] sm:$0xff] %vm2544_vm5, %v9027_v26  ;;  %2571 = vst.msk [vmem:[#allocation3 + $0xc8] sm:$0xff] %vm2544_vm5, %v9027_v26  ;;  %v7323_v24 = vld [vmem:[#allocation3 + $0x8] sm:$0xff]  ;;  %v2726_v40 = vmul.f32 %v7309_v33, %v2665_v56  ;;  %v2794_v42 = vmul.f32 %v7315_v29, %v2665_v56  ;;  %v3038_v15 = vmul.f32 %v7318_v63, %v2665_v56 }
 0x157   : > { %2573 = vst.msk [vmem:[#allocation3 + $0xd8] sm:$0xff] %vm2544_vm5, %v9027_v26  ;;  %2574 = vst.msk [vmem:[#allocation3 + $0xe0] sm:$0xff] %vm2544_vm5, %v9027_v26  ;;  %v2795_v9 = vmul.f32 %v7315_v29, %v7323_v24  ;;  %v3039_v46 = vmul.f32 %v7318_v63, %v7323_v24  ;;  %v1966_v21 = vadd.f32 %v7237_v5, %v1722_v31  ;;  %v2425_v18 = vpop.f32.mrf.mxu0 }
 0x158   : > { %2576 = vst.msk [vmem:[#allocation3 + $0xf0] sm:$0xff] %vm2544_vm5, %v9027_v26  ;;  %2577 = vst.msk [vmem:[#allocation3 + $0xf8] sm:$0xff] %vm2544_vm5, %v9027_v26  ;;  %v2431_v2 = vadd.f32 %v5392_v13, %v7138_v43  ;;  %v2890_v25 = vrot.slane %v2794_v42, 1  ;;  %v3134_v58 = vrot.slane %v3038_v15, 2  ;;  %v2426_v41 = vadd.f32 %v7138_v43, %v2425_v18 }
 0x159   : > { %2579 = vst.msk [vmem:[#allocation3 + $0x108] sm:$0xff] %vm2544_vm5, %v9027_v26  ;;  %2580 = vst.msk [vmem:[#allocation3 + $0x110] sm:$0xff] %vm2544_vm5, %v9027_v26  ;;  %v2891_v4 = vrot.slane %v2795_v9, 1  ;;  %v3135_v17 = vrot.slane %v3039_v46, 2  ;;  %v2210_v48 = vadd.f32 %v7242_v50, %v1966_v21  ;;  %v7432_v13 = vrot.slane %v2721_v3, %v5835_v7 }
 0x15a   : > { %2582 = vst.msk [vmem:[#allocation3 + $0x120] sm:$0xff] %vm2544_vm5, %v9027_v26  ;;  %2583 = vst.msk [vmem:[#allocation3 + $0x128] sm:$0xff] %vm2544_vm5, %v9027_v26  ;;  %v2609_v44 = vmax.f32 %v2431_v2, 0.0  ;;  %v2727_v21 = vmul.f32 %v7309_v33, %v7323_v24 }
 0x15b   : > { %2585 = vst.msk [vmem:[#allocation3 + $0x138] sm:$0xff] %vm2544_vm5, %v9027_v26  ;;  %2586 = vst.msk [vmem:[#allocation3 + $0x140] sm:$0xff] %vm2544_vm5, %v9027_v26  ;;  %v3136_v19 = vsel %vm954_vm4, %v3134_v58, %v3135_v17  ;;  %5424 = vmatmul.mubr.msk.f32.gmra.mxu1 %vm331_vm1, %v2210_v48 }
 0x15c   : > { %2588 = vst.msk [vmem:[#allocation3 + $0x150] sm:$0xff] %vm2544_vm5, %v9027_v26  ;;  %2589 = vst.msk [vmem:[#allocation3 + $0x158] sm:$0xff] %vm2544_vm5, %v9027_v26 }
 0x15d   : > { %2591 = vst.msk [vmem:[#allocation3 + $0x168] sm:$0xff] %vm2544_vm5, %v9027_v26  ;;  %2592 = vst.msk [vmem:[#allocation3 + $0x170] sm:$0xff] %vm2544_vm5, %v9027_v26 }
 0x15e   : > { %2594 = vst.msk [vmem:[#allocation3 + $0x180] sm:$0xff] %vm2544_vm5, %v9027_v26  ;;  %2595 = vst.msk [vmem:[#allocation3 + $0x188] sm:$0xff] %vm2544_vm5, %v9027_v26 }
 0x15f   : > { %2597 = vst.msk [vmem:[#allocation3 + $0x198] sm:$0xff] %vm2544_vm5, %v9027_v26  ;;  %2598 = vst.msk [vmem:[#allocation3 + $0x1a0] sm:$0xff] %vm2544_vm5, %v9027_v26 }
 0x160   : > { %2551 = vst.msk [vmem:[#allocation3 + $0x28] sm:$0x3] %vm2547_vm6, %v9027_v26  ;;  %2548 = vst.msk [vmem:[#allocation3 + $0x10] sm:$0x3] %vm2547_vm6, %v9027_v26 }
 0x161   : > { %2554 = vst.msk [vmem:[#allocation3 + $0x40] sm:$0x3] %vm2547_vm6, %v9027_v26  ;;  %2557 = vst.msk [vmem:[#allocation3 + $0x58] sm:$0x3] %vm2547_vm6, %v9027_v26 }
 0x162   : > { %2560 = vst.msk [vmem:[#allocation3 + $0x70] sm:$0x3] %vm2547_vm6, %v9027_v26  ;;  %2563 = vst.msk [vmem:[#allocation3 + $0x88] sm:$0x3] %vm2547_vm6, %v9027_v26 }
 0x163   : > { %2566 = vst.msk [vmem:[#allocation3 + $0xa0] sm:$0x3] %vm2547_vm6, %v9027_v26  ;;  %2569 = vst.msk [vmem:[#allocation3 + $0xb8] sm:$0x3] %vm2547_vm6, %v9027_v26 }
 0x164   : > { %2572 = vst.msk [vmem:[#allocation3 + $0xd0] sm:$0x3] %vm2547_vm6, %v9027_v26  ;;  %2575 = vst.msk [vmem:[#allocation3 + $0xe8] sm:$0x3] %vm2547_vm6, %v9027_v26 }
 0x165   : > { %2578 = vst.msk [vmem:[#allocation3 + $0x100] sm:$0x3] %vm2547_vm6, %v9027_v26  ;;  %2581 = vst.msk [vmem:[#allocation3 + $0x118] sm:$0x3] %vm2547_vm6, %v9027_v26 }
 0x166   : > { %2584 = vst.msk [vmem:[#allocation3 + $0x130] sm:$0x3] %vm2547_vm6, %v9027_v26  ;;  %2587 = vst.msk [vmem:[#allocation3 + $0x148] sm:$0x3] %vm2547_vm6, %v9027_v26 }
 0x167   : > { %2590 = vst.msk [vmem:[#allocation3 + $0x160] sm:$0x3] %vm2547_vm6, %v9027_v26  ;;  %2593 = vst.msk [vmem:[#allocation3 + $0x178] sm:$0x3] %vm2547_vm6, %v9027_v26  ;;  %v2667_v55 = vld [vmem:[#allocation3 + $0x10] sm:$0x3] }
 0x168   : > { %2596 = vst.msk [vmem:[#allocation3 + $0x190] sm:$0x3] %vm2547_vm6, %v9027_v26  ;;  %2599 = vst.msk [vmem:[#allocation3 + $0x1a8] sm:$0x3] %vm2547_vm6, %v9027_v26  ;;  %v2796_v14 = vmul.f32 %v7315_v29, %v2667_v55  ;;  %v3040_v32 = vmul.f32 %v7318_v63, %v2667_v55  ;;  %v2892_v26 = vsel %vm709_vm3, %v2890_v25, %v2891_v4 }
 0x169   : > { %2634 = vst.msk [vmem:[#allocation3 + $0x21] sm:$0xff] %vm2544_vm5, %v2601_v11  ;;  %2633 = vst.msk [vmem:[#allocation3 + $0x19] sm:$0xff] %vm2544_vm5, %v2600_v57  ;;  %v3002_v37 = vadd.f32 %v2892_v26, %v2726_v40  ;;  %v2608_v57 = vmax.f32 %v2426_v41, 0.0 }
 0x16a   : > { %2636 = vst.msk [vmem:[#allocation3 + $0x39] sm:$0xff] %vm2544_vm5, %v2603_v52  ;;  %2635 = vst.msk [vmem:[#allocation3 + $0x31] sm:$0xff] %vm2544_vm5, %v2602_v1  ;;  %v2893_v62 = vrot.slane %v2796_v14, 1  ;;  %v3137_v27 = vrot.slane %v3040_v32, 2  ;;  %v7435_v14 = vrot.slane %v2721_v3, %v5837_v8 }
 0x16b   : > { %2638 = vst.msk [vmem:[#allocation3 + $0x51] sm:$0xff] %vm2544_vm5, %v2605_v34  ;;  %2637 = vst.msk [vmem:[#allocation3 + $0x49] sm:$0xff] %vm2544_vm5, %v2604_v54  ;;  %v3246_v53 = vadd.f32 %v3136_v19, %v3002_v37 }
 0x16c   : > { %2640 = vst.msk [vmem:[#allocation3 + $0x69] sm:$0xff] %vm2544_vm5, %v2607_v28  ;;  %2639 = vst.msk [vmem:[#allocation3 + $0x61] sm:$0xff] %vm2544_vm5, %v2606_v61  ;;  %v2894_v50 = vsel %vm709_vm3, %v2891_v4, %v2893_v62  ;;  %v3138_v54 = vsel %vm954_vm4, %v3135_v17, %v3137_v27 }
 0x16d   : > { %4719 = vst.msk [vmem:[#allocation3] sm:$0xff] %vm2544_vm5, %v5600_v38  ;;  %4720 = vst.msk [vmem:[#allocation3 + $0x8] sm:$0xff] %vm2544_vm5, %v5600_v38 }
 0x16e   : > { %4721 = vst.msk [vmem:[#allocation3 + $0x10] sm:$0x3] %vm2547_vm6, %v5600_v38 }
 0x16f   : > { %2642 = vst.msk [vmem:[#allocation3 + $0x81] sm:$0xff] %vm2544_vm5, %v2609_v44  ;;  %2641 = vst.msk [vmem:[#allocation3 + $0x79] sm:$0xff] %vm2544_vm5, %v2608_v57  ;;  %v3003_v44 = vadd.f32 %v2894_v50, %v2727_v21 }
 0x170   : > { %v7352_v16 = vld [vmem:[#allocation3 + $0x28] sm:$0x3]  ;;  %v7359_v20 = vld [vmem:[#allocation3 + $0x18] sm:$0xff]  ;;  %v7361_v36 = vld [vmem:[#allocation3 + $0x20] sm:$0xff] }
 0x171   : > { %4724 = vst.msk [vmem:[#allocation3 + $0x28] sm:$0x3] %vm2547_vm6, %v5600_v38  ;;  %v7367_v5 = vld [vmem:[#allocation3 + $0x40] sm:$0x3]  ;;  %v7369_v11 = vld [vmem:[#allocation3 + $0x30] sm:$0xff]  ;;  %v7371_v59 = vld [vmem:[#allocation3 + $0x38] sm:$0xff]  ;;  %v3282_v6 = vmul.f32 %v7326_v22, %v7359_v20  ;;  %v3350_v45 = vmul.f32 %v7329_v39, %v7359_v20  ;;  %v3351_v51 = vmul.f32 %v7329_v39, %v7361_v36  ;;  %v3352_v10 = vmul.f32 %v7329_v39, %v7352_v16 }
 0x172   : > { %4722 = vst.msk [vmem:[#allocation3 + $0x18] sm:$0xff] %vm2544_vm5, %v5600_v38  ;;  %4723 = vst.msk [vmem:[#allocation3 + $0x20] sm:$0xff] %vm2544_vm5, %v5600_v38  ;;  %v7385_v23 = vld [vmem:[#allocation3 + $0x58] sm:$0x3]  ;;  %v7400_v35 = vld [vmem:[#allocation3 + $0x48] sm:$0xff]  ;;  %v3594_v52 = vmul.f32 %v7332_v30, %v7359_v20  ;;  %v3595_v1 = vmul.f32 %v7332_v30, %v7361_v36  ;;  %v3596_v61 = vmul.f32 %v7332_v30, %v7352_v16 }
 0x173   : > { %4727 = vst.msk [vmem:[#allocation3 + $0x40] sm:$0x3] %vm2547_vm6, %v5600_v38  ;;  %v7387_v0 = vld [vmem:[#allocation3 + $0x70] sm:$0x3]  ;;  %4730 = vst.msk [vmem:[#allocation3 + $0x58] sm:$0x3] %vm2547_vm6, %v5600_v38  ;;  %v3314_v56 = vadd.f32 %v3282_v6, %v3246_v53  ;;  %v3838_v32 = vmul.f32 %v7376_v47, %v7369_v11  ;;  %v3906_v25 = vmul.f32 %v7432_v13, %v7369_v11 }
 0x174   : > { %4725 = vst.msk [vmem:[#allocation3 + $0x30] sm:$0xff] %vm2544_vm5, %v5600_v38  ;;  %4726 = vst.msk [vmem:[#allocation3 + $0x38] sm:$0xff] %vm2544_vm5, %v5600_v38  ;;  %v7412_v12 = vld [vmem:[#allocation3 + $0x50] sm:$0xff]  ;;  %v7416_v60 = vld [vmem:[#allocation3 + $0x60] sm:$0xff]  ;;  %v3446_v28 = vrot.slane %v3350_v45, 1  ;;  %v3447_v49 = vrot.slane %v3351_v51, 1  ;;  %v3907_v7 = vmul.f32 %v7432_v13, %v7371_v59  ;;  %v3908_v8 = vmul.f32 %v7432_v13, %v7367_v5 }
 0x175   : > { %4733 = vst.msk [vmem:[#allocation3 + $0x70] sm:$0x3] %vm2547_vm6, %v5600_v38  ;;  %v7418_v34 = vld [vmem:[#allocation3 + $0x68] sm:$0xff]  ;;  %v3449_v31 = vrot.slane %v3352_v10, 1  ;;  %v3690_v55 = vrot.slane %v3594_v52, 2  ;;  %v3691_v40 = vrot.slane %v3595_v1, 2  ;;  %v4150_v62 = vmul.f32 %v7435_v14, %v7369_v11 }
 0x176   : > { %4728 = vst.msk [vmem:[#allocation3 + $0x48] sm:$0xff] %vm2544_vm5, %v5600_v38  ;;  %4729 = vst.msk [vmem:[#allocation3 + $0x50] sm:$0xff] %vm2544_vm5, %v5600_v38  ;;  %v3448_v42 = vsel %vm709_vm3, %v3446_v28, %v3447_v49  ;;  %v3693_v9 = vrot.slane %v3596_v61, 2  ;;  %v7449_v4 = vld [vmem:[#allocation3 + $0x88] sm:$0x3]  ;;  %v4151_v24 = vmul.f32 %v7435_v14, %v7371_v59  ;;  %v4152_v58 = vmul.f32 %v7435_v14, %v7367_v5  ;;  %v7460_v19 = vld [vmem:[#allocation3 + $0x78] sm:$0xff]  ;;  %v5395_v28 = vpop.f32.mrf.mxu0 }
 0x177   : > { %4731 = vst.msk [vmem:[#allocation3 + $0x60] sm:$0xff] %vm2544_vm5, %v5600_v38  ;;  %4732 = vst.msk [vmem:[#allocation3 + $0x68] sm:$0xff] %vm2544_vm5, %v5600_v38  ;;  %v3450_v15 = vsel %vm709_vm3, %v3447_v49, %v3449_v31  ;;  %v3558_v46 = vadd.f32 %v3448_v42, %v3314_v56  ;;  %v3692_v2 = vsel %vm954_vm4, %v3690_v55, %v3691_v40  ;;  %v4002_v27 = vrot.slane %v3906_v25, 1  ;;  %v7462_v57 = vld [vmem:[#allocation3 + $0x80] sm:$0xff] }
 0x178   : > { %4736 = vst.msk [vmem:[#allocation3 + $0x88] sm:$0x3] %vm2547_vm6, %v5600_v38  ;;  %v3694_v17 = vsel %vm954_vm4, %v3691_v40, %v3693_v9  ;;  %v4003_v48 = vrot.slane %v3907_v7, 1  ;;  %v4005_v3 = vrot.slane %v3908_v8, 1  ;;  %v4246_v26 = vrot.slane %v4150_v62, 2  ;;  %v2435_v9 = vpop.f32.mrf.mxu0 }
 0x179   : > { %v3802_v18 = vadd.f32 %v3692_v2, %v3558_v46  ;;  %v4247_v37 = vrot.slane %v4151_v24, 2  ;;  %v4249_v45 = vrot.slane %v4152_v58, 2  ;;  %v3247_v51 = vadd.f32 %v3138_v54, %v3003_v44  ;;  %4734 = vst.msk [vmem:[#allocation3 + $0x78] sm:$0xff] %vm2544_vm5, %v5600_v38  ;;  %4735 = vst.msk [vmem:[#allocation3 + $0x80] sm:$0xff] %vm2544_vm5, %v5600_v38 }
 0x17a   : > { %v4004_v6 = vsel %vm709_vm3, %v4002_v27, %v4003_v48  ;;  %v3283_v53 = vmul.f32 %v7326_v22, %v7361_v36  ;;  %v4006_v50 = vsel %vm709_vm3, %v4003_v48, %v4005_v3  ;;  %v3839_v1 = vmul.f32 %v7376_v47, %v7371_v59 }
 0x17b   : > { %v3870_v41 = vadd.f32 %v3838_v32, %v3802_v18  ;;  %v4248_v52 = vsel %vm954_vm4, %v4246_v26, %v4247_v37  ;;  %v2728_v54 = vmul.f32 %v7309_v33, %v7359_v20  ;;  %v2797_v61 = vmul.f32 %v7315_v29, %v7359_v20 }
 0x17c   : > { %v3315_v49 = vadd.f32 %v3283_v53, %v3247_v51  ;;  %v7481_v56 = vmul.f32 %v7315_v29, %v7361_v36  ;;  %v2441_v31 = vadd.f32 %v5395_v28, %v7138_v43  ;;  %v3041_v40 = vmul.f32 %v7318_v63, %v7359_v20 }
 0x17d   : > { %v4114_v10 = vadd.f32 %v4004_v6, %v3870_v41  ;;  %v7488_v42 = vmul.f32 %v7318_v63, %v7361_v36  ;;  %v2895_v32 = vrot.slane %v2797_v61, 1  ;;  %v3284_v2 = vmul.f32 %v7326_v22, %v7369_v11 }
 0x17e   : > { %v3559_v46 = vadd.f32 %v3450_v15, %v3315_v49  ;;  %v2896_v21 = vrot.slane %v7481_v56, 1  ;;  %v2611_v25 = vmax.f32 %v2441_v31, 0.0  ;;  %v2436_v7 = vadd.f32 %v7138_v43, %v2435_v9 }
 0x17f   : > { %v4358_v55 = vadd.f32 %v4248_v52, %v4114_v10  ;;  %v3139_v8 = vrot.slane %v3041_v40, 2  ;;  %v3140_v20 = vrot.slane %v7488_v42, 2  ;;  %v3353_v15 = vmul.f32 %v7329_v39, %v7369_v11 }
 0x180   : > { %v3803_v18 = vadd.f32 %v3694_v17, %v3559_v46  ;;  %v2897_v62 = vsel %vm709_vm3, %v2895_v32, %v2896_v21  ;;  %v7503_v24 = vmul.f32 %v7329_v39, %v7371_v59  ;;  %2644 = vst.msk [vmem:[#allocation3 + $0x99] sm:$0xff] %vm2544_vm5, %v2611_v25  ;;  %v2610_v58 = vmax.f32 %v2436_v7, 0.0  ;;  %v5277_v25 = vld [vmem:[%s5842_s16 + $0x20] ss:$2 sm:$0xff] }
 0x181   : > { %5428 = vmatprep.mubr.msk.f32.mxu1 %vm2544_vm5, %v4358_v55  ;;  %v3004_v27 = vadd.f32 %v2897_v62, %v2728_v54  ;;  %v3141_v48 = vsel %vm954_vm4, %v3139_v8, %v3140_v20  ;;  %v3597_v17 = vmul.f32 %v7332_v30, %v7369_v11  ;;  %v3451_v41 = vrot.slane %v3353_v15, 1 }
 0x182   : > { %v3871_v44 = vadd.f32 %v3839_v1, %v3803_v18  ;;  %v3452_v3 = vrot.slane %v7503_v24, 1  ;;  %v3598_v26 = vmul.f32 %v7332_v30, %v7371_v59  ;;  %2643 = vst.msk [vmem:[#allocation3 + $0x91] sm:$0xff] %vm2544_vm5, %v2610_v58  ;;  %v4250_v6 = vsel %vm954_vm4, %v4247_v37, %v4249_v45 }
 0x183   : > { %v3248_v51 = vadd.f32 %v3141_v48, %v3004_v27  ;;  %v3695_v53 = vrot.slane %v3597_v17, 2  ;;  %v3909_v10 = vmul.f32 %v7432_v13, %v7400_v35  ;;  %v3910_v49 = vmul.f32 %v7432_v13, %v7412_v12 }
 0x184   : > { %v4115_v52 = vadd.f32 %v4006_v50, %v3871_v44  ;;  %v3453_v1 = vsel %vm709_vm3, %v3451_v41, %v3452_v3  ;;  %v3696_v28 = vrot.slane %v3598_v26, 2  ;;  %v4153_v31 = vmul.f32 %v7435_v14, %v7400_v35 }
 0x185   : > { %v3316_v54 = vadd.f32 %v3284_v2, %v3248_v51  ;;  %v4007_v61 = vrot.slane %v3909_v10, 1  ;;  %v7525_v37 = vmul.f32 %v7435_v14, %v7412_v12  ;;  %v3840_v50 = vmul.f32 %v7376_v47, %v7400_v35  ;;  %v4956_v2 = vld [vmem:[%s5842_s16] ss:$2 sm:$0xff] }
 0x186   : > { %v4359_v45 = vadd.f32 %v4250_v6, %v4115_v52  ;;  %v4008_v55 = vrot.slane %v3910_v49, 1  ;;  %v4251_v9 = vrot.slane %v4153_v31, 2  ;;  %v2799_v32 = vmul.f32 %v7315_v29, %v7352_v16  ;;  %5478 = vmatprep.mubr.msk.f32.mxu0 %vm331_vm1, %v4956_v2  ;;  %v5398_v52 = vpop.f32.mrf.mxu0 }
 0x187   : > { %v3560_v40 = vadd.f32 %v3453_v1, %v3316_v54  ;;  %v4252_v46 = vrot.slane %v7525_v37, 2  ;;  %v7534_v7 = vld [vmem:[#allocation3 + $0xa0] sm:$0x3]  ;;  %v3697_v8 = vsel %vm954_vm4, %v3695_v53, %v3696_v28  ;;  %v2729_v18 = vmul.f32 %v7309_v33, %v7361_v36  ;;  %5479 = vmatmul.mubr.msk.f32.vlgmr.msra.gmra.mxu0 %vm331_vm1, %v5277_v25 }
 0x188   : > { %5429 = vmatmul.mubr.msk.f32.vlgmr.msra.gmra.mxu1 %vm2544_vm5, %v4359_v45  ;;  %v3043_v62 = vmul.f32 %v7318_v63, %v7352_v16  ;;  %v3355_v15 = vmul.f32 %v7329_v39, %v7367_v5  ;;  %4739 = vst.msk [vmem:[#allocation3 + $0xa0] sm:$0x3] %vm2547_vm6, %v5600_v38  ;;  %v4009_v58 = vsel %vm709_vm3, %v4007_v61, %v4008_v55  ;;  %v2898_v27 = vrot.slane %v2799_v32, 1 }
 0x189   : > { %v3804_v24 = vadd.f32 %v3697_v8, %v3560_v40  ;;  %v3599_v48 = vmul.f32 %v7332_v30, %v7367_v5  ;;  %v4253_v36 = vsel %vm954_vm4, %v4251_v9, %v4252_v46  ;;  %v3285_v17 = vmul.f32 %v7326_v22, %v7371_v59  ;;  %v7557_v41 = vld [vmem:[#allocation3 + $0x90] sm:$0xff]  ;;  %v7559_v26 = vld [vmem:[#allocation3 + $0x98] sm:$0xff] }
 0x18a   : > { %v3142_v16 = vrot.slane %v3043_v62, 2  ;;  %v3911_v44 = vmul.f32 %v7432_v13, %v7385_v23  ;;  %v2899_v51 = vsel %vm709_vm3, %v2896_v21, %v2898_v27  ;;  %v3454_v53 = vrot.slane %v3355_v15, 1  ;;  %4737 = vst.msk [vmem:[#allocation3 + $0x90] sm:$0xff] %vm2544_vm5, %v5600_v38  ;;  %4738 = vst.msk [vmem:[#allocation3 + $0x98] sm:$0xff] %vm2544_vm5, %v5600_v38 }
 0x18b   : > { %v3872_v6 = vadd.f32 %v3840_v50, %v3804_v24  ;;  %v4155_v10 = vmul.f32 %v7435_v14, %v7385_v23  ;;  %v3005_v1 = vadd.f32 %v2899_v51, %v2729_v18  ;;  %v3698_v54 = vrot.slane %v3599_v48, 2  ;;  %v2445_v50 = vpop.f32.mrf.mxu0 }
 0x18c   : > { %v3143_v49 = vsel %vm954_vm4, %v3140_v20, %v3142_v16  ;;  %v3841_v56 = vmul.f32 %v7376_v47, %v7412_v12  ;;  %v2451_v21 = vadd.f32 %v5398_v52, %v7138_v43  ;;  %v3455_v31 = vsel %vm709_vm3, %v3452_v3, %v3454_v53 }
 0x18d   : > { %v4116_v61 = vadd.f32 %v4009_v58, %v3872_v6  ;;  %v4010_v45 = vrot.slane %v3911_v44, 1  ;;  %v3249_v40 = vadd.f32 %v3143_v49, %v3005_v1  ;;  %v3699_v9 = vsel %vm954_vm4, %v3696_v28, %v3698_v54 }
 0x18e   : > { %v4254_v32 = vrot.slane %v4155_v10, 2  ;;  %v2800_v42 = vmul.f32 %v7315_v29, %v7369_v11  ;;  %v2613_v2 = vmax.f32 %v2451_v21, 0.0  ;;  %v2446_v20 = vadd.f32 %v7138_v43, %v2445_v50 }
 0x18f   : > { %v4360_v25 = vadd.f32 %v4253_v36, %v4116_v61  ;;  %v4011_v8 = vsel %vm709_vm3, %v4008_v55, %v4010_v45  ;;  %v3317_v18 = vadd.f32 %v3285_v17, %v3249_v40  ;;  %v2801_v62 = vmul.f32 %v7315_v29, %v7371_v59 }
 0x190   : > { %v2900_v3 = vrot.slane %v2800_v42, 1  ;;  %v3044_v15 = vmul.f32 %v7318_v63, %v7369_v11  ;;  %2646 = vst.msk [vmem:[#allocation3 + $0xb1] sm:$0xff] %vm2544_vm5, %v2613_v2  ;;  %v2612_v28 = vmax.f32 %v2446_v20, 0.0  ;;  %v2730_v24 = vmul.f32 %v7309_v33, %v7369_v11 }
 0x191   : > { %5431 = vmatprep.mubr.msk.f32.mxu1 %vm2544_vm5, %v4360_v25  ;;  %v3045_v58 = vmul.f32 %v7318_v63, %v7371_v59  ;;  %v3356_v55 = vmul.f32 %v7329_v39, %v7400_v35  ;;  %v3561_v27 = vadd.f32 %v3455_v31, %v3317_v18  ;;  %v2901_v48 = vrot.slane %v2801_v62, 1 }
 0x192   : > { %v3144_v36 = vrot.slane %v3044_v15, 2  ;;  %v3357_v16 = vmul.f32 %v7329_v39, %v7412_v12  ;;  %2645 = vst.msk [vmem:[#allocation3 + $0xa9] sm:$0xff] %vm2544_vm5, %v2612_v28  ;;  %v4255_v17 = vsel %vm954_vm4, %v4252_v46, %v4254_v32  ;;  %v3600_v11 = vmul.f32 %v7332_v30, %v7400_v35 }
 0x193   : > { %v3145_v44 = vrot.slane %v3045_v58, 2  ;;  %v7605_v6 = vmul.f32 %v7332_v30, %v7412_v12  ;;  %v3805_v51 = vadd.f32 %v3699_v9, %v3561_v27  ;;  %v2902_v53 = vsel %vm709_vm3, %v2900_v3, %v2901_v48 }
 0x194   : > { %v3456_v10 = vrot.slane %v3356_v55, 1  ;;  %v3457_v52 = vrot.slane %v3357_v16, 1  ;;  %v3006_v1 = vadd.f32 %v2902_v53, %v2730_v24  ;;  %v3286_v49 = vmul.f32 %v7326_v22, %v7400_v35 }
 0x195   : > { %v3700_v37 = vrot.slane %v3600_v11, 2  ;;  %v3701_v46 = vrot.slane %v7605_v6, 2  ;;  %v3873_v54 = vadd.f32 %v3841_v56, %v3805_v51  ;;  %v3146_v21 = vsel %vm954_vm4, %v3144_v36, %v3145_v44 }
 0x196   : > { %v3912_v61 = vmul.f32 %v7432_v13, %v7416_v60  ;;  %v7616_v31 = vmul.f32 %v7432_v13, %v7418_v34  ;;  %v3250_v45 = vadd.f32 %v3146_v21, %v3006_v1  ;;  %v3842_v50 = vmul.f32 %v7376_v47, %v7416_v60 }
 0x197   : > { %v4156_v40 = vmul.f32 %v7435_v14, %v7416_v60  ;;  %v7624_v9 = vmul.f32 %v7435_v14, %v7418_v34  ;;  %v7626_v56 = vld [vmem:[#allocation3 + $0xb8] sm:$0x3]  ;;  %v4117_v32 = vadd.f32 %v4011_v8, %v3873_v54  ;;  %v3458_v42 = vsel %vm709_vm3, %v3456_v10, %v3457_v52 }
 0x198   : > { %v4012_v2 = vrot.slane %v3912_v61, 1  ;;  %v4013_v20 = vrot.slane %v7616_v31, 1  ;;  %4742 = vst.msk [vmem:[#allocation3 + $0xb8] sm:$0x3] %vm2547_vm6, %v5600_v38  ;;  %v3318_v25 = vadd.f32 %v3286_v49, %v3250_v45  ;;  %v3702_v18 = vsel %vm954_vm4, %v3700_v37, %v3701_v46 }
 0x199   : > { %v2731_v62 = vmul.f32 %v7309_v33, %v7371_v59  ;;  %v2802_v3 = vmul.f32 %v7315_v29, %v7367_v5  ;;  %v4361_v15 = vadd.f32 %v4255_v17, %v4117_v32  ;;  %v4256_v28 = vrot.slane %v4156_v40, 2  ;;  %v7653_v10 = vld [vmem:[#allocation3 + $0xa8] sm:$0xff]  ;;  %v7655_v1 = vld [vmem:[#allocation3 + $0xb0] sm:$0xff]  ;;  %v5401_v40 = vpop.f32.mrf.mxu0 }
 0x19a   : > { %v4257_v8 = vrot.slane %v7624_v9, 2  ;;  %v3046_v24 = vmul.f32 %v7318_v63, %v7367_v5  ;;  %v3562_v58 = vadd.f32 %v3458_v42, %v3318_v25  ;;  %v4014_v55 = vsel %vm709_vm3, %v4012_v2, %v4013_v20  ;;  %4740 = vst.msk [vmem:[#allocation3 + $0xa8] sm:$0xff] %vm2544_vm5, %v5600_v38  ;;  %4741 = vst.msk [vmem:[#allocation3 + $0xb0] sm:$0xff] %vm2544_vm5, %v5600_v38 }
 0x19b   : > { %v2903_v27 = vrot.slane %v2802_v3, 1  ;;  %v3358_v36 = vmul.f32 %v7329_v39, %v7385_v23  ;;  %5432 = vmatmul.mubr.msk.f32.gmra.mxu1 %vm2544_vm5, %v4361_v15  ;;  %v3287_v16 = vmul.f32 %v7326_v22, %v7412_v12  ;;  %v3602_v17 = vmul.f32 %v7332_v30, %v7385_v23 }
 0x19c   : > { %v3147_v59 = vrot.slane %v3046_v24, 2  ;;  %v3914_v11 = vmul.f32 %v7432_v13, %v7387_v0  ;;  %v3806_v5 = vadd.f32 %v3702_v18, %v3562_v58  ;;  %v4158_v53 = vmul.f32 %v7435_v14, %v7387_v0 }
 0x19d   : > { %v2904_v6 = vsel %vm709_vm3, %v2901_v48, %v2903_v27  ;;  %v3459_v51 = vrot.slane %v3358_v36, 1  ;;  %v4258_v49 = vsel %vm954_vm4, %v4256_v28, %v4257_v8  ;;  %v3843_v21 = vmul.f32 %v7376_v47, %v7418_v34 }
 0x19e   : > { %v3007_v37 = vadd.f32 %v2904_v6, %v2731_v62  ;;  %v3148_v54 = vsel %vm954_vm4, %v3145_v44, %v3147_v59  ;;  %v3874_v48 = vadd.f32 %v3842_v50, %v3806_v5  ;;  %v3703_v31 = vrot.slane %v3602_v17, 2 }
 0x19f   : > { %v3460_v61 = vsel %vm709_vm3, %v3457_v52, %v3459_v51  ;;  %v4015_v45 = vrot.slane %v3914_v11, 1  ;;  %v4259_v42 = vrot.slane %v4158_v53, 2  ;;  %v2732_v44 = vmul.f32 %v7309_v33, %v7400_v35  ;;  %v2455_v52 = vpop.f32.mrf.mxu0 }
 0x1a0   : > { %v3251_v32 = vadd.f32 %v3148_v54, %v3007_v37  ;;  %v2803_v2 = vmul.f32 %v7315_v29, %v7400_v35  ;;  %v2461_v25 = vadd.f32 %v5401_v40, %v7138_v43  ;;  %v4118_v18 = vadd.f32 %v4014_v55, %v3874_v48 }
 0x1a1   : > { %v3704_v62 = vsel %vm954_vm4, %v3701_v46, %v3703_v31  ;;  %v7676_v50 = vmul.f32 %v7315_v29, %v7412_v12  ;;  %v3047_v28 = vmul.f32 %v7318_v63, %v7400_v35  ;;  %v7682_v24 = vmul.f32 %v7318_v63, %v7412_v12 }
 0x1a2   : > { %v3319_v3 = vadd.f32 %v3287_v16, %v3251_v32  ;;  %v2905_v15 = vrot.slane %v2803_v2, 1  ;;  %v2615_v58 = vmax.f32 %v2461_v25, 0.0  ;;  %v2456_v27 = vadd.f32 %v7138_v43, %v2455_v52 }
 0x1a3   : > { %v4362_v55 = vadd.f32 %v4258_v49, %v4118_v18  ;;  %v2906_v46 = vrot.slane %v7676_v50, 1  ;;  %v4016_v59 = vsel %vm709_vm3, %v4013_v20, %v4015_v45  ;;  %v3149_v17 = vrot.slane %v3047_v28, 2 }
 0x1a4   : > { %v3563_v36 = vadd.f32 %v3460_v61, %v3319_v3  ;;  %v3150_v16 = vrot.slane %v7682_v24, 2  ;;  %2648 = vst.msk [vmem:[#allocation3 + $0xc9] sm:$0xff] %vm2544_vm5, %v2615_v58  ;;  %v2614_v11 = vmax.f32 %v2456_v27, 0.0  ;;  %v3359_v5 = vmul.f32 %v7329_v39, %v7416_v60 }
 0x1a5   : > { %5434 = vmatprep.mubr.msk.f32.mxu1 %vm2544_vm5, %v4362_v55  ;;  %v2907_v35 = vsel %vm709_vm3, %v2905_v15, %v2906_v46  ;;  %v7695_v6 = vmul.f32 %v7329_v39, %v7418_v34  ;;  %v3288_v20 = vmul.f32 %v7326_v22, %v7416_v60  ;;  %v3603_v49 = vmul.f32 %v7332_v30, %v7416_v60 }
 0x1a6   : > { %v3807_v51 = vadd.f32 %v3704_v62, %v3563_v36  ;;  %v3008_v53 = vadd.f32 %v2907_v35, %v2732_v44  ;;  %2647 = vst.msk [vmem:[#allocation3 + $0xc1] sm:$0xff] %vm2544_vm5, %v2614_v11  ;;  %v3151_v37 = vsel %vm954_vm4, %v3149_v17, %v3150_v16  ;;  %v3461_v54 = vrot.slane %v3359_v5, 1 }
 0x1a7   : > { %v3462_v48 = vrot.slane %v7695_v6, 1  ;;  %v3604_v61 = vmul.f32 %v7332_v30, %v7418_v34  ;;  %v3705_v40 = vrot.slane %v3603_v49, 2  ;;  %v3915_v32 = vmul.f32 %v7432_v13, %v7460_v19 }
 0x1a8   : > { %v3875_v31 = vadd.f32 %v3843_v21, %v3807_v51  ;;  %v3252_v45 = vadd.f32 %v3151_v37, %v3008_v53  ;;  %v4260_v44 = vsel %vm954_vm4, %v4257_v8, %v4259_v42  ;;  %v7715_v25 = vmul.f32 %v7432_v13, %v7462_v57 }
 0x1a9   : > { %v3706_v2 = vrot.slane %v3604_v61, 2  ;;  %v4159_v18 = vmul.f32 %v7435_v14, %v7460_v19  ;;  %v4017_v21 = vrot.slane %v3915_v32, 1  ;;  %v7721_v52 = vmul.f32 %v7435_v14, %v7462_v57 }
 0x1aa   : > { %v4119_v62 = vadd.f32 %v4016_v59, %v3875_v31  ;;  %v3320_v50 = vadd.f32 %v3288_v20, %v3252_v45  ;;  %v3463_v3 = vsel %vm709_vm3, %v3461_v54, %v3462_v48  ;;  %v3844_v8 = vmul.f32 %v7376_v47, %v7460_v19  ;;  %v5404_v54 = vpop.f32.mrf.mxu0 }
 0x1ab   : > { %v3707_v9 = vsel %vm954_vm4, %v3705_v40, %v3706_v2  ;;  %v4018_v42 = vrot.slane %v7715_v25, 1  ;;  %v7728_v15 = vld [vmem:[#allocation3 + $0xd0] sm:$0x3]  ;;  %v4261_v27 = vrot.slane %v4159_v18, 2  ;;  %v2805_v55 = vmul.f32 %v7315_v29, %v7385_v23 }
 0x1ac   : > { %v4363_v28 = vadd.f32 %v4260_v44, %v4119_v62  ;;  %v3564_v58 = vadd.f32 %v3463_v3, %v3320_v50  ;;  %4745 = vst.msk [vmem:[#allocation3 + $0xd0] sm:$0x3] %vm2547_vm6, %v5600_v38  ;;  %v4262_v36 = vrot.slane %v7721_v52, 2  ;;  %v2733_v59 = vmul.f32 %v7309_v33, %v7412_v12  ;;  %v2465_v62 = vpop.f32.mrf.mxu0 }
 0x1ad   : > { %v3049_v17 = vmul.f32 %v7318_v63, %v7385_v23  ;;  %v3361_v11 = vmul.f32 %v7329_v39, %v7387_v0  ;;  %v4019_v5 = vsel %vm709_vm3, %v4017_v21, %v4018_v42  ;;  %v2908_v6 = vrot.slane %v2805_v55, 1  ;;  %v7745_v53 = vld [vmem:[#allocation3 + $0xc0] sm:$0xff]  ;;  %v7747_v20 = vld [vmem:[#allocation3 + $0xc8] sm:$0xff] }
 0x1ae   : > { %5435 = vmatmul.mubr.msk.f32.gmra.mxu1 %vm2544_vm5, %v4363_v28  ;;  %v3808_v35 = vadd.f32 %v3707_v9, %v3564_v58  ;;  %v3605_v51 = vmul.f32 %v7332_v30, %v7387_v0  ;;  %v3289_v23 = vmul.f32 %v7326_v22, %v7418_v34  ;;  %v3917_v37 = vmul.f32 %v7432_v13, %v7449_v4 }
 0x1af   : > { %v3152_v12 = vrot.slane %v3049_v17, 2  ;;  %v3464_v49 = vrot.slane %v3361_v11, 1  ;;  %4743 = vst.msk [vmem:[#allocation3 + $0xc0] sm:$0xff] %vm2544_vm5, %v5600_v38  ;;  %4744 = vst.msk [vmem:[#allocation3 + $0xc8] sm:$0xff] %vm2544_vm5, %v5600_v38  ;;  %v2909_v31 = vsel %vm709_vm3, %v2906_v46, %v2908_v6  ;;  %v4161_v40 = vmul.f32 %v7435_v14, %v7449_v4 }
 0x1b0   : > { %v3876_v61 = vadd.f32 %v3844_v8, %v3808_v35  ;;  %v3708_v45 = vrot.slane %v3605_v51, 2  ;;  %v2471_v32 = vadd.f32 %v5404_v54, %v7138_v43  ;;  %v4263_v44 = vsel %vm954_vm4, %v4261_v27, %v4262_v36 }
 0x1b1   : > { %v3009_v25 = vadd.f32 %v2909_v31, %v2733_v59  ;;  %v3845_v18 = vmul.f32 %v7376_v47, %v7462_v57  ;;  %v3153_v21 = vsel %vm954_vm4, %v3150_v16, %v3152_v12  ;;  %v3465_v46 = vsel %vm709_vm3, %v3462_v48, %v3464_v49 }
 0x1b2   : > { %v4120_v50 = vadd.f32 %v4019_v5, %v3876_v61  ;;  %v3709_v52 = vsel %vm954_vm4, %v3706_v2, %v3708_v45  ;;  %v2617_v3 = vmax.f32 %v2471_v32, 0.0  ;;  %v2466_v9 = vadd.f32 %v7138_v43, %v2465_v62 }
 0x1b3   : > { %v3253_v8 = vadd.f32 %v3153_v21, %v3009_v25  ;;  %v4020_v28 = vrot.slane %v3917_v37, 1  ;;  %v4264_v27 = vrot.slane %v4161_v40, 2  ;;  %v2734_v55 = vmul.f32 %v7309_v33, %v7416_v60  ;;  %v5278_v37 = vld [vmem:[%s5842_s16 + $0x40] ss:$2 sm:$0xff] }
 0x1b4   : > { %v4364_v58 = vadd.f32 %v4263_v44, %v4120_v50  ;;  %v2806_v59 = vmul.f32 %v7315_v29, %v7416_v60  ;;  %2650 = vst.msk [vmem:[#allocation3 + $0xe1] sm:$0xff] %vm2544_vm5, %v2617_v3  ;;  %v2616_v24 = vmax.f32 %v2466_v9, 0.0  ;;  %v7777_v48 = vmul.f32 %v7315_v29, %v7418_v34  ;;  %5481 = vmatprep.mubr.msk.f32.mxu0 %vm331_vm1, %v5278_v37  ;;  %v5279_v40 = vld [vmem:[%s5842_s16 + $0x60] ss:$2 sm:$0xff] }
 0x1b5   : > { %v3321_v16 = vadd.f32 %v3289_v23, %v3253_v8  ;;  %v3050_v43 = vmul.f32 %v7318_v63, %v7416_v60  ;;  %v4021_v2 = vsel %vm709_vm3, %v4018_v42, %v4020_v28  ;;  %v7785_v11 = vmul.f32 %v7318_v63, %v7418_v34  ;;  %5482 = vmatmul.mubr.msk.f32.gmra.mxu0 %vm331_vm1, %v5279_v40 }
 0x1b6   : > { %5437 = vmatprep.mubr.msk.f32.mxu1 %vm2544_vm5, %v4364_v58  ;;  %v2910_v17 = vrot.slane %v2806_v59, 1  ;;  %v3362_v35 = vmul.f32 %v7329_v39, %v7460_v19  ;;  %2649 = vst.msk [vmem:[#allocation3 + $0xd9] sm:$0xff] %vm2544_vm5, %v2616_v24  ;;  %v2911_v6 = vrot.slane %v7777_v48, 1  ;;  %v7793_v60 = vmul.f32 %v7329_v39, %v7462_v57 }
 0x1b7   : > { %v3565_v5 = vadd.f32 %v3465_v46, %v3321_v16  ;;  %v3154_v51 = vrot.slane %v3050_v43, 2  ;;  %v4265_v42 = vsel %vm954_vm4, %v4262_v36, %v4264_v27  ;;  %v3155_v12 = vrot.slane %v7785_v11, 2 }
 0x1b8   : > { %v3606_v23 = vmul.f32 %v7332_v30, %v7460_v19  ;;  %v7801_v49 = vmul.f32 %v7332_v30, %v7462_v57  ;;  %v2912_v61 = vsel %vm709_vm3, %v2910_v17, %v2911_v6  ;;  %v3466_v31 = vrot.slane %v3362_v35, 1 }
 0x1b9   : > { %v3809_v54 = vadd.f32 %v3709_v52, %v3565_v5  ;;  %v3467_v45 = vrot.slane %v7793_v60, 1  ;;  %v3010_v36 = vadd.f32 %v2912_v61, %v2734_v55  ;;  %v3156_v32 = vsel %vm954_vm4, %v3154_v51, %v3155_v12  ;;  %v5407_v61 = vpop.f32.mrf.mxu0 }
 0x1ba   : > { %v3290_v44 = vmul.f32 %v7326_v22, %v7460_v19  ;;  %v3710_v25 = vrot.slane %v3606_v23, 2  ;;  %v3711_v50 = vrot.slane %v7801_v49, 2  ;;  %v3918_v21 = vmul.f32 %v7432_v13, %v7557_v41 }
 0x1bb   : > { %v3877_v62 = vadd.f32 %v3845_v18, %v3809_v54  ;;  %v3919_v46 = vmul.f32 %v7432_v13, %v7559_v26  ;;  %v7819_v52 = vld [vmem:[#allocation3 + $0xe8] sm:$0x3]  ;;  %v3254_v3 = vadd.f32 %v3156_v32, %v3010_v36  ;;  %v3846_v9 = vmul.f32 %v7376_v47, %v7557_v41 }
 0x1bc   : > { %v4162_v8 = vmul.f32 %v7435_v14, %v7557_v41  ;;  %v7827_v18 = vmul.f32 %v7435_v14, %v7559_v26  ;;  %4748 = vst.msk [vmem:[#allocation3 + $0xe8] sm:$0x3] %vm2547_vm6, %v5600_v38  ;;  %v3468_v58 = vsel %vm709_vm3, %v3466_v31, %v3467_v45  ;;  %v4022_v27 = vrot.slane %v3918_v21, 1 }
 0x1bd   : > { %v4121_v28 = vadd.f32 %v4021_v2, %v3877_v62  ;;  %v4023_v55 = vrot.slane %v3919_v46, 1  ;;  %v3322_v59 = vadd.f32 %v3290_v44, %v3254_v3  ;;  %v2808_v48 = vmul.f32 %v7315_v29, %v7387_v0  ;;  %v7835_v43 = vld [vmem:[#allocation3 + $0xd8] sm:$0xff]  ;;  %v7837_v17 = vld [vmem:[#allocation3 + $0xe0] sm:$0xff]  ;;  %v7867_v44 = vld [vmem:[%s9012_s3] ss:$0 sm:$0xff]  ;;  %v2475_v3 = vpop.f32.mrf.mxu0 }
 0x1be   : > { %v4266_v24 = vrot.slane %v4162_v8, 2  ;;  %v4267_v16 = vrot.slane %v7827_v18, 2  ;;  %v3712_v5 = vsel %vm954_vm4, %v3710_v25, %v3711_v50  ;;  %v2735_v2 = vmul.f32 %v7309_v33, %v7418_v34  ;;  %4746 = vst.msk [vmem:[#allocation3 + $0xd8] sm:$0xff] %vm2544_vm5, %v5600_v38  ;;  %4747 = vst.msk [vmem:[#allocation3 + $0xe0] sm:$0xff] %vm2544_vm5, %v5600_v38 }
 0x1bf   : > { %v4365_v35 = vadd.f32 %v4265_v42, %v4121_v28  ;;  %v3052_v51 = vmul.f32 %v7318_v63, %v7387_v0  ;;  %v3566_v60 = vadd.f32 %v3468_v58, %v3322_v59  ;;  %v4024_v23 = vsel %vm709_vm3, %v4022_v27, %v4023_v55 }
 0x1c0   : > { %v2913_v49 = vrot.slane %v2808_v48, 1  ;;  %v3364_v42 = vmul.f32 %v7329_v39, %v7449_v4  ;;  %v4268_v34 = vsel %vm954_vm4, %v4266_v24, %v4267_v16  ;;  %v3291_v0 = vmul.f32 %v7326_v22, %v7462_v57 }
 0x1c1   : > { %5438 = vmatmul.mubr.msk.f32.gmra.mxu1 %vm2544_vm5, %v4365_v35  ;;  %v3608_v37 = vmul.f32 %v7332_v30, %v7449_v4  ;;  %v3920_v54 = vmul.f32 %v7432_v13, %v7534_v7  ;;  %v3810_v31 = vadd.f32 %v3712_v5, %v3566_v60  ;;  %v3157_v36 = vrot.slane %v3052_v51, 2 }
 0x1c2   : > { %v2914_v40 = vsel %vm709_vm3, %v2911_v6, %v2913_v49  ;;  %v4164_v32 = vmul.f32 %v7435_v14, %v7534_v7  ;;  %v2481_v25 = vadd.f32 %v7867_v44, %v5407_v61  ;;  %v3469_v21 = vrot.slane %v3364_v42, 1 }
 0x1c3   : > { %v3011_v62 = vadd.f32 %v2914_v40, %v2735_v2  ;;  %v3847_v46 = vmul.f32 %v7376_v47, %v7559_v26  ;;  %v3878_v8 = vadd.f32 %v3846_v9, %v3810_v31  ;;  %v3158_v6 = vsel %vm954_vm4, %v3155_v12, %v3157_v36 }
 0x1c4   : > { %v3713_v28 = vrot.slane %v3608_v37, 2  ;;  %v4025_v58 = vrot.slane %v3920_v54, 1  ;;  %v2619_v27 = vmax.f32 %v2481_v25, 0.0  ;;  %v2476_v59 = vadd.f32 %v7867_v44, %v2475_v3 }
 0x1c5   : > { %v3255_v24 = vadd.f32 %v3158_v6, %v3011_v62  ;;  %v3470_v48 = vsel %vm709_vm3, %v3467_v45, %v3469_v21  ;;  %v4122_v35 = vadd.f32 %v4024_v23, %v3878_v8  ;;  %v4269_v51 = vrot.slane %v4164_v32, 2 }
 0x1c6   : > { %v3714_v5 = vsel %vm954_vm4, %v3711_v50, %v3713_v28  ;;  %v4026_v2 = vsel %vm709_vm3, %v4023_v55, %v4025_v58  ;;  %2652 = vst.msk [vmem:[#allocation3 + $0xf9] sm:$0xff] %vm2544_vm5, %v2619_v27  ;;  %v2618_v9 = vmax.f32 %v2476_v59, 0.0  ;;  %v2809_v12 = vmul.f32 %v7315_v29, %v7460_v19 }
 0x1c7   : > { %v3323_v11 = vadd.f32 %v3291_v0, %v3255_v24  ;;  %v7884_v60 = vmul.f32 %v7315_v29, %v7462_v57  ;;  %v4366_v49 = vadd.f32 %v4268_v34, %v4122_v35  ;;  %v2736_v45 = vmul.f32 %v7309_v33, %v7460_v19 }
 0x1c8   : > { %v3053_v50 = vmul.f32 %v7318_v63, %v7460_v19  ;;  %v7892_v55 = vmul.f32 %v7318_v63, %v7462_v57  ;;  %2651 = vst.msk [vmem:[#allocation3 + $0xf1] sm:$0xff] %vm2544_vm5, %v2618_v9  ;;  %v2915_v42 = vrot.slane %v2809_v12, 1  ;;  %v3365_v37 = vmul.f32 %v7329_v39, %v7557_v41 }
 0x1c9   : > { %v3567_v23 = vadd.f32 %v3470_v48, %v3323_v11  ;;  %v2916_v0 = vrot.slane %v7884_v60, 1  ;;  %5440 = vmatprep.mubr.msk.f32.mxu1 %vm2544_vm5, %v4366_v49  ;;  %v3366_v19 = vmul.f32 %v7329_v39, %v7559_v26  ;;  %v3609_v61 = vmul.f32 %v7332_v30, %v7557_v41 }
 0x1ca   : > { %v3159_v34 = vrot.slane %v3053_v50, 2  ;;  %v3160_v54 = vrot.slane %v7892_v55, 2  ;;  %v4270_v40 = vsel %vm954_vm4, %v4267_v16, %v4269_v51  ;;  %v3610_v32 = vmul.f32 %v7332_v30, %v7559_v26 }
 0x1cb   : > { %v3811_v31 = vadd.f32 %v3714_v5, %v3567_v23  ;;  %v2917_v36 = vsel %vm709_vm3, %v2915_v42, %v2916_v0  ;;  %v3292_v62 = vmul.f32 %v7326_v22, %v7557_v41  ;;  %v3471_v21 = vrot.slane %v3365_v37, 1 }
 0x1cc   : > { %v3012_v25 = vadd.f32 %v2917_v36, %v2736_v45  ;;  %v3472_v3 = vrot.slane %v3366_v19, 1  ;;  %v3161_v6 = vsel %vm954_vm4, %v3159_v34, %v3160_v54  ;;  %v3715_v28 = vrot.slane %v3609_v61, 2 }
 0x1cd   : > { %v3879_v8 = vadd.f32 %v3847_v46, %v3811_v31  ;;  %v3921_v18 = vmul.f32 %v7432_v13, %v7653_v10  ;;  %v7915_v58 = vld [vmem:[#allocation3 + $0x100] sm:$0x3]  ;;  %v3716_v27 = vrot.slane %v3610_v32, 2  ;;  %v3922_v59 = vmul.f32 %v7432_v13, %v7655_v1 }
 0x1ce   : > { %v3256_v16 = vadd.f32 %v3161_v6, %v3012_v25  ;;  %v4165_v24 = vmul.f32 %v7435_v14, %v7653_v10  ;;  %4751 = vst.msk [vmem:[#allocation3 + $0x100] sm:$0x3] %vm2547_vm6, %v5600_v38  ;;  %v3848_v48 = vmul.f32 %v7376_v47, %v7653_v10  ;;  %v7927_v5 = vmul.f32 %v7435_v14, %v7655_v1  ;;  %v5410_v25 = vpop.f32.mrf.mxu0 }
 0x1cf   : > { %v4123_v46 = vadd.f32 %v4026_v2, %v3879_v8  ;;  %v4027_v35 = vrot.slane %v3921_v18, 1  ;;  %v3473_v9 = vsel %vm709_vm3, %v3471_v21, %v3472_v3  ;;  %v4028_v11 = vrot.slane %v3922_v59, 1  ;;  %v7930_v60 = vld [vmem:[#allocation3 + $0xf0] sm:$0xff]  ;;  %v7932_v49 = vld [vmem:[#allocation3 + $0xf8] sm:$0xff] }
 0x1d0   : > { %v3324_v51 = vadd.f32 %v3292_v62, %v3256_v16  ;;  %v4271_v12 = vrot.slane %v4165_v24, 2  ;;  %v4272_v2 = vrot.slane %v7927_v5, 2  ;;  %v2811_v50 = vmul.f32 %v7315_v29, %v7449_v4  ;;  %4749 = vst.msk [vmem:[#allocation3 + $0xf0] sm:$0xff] %vm2544_vm5, %v5600_v38  ;;  %4750 = vst.msk [vmem:[#allocation3 + $0xf8] sm:$0xff] %vm2544_vm5, %v5600_v38  ;;  %v2485_v24 = vpop.f32.mrf.mxu0 }
 0x1d1   : > { %v4367_v45 = vadd.f32 %v4270_v40, %v4123_v46  ;;  %v3055_v55 = vmul.f32 %v7318_v63, %v7449_v4  ;;  %v3717_v42 = vsel %vm954_vm4, %v3715_v28, %v3716_v27  ;;  %v2737_v37 = vmul.f32 %v7309_v33, %v7462_v57 }
 0x1d2   : > { %v3568_v23 = vadd.f32 %v3473_v9, %v3324_v51  ;;  %v3367_v34 = vmul.f32 %v7329_v39, %v7534_v7  ;;  %v4029_v19 = vsel %vm709_vm3, %v4027_v35, %v4028_v11  ;;  %v2918_v4 = vrot.slane %v2811_v50, 1 }
 0x1d3   : > { %5441 = vmatmul.mubr.msk.f32.gmra.mxu1 %vm2544_vm5, %v4367_v45  ;;  %v3293_v61 = vmul.f32 %v7326_v22, %v7559_v26  ;;  %v3611_v31 = vmul.f32 %v7332_v30, %v7534_v7  ;;  %v4273_v36 = vsel %vm954_vm4, %v4271_v12, %v4272_v2  ;;  %v3162_v57 = vrot.slane %v3055_v55, 2 }
 0x1d4   : > { %v3812_v40 = vadd.f32 %v3717_v42, %v3568_v23  ;;  %v3923_v32 = vmul.f32 %v7432_v13, %v7626_v56  ;;  %v2919_v62 = vsel %vm709_vm3, %v2916_v0, %v2918_v4  ;;  %v3474_v21 = vrot.slane %v3367_v34, 1 }
 0x1d5   : > { %v3718_v8 = vrot.slane %v3611_v31, 2  ;;  %v4167_v6 = vmul.f32 %v7435_v14, %v7626_v56  ;;  %v2491_v28 = vadd.f32 %v7867_v44, %v5410_v25  ;;  %v3013_v16 = vadd.f32 %v2919_v62, %v2737_v37 }
 0x1d6   : > { %v3880_v18 = vadd.f32 %v3848_v48, %v3812_v40  ;;  %v3849_v59 = vmul.f32 %v7376_v47, %v7655_v1  ;;  %v3163_v46 = vsel %vm954_vm4, %v3160_v54, %v3162_v57  ;;  %v3475_v35 = vsel %vm709_vm3, %v3472_v3, %v3474_v21 }
 0x1d7   : > { %v3719_v51 = vsel %vm954_vm4, %v3716_v27, %v3718_v8  ;;  %v4030_v0 = vrot.slane %v3923_v32, 1  ;;  %v2621_v9 = vmax.f32 %v2491_v28, 0.0  ;;  %v2486_v12 = vadd.f32 %v7867_v44, %v2485_v24 }
 0x1d8   : > { %v4124_v45 = vadd.f32 %v4029_v19, %v3880_v18  ;;  %v3257_v50 = vadd.f32 %v3163_v46, %v3013_v16  ;;  %v4274_v55 = vrot.slane %v4167_v6, 2  ;;  %v2738_v48 = vmul.f32 %v7309_v33, %v7557_v41 }
 0x1d9   : > { %v2812_v23 = vmul.f32 %v7315_v29, %v7557_v41  ;;  %v7975_v54 = vmul.f32 %v7315_v29, %v7559_v26  ;;  %2654 = vst.msk [vmem:[#allocation3 + $0x111] sm:$0xff] %vm2544_vm5, %v2621_v9  ;;  %v2620_v3 = vmax.f32 %v2486_v12, 0.0  ;;  %v3056_v37 = vmul.f32 %v7318_v63, %v7557_v41 }
 0x1da   : > { %v4368_v27 = vadd.f32 %v4273_v36, %v4124_v45  ;;  %v3325_v42 = vadd.f32 %v3293_v61, %v3257_v50  ;;  %v4031_v34 = vsel %vm709_vm3, %v4028_v11, %v4030_v0  ;;  %v7984_v31 = vmul.f32 %v7318_v63, %v7559_v26 }
 0x1db   : > { %v2920_v19 = vrot.slane %v2812_v23, 1  ;;  %v2921_v4 = vrot.slane %v7975_v54, 1  ;;  %2653 = vst.msk [vmem:[#allocation3 + $0x109] sm:$0xff] %vm2544_vm5, %v2620_v3  ;;  %v3164_v57 = vrot.slane %v3056_v37, 2  ;;  %v3368_v61 = vmul.f32 %v7329_v39, %v7653_v10 }
 0x1dc   : > { %5443 = vmatprep.mubr.msk.f32.mxu1 %vm2544_vm5, %v4368_v27  ;;  %v3569_v40 = vadd.f32 %v3475_v35, %v3325_v42  ;;  %v7992_v41 = vmul.f32 %v7329_v39, %v7655_v1  ;;  %v3165_v36 = vrot.slane %v7984_v31, 2  ;;  %v3612_v32 = vmul.f32 %v7332_v30, %v7653_v10 }
 0x1dd   : > { %v2922_v11 = vsel %vm709_vm3, %v2920_v19, %v2921_v4  ;;  %v8000_v25 = vmul.f32 %v7332_v30, %v7655_v1  ;;  %v3476_v8 = vrot.slane %v3368_v61, 1  ;;  %v4275_v28 = vsel %vm954_vm4, %v4272_v2, %v4274_v55 }
 0x1de   : > { %v3813_v62 = vadd.f32 %v3719_v51, %v3569_v40  ;;  %v3014_v21 = vadd.f32 %v2922_v11, %v2738_v48  ;;  %v3477_v6 = vrot.slane %v7992_v41, 1  ;;  %v3166_v18 = vsel %vm954_vm4, %v3164_v57, %v3165_v36 }
 0x1df   : > { %v3294_v16 = vmul.f32 %v7326_v22, %v7653_v10  ;;  %v3720_v24 = vrot.slane %v3612_v32, 2  ;;  %v3721_v51 = vrot.slane %v8000_v25, 2  ;;  %v3924_v0 = vmul.f32 %v7432_v13, %v7745_v53 }
 0x1e0   : > { %v3881_v46 = vadd.f32 %v3849_v59, %v3813_v62  ;;  %v3258_v35 = vadd.f32 %v3166_v18, %v3014_v21  ;;  %v8014_v9 = vld [vmem:[#allocation3 + $0x118] sm:$0x3]  ;;  %v3850_v5 = vmul.f32 %v7376_v47, %v7745_v53  ;;  %v3925_v2 = vmul.f32 %v7432_v13, %v7747_v20  ;;  %v5413_v62 = vpop.f32.mrf.mxu0 }
 0x1e1   : > { %v4168_v12 = vmul.f32 %v7435_v14, %v7745_v53  ;;  %v8024_v59 = vmul.f32 %v7435_v14, %v7747_v20  ;;  %4754 = vst.msk [vmem:[#allocation3 + $0x118] sm:$0x3] %vm2547_vm6, %v5600_v38  ;;  %v3478_v55 = vsel %vm709_vm3, %v3476_v8, %v3477_v6  ;;  %v4032_v48 = vrot.slane %v3924_v0, 1  ;;  %v5281_v18 = vld [vmem:[%s5842_s16 + $0xa0] ss:$2 sm:$0xff] }
 0x1e2   : > { %v4125_v45 = vadd.f32 %v4031_v34, %v3881_v46  ;;  %v3326_v50 = vadd.f32 %v3294_v16, %v3258_v35  ;;  %v4033_v23 = vrot.slane %v3925_v2, 1  ;;  %v2814_v27 = vmul.f32 %v7315_v29, %v7534_v7  ;;  %v8034_v42 = vld [vmem:[#allocation3 + $0x108] sm:$0xff]  ;;  %v8036_v37 = vld [vmem:[#allocation3 + $0x110] sm:$0xff]  ;;  %v2495_v0 = vpop.f32.mrf.mxu0 }
 0x1e3   : > { %v4276_v54 = vrot.slane %v4168_v12, 2  ;;  %v4277_v3 = vrot.slane %v8024_v59, 2  ;;  %v3722_v40 = vsel %vm954_vm4, %v3720_v24, %v3721_v51  ;;  %v3058_v57 = vmul.f32 %v7318_v63, %v7534_v7  ;;  %4752 = vst.msk [vmem:[#allocation3 + $0x108] sm:$0xff] %vm2544_vm5, %v5600_v38  ;;  %4753 = vst.msk [vmem:[#allocation3 + $0x110] sm:$0xff] %vm2544_vm5, %v5600_v38 }
 0x1e4   : > { %v4369_v19 = vadd.f32 %v4275_v28, %v4125_v45  ;;  %v3570_v34 = vadd.f32 %v3478_v55, %v3326_v50  ;;  %v2739_v61 = vmul.f32 %v7309_v33, %v7559_v26  ;;  %v2923_v11 = vrot.slane %v2814_v27, 1  ;;  %v5280_v28 = vld [vmem:[%s5842_s16 + $0x80] ss:$2 sm:$0xff] }
 0x1e5   : > { %v3295_v32 = vmul.f32 %v7326_v22, %v7655_v1  ;;  %v3370_v25 = vmul.f32 %v7329_v39, %v7626_v56  ;;  %v4034_v21 = vsel %vm709_vm3, %v4032_v48, %v4033_v23  ;;  %v4278_v8 = vsel %vm954_vm4, %v4276_v54, %v4277_v3  ;;  %5484 = vmatprep.mubr.msk.f32.mxu0 %vm331_vm1, %v5280_v28 }
 0x1e6   : > { %5444 = vmatmul.mubr.msk.f32.gmra.mxu1 %vm2544_vm5, %v4369_v19  ;;  %v3814_v7 = vadd.f32 %v3722_v40, %v3570_v34  ;;  %v3614_v26 = vmul.f32 %v7332_v30, %v7626_v56  ;;  %v2501_v16 = vadd.f32 %v7867_v44, %v5413_v62  ;;  %v2924_v24 = vsel %vm709_vm3, %v2921_v4, %v2923_v11 }
 0x1e7   : > { %v3167_v46 = vrot.slane %v3058_v57, 2  ;;  %v3926_v35 = vmul.f32 %v7432_v13, %v7728_v15  ;;  %v3015_v12 = vadd.f32 %v2924_v24, %v2739_v61  ;;  %v3479_v45 = vrot.slane %v3370_v25, 1  ;;  %5485 = vmatmul.mubr.msk.f32.gmra.mxu0 %vm331_vm1, %v5281_v18 }
 0x1e8   : > { %v3882_v2 = vadd.f32 %v3850_v5, %v3814_v7  ;;  %v3851_v50 = vmul.f32 %v7376_v47, %v7747_v20  ;;  %v2623_v55 = vmax.f32 %v2501_v16, 0.0  ;;  %v2496_v48 = vadd.f32 %v7867_v44, %v2495_v0 }
 0x1e9   : > { %v3168_v4 = vsel %vm954_vm4, %v3165_v36, %v3167_v46  ;;  %v3723_v54 = vrot.slane %v3614_v26, 2  ;;  %v4035_v34 = vrot.slane %v3926_v35, 1  ;;  %v4170_v5 = vmul.f32 %v7435_v14, %v7728_v15 }
 0x1ea   : > { %v4126_v27 = vadd.f32 %v4034_v21, %v3882_v2  ;;  %v3259_v19 = vadd.f32 %v3168_v4, %v3015_v12  ;;  %2656 = vst.msk [vmem:[#allocation3 + $0x129] sm:$0xff] %vm2544_vm5, %v2623_v55  ;;  %v2622_v40 = vmax.f32 %v2496_v48, 0.0  ;;  %v3480_v57 = vsel %vm709_vm3, %v3477_v6, %v3479_v45 }
 0x1eb   : > { %v3724_v61 = vsel %vm954_vm4, %v3721_v51, %v3723_v54  ;;  %v2815_v31 = vmul.f32 %v7315_v29, %v7653_v10  ;;  %v4036_v25 = vsel %vm709_vm3, %v4033_v23, %v4035_v34  ;;  %v8084_v62 = vmul.f32 %v7315_v29, %v7655_v1 }
 0x1ec   : > { %v4370_v36 = vadd.f32 %v4278_v8, %v4126_v27  ;;  %v3327_v11 = vadd.f32 %v3295_v32, %v3259_v19  ;;  %2655 = vst.msk [vmem:[#allocation3 + $0x121] sm:$0xff] %vm2544_vm5, %v2622_v40  ;;  %v2740_v41 = vmul.f32 %v7309_v33, %v7653_v10  ;;  %v3059_v6 = vmul.f32 %v7318_v63, %v7653_v10 }
 0x1ed   : > { %v2925_v7 = vrot.slane %v2815_v31, 1  ;;  %v8093_v51 = vmul.f32 %v7318_v63, %v7655_v1  ;;  %v4279_v32 = vrot.slane %v4170_v5, 2  ;;  %v2926_v21 = vrot.slane %v8084_v62, 1 }
 0x1ee   : > { %5446 = vmatprep.mubr.msk.f32.mxu1 %vm2544_vm5, %v4370_v36  ;;  %v3571_v23 = vadd.f32 %v3480_v57, %v3327_v11  ;;  %v3371_v8 = vmul.f32 %v7329_v39, %v7745_v53  ;;  %v3169_v26 = vrot.slane %v3059_v6, 2  ;;  %v3372_v18 = vmul.f32 %v7329_v39, %v7747_v20 }
 0x1ef   : > { %v3170_v28 = vrot.slane %v8093_v51, 2  ;;  %v3615_v10 = vmul.f32 %v7332_v30, %v7745_v53  ;;  %v2927_v24 = vsel %vm709_vm3, %v2925_v7, %v2926_v21  ;;  %v3296_v46 = vmul.f32 %v7326_v22, %v7745_v53 }
 0x1f0   : > { %v3815_v16 = vadd.f32 %v3724_v61, %v3571_v23  ;;  %v3616_v35 = vmul.f32 %v7332_v30, %v7747_v20  ;;  %v4280_v0 = vsel %vm954_vm4, %v4277_v3, %v4279_v32  ;;  %v3016_v2 = vadd.f32 %v2927_v24, %v2740_v41 }
 0x1f1   : > { %v3481_v12 = vrot.slane %v3371_v8, 1  ;;  %v3482_v45 = vrot.slane %v3372_v18, 1  ;;  %v8112_v55 = vld [vmem:[#allocation3 + $0x130] sm:$0x3]  ;;  %v3171_v4 = vsel %vm954_vm4, %v3169_v26, %v3170_v28  ;;  %v3725_v54 = vrot.slane %v3615_v10, 2 }
 0x1f2   : > { %v3883_v48 = vadd.f32 %v3851_v50, %v3815_v16  ;;  %v3927_v27 = vmul.f32 %v7432_v13, %v7835_v43  ;;  %4757 = vst.msk [vmem:[#allocation3 + $0x130] sm:$0x3] %vm2547_vm6, %v5600_v38  ;;  %v3260_v19 = vadd.f32 %v3171_v4, %v3016_v2  ;;  %v3726_v34 = vrot.slane %v3616_v35, 2 }
 0x1f3   : > { %v3928_v59 = vmul.f32 %v7432_v13, %v7837_v17  ;;  %v4171_v3 = vmul.f32 %v7435_v14, %v7835_v43  ;;  %v3852_v50 = vmul.f32 %v7376_v47, %v7835_v43  ;;  %v8127_v57 = vmul.f32 %v7435_v14, %v7837_v17  ;;  %v8129_v61 = vld [vmem:[#allocation3 + $0x120] sm:$0xff]  ;;  %v8131_v31 = vld [vmem:[#allocation3 + $0x128] sm:$0xff] }
 0x1f4   : > { %v4127_v5 = vadd.f32 %v4036_v25, %v3883_v48  ;;  %v4037_v40 = vrot.slane %v3927_v27, 1  ;;  %v3328_v36 = vadd.f32 %v3296_v46, %v3260_v19  ;;  %v3483_v11 = vsel %vm709_vm3, %v3481_v12, %v3482_v45  ;;  %4755 = vst.msk [vmem:[#allocation3 + $0x120] sm:$0xff] %vm2544_vm5, %v5600_v38  ;;  %4756 = vst.msk [vmem:[#allocation3 + $0x128] sm:$0xff] %vm2544_vm5, %v5600_v38 }
 0x1f5   : > { %v4038_v62 = vrot.slane %v3928_v59, 1  ;;  %v4281_v41 = vrot.slane %v4171_v3, 2  ;;  %v4282_v7 = vrot.slane %v8127_v57, 2  ;;  %v2817_v6 = vmul.f32 %v7315_v29, %v7626_v56 }
 0x1f6   : > { %v4371_v25 = vadd.f32 %v4280_v0, %v4127_v5  ;;  %v3061_v51 = vmul.f32 %v7318_v63, %v7626_v56  ;;  %v3572_v23 = vadd.f32 %v3483_v11, %v3328_v36  ;;  %v3727_v32 = vsel %vm954_vm4, %v3725_v54, %v3726_v34  ;;  %v5416_v0 = vpop.f32.mrf.mxu0 }
 0x1f7   : > { %v2741_v8 = vmul.f32 %v7309_v33, %v7655_v1  ;;  %v3373_v26 = vmul.f32 %v7329_v39, %v7728_v15  ;;  %v4039_v18 = vsel %vm709_vm3, %v4037_v40, %v4038_v62  ;;  %v2928_v10 = vrot.slane %v2817_v6, 1 }
 0x1f8   : > { %5447 = vmatmul.mubr.msk.f32.gmra.mxu1 %vm2544_vm5, %v4371_v25  ;;  %v3297_v16 = vmul.f32 %v7326_v22, %v7747_v20  ;;  %v3617_v56 = vmul.f32 %v7332_v30, %v7728_v15  ;;  %v3816_v24 = vadd.f32 %v3727_v32, %v3572_v23  ;;  %v4283_v46 = vsel %vm954_vm4, %v4281_v41, %v4282_v7  ;;  %v2505_v3 = vpop.f32.mrf.mxu0 }
 0x1f9   : > { %v3172_v1 = vrot.slane %v3061_v51, 2  ;;  %v3929_v35 = vmul.f32 %v7432_v13, %v7819_v52  ;;  %v2929_v2 = vsel %vm709_vm3, %v2926_v21, %v2928_v10  ;;  %v3484_v12 = vrot.slane %v3373_v26, 1 }
 0x1fa   : > { %v3728_v48 = vrot.slane %v3617_v56, 2  ;;  %v4173_v4 = vmul.f32 %v7435_v14, %v7819_v52  ;;  %v2511_v54 = vadd.f32 %v7867_v44, %v5416_v0  ;;  %v3884_v27 = vadd.f32 %v3852_v50, %v3816_v24 }
 0x1fb   : > { %v3017_v19 = vadd.f32 %v2929_v2, %v2741_v8  ;;  %v3853_v59 = vmul.f32 %v7376_v47, %v7837_v17  ;;  %v3173_v5 = vsel %vm954_vm4, %v3170_v28, %v3172_v1  ;;  %v3485_v40 = vsel %vm709_vm3, %v3482_v45, %v3484_v12 }
 0x1fc   : > { %v3729_v36 = vsel %vm954_vm4, %v3726_v34, %v3728_v48  ;;  %v4040_v21 = vrot.slane %v3929_v35, 1  ;;  %v2625_v11 = vmax.f32 %v2511_v54, 0.0  ;;  %v2506_v41 = vadd.f32 %v7867_v44, %v2505_v3 }
 0x1fd   : > { %v4128_v25 = vadd.f32 %v4039_v18, %v3884_v27  ;;  %v3261_v6 = vadd.f32 %v3173_v5, %v3017_v19  ;;  %v4284_v51 = vrot.slane %v4173_v4, 2  ;;  %v2742_v50 = vmul.f32 %v7309_v33, %v7745_v53 }
 0x1fe   : > { %v2818_v23 = vmul.f32 %v7315_v29, %v7745_v53  ;;  %v8175_v28 = vmul.f32 %v7315_v29, %v7747_v20  ;;  %2658 = vst.msk [vmem:[#allocation3 + $0x141] sm:$0xff] %vm2544_vm5, %v2625_v11  ;;  %v2624_v45 = vmax.f32 %v2506_v41, 0.0  ;;  %v3062_v8 = vmul.f32 %v7318_v63, %v7745_v53 }
 0x1ff   : > { %v4372_v34 = vadd.f32 %v4283_v46, %v4128_v25  ;;  %v3329_v32 = vadd.f32 %v3297_v16, %v3261_v6  ;;  %v4041_v26 = vsel %vm709_vm3, %v4038_v62, %v4040_v21  ;;  %v8184_v56 = vmul.f32 %v7318_v63, %v7747_v20  ;;  %v8194_v62 = vld [vmem:[#allocation3 + $0x198] sm:$0xff]  ;;  %v8196_v46 = vld [vmem:[#allocation3 + $0x1a0] sm:$0xff] }
 0x200   : > { %v2930_v18 = vrot.slane %v2818_v23, 1  ;;  %v2931_v10 = vrot.slane %v8175_v28, 1  ;;  %2657 = vst.msk [vmem:[#allocation3 + $0x139] sm:$0xff] %vm2544_vm5, %v2624_v45  ;;  %v3174_v1 = vrot.slane %v3062_v8, 2  ;;  %v3374_v16 = vmul.f32 %v7329_v39, %v7835_v43  ;;  %4770 = vst.msk [vmem:[#allocation3 + $0x198] sm:$0xff] %vm2544_vm5, %v5600_v38 }
 0x201   : > { %5449 = vmatprep.mubr.msk.f32.mxu1 %vm2544_vm5, %v4372_v34  ;;  %v3573_v24 = vadd.f32 %v3485_v40, %v3329_v32  ;;  %v8192_v53 = vmul.f32 %v7329_v39, %v7837_v17  ;;  %v3175_v0 = vrot.slane %v8184_v56, 2  ;;  %v3618_v2 = vmul.f32 %v7332_v30, %v7835_v43  ;;  %4771 = vst.msk [vmem:[#allocation3 + $0x1a0] sm:$0xff] %vm2544_vm5, %v5600_v38  ;;  %v8235_v45 = vld [vmem:[#allocation3 + $0x1a8] sm:$0x3] }
 0x202   : > { %v2932_v35 = vsel %vm709_vm3, %v2930_v18, %v2931_v10  ;;  %v8204_v12 = vmul.f32 %v7332_v30, %v7837_v17  ;;  %v3486_v54 = vrot.slane %v3374_v16, 1  ;;  %v4285_v19 = vsel %vm954_vm4, %v4282_v7, %v4284_v51  ;;  %4772 = vst.msk [vmem:[#allocation3 + $0x1a8] sm:$0x3] %vm2547_vm6, %v5600_v38 }
 0x203   : > { %v3817_v48 = vadd.f32 %v3729_v36, %v3573_v24  ;;  %v3018_v4 = vadd.f32 %v2932_v35, %v2742_v50  ;;  %v3487_v27 = vrot.slane %v8192_v53, 1  ;;  %v3176_v3 = vsel %vm954_vm4, %v3174_v1, %v3175_v0 }
 0x204   : > { %v3730_v5 = vrot.slane %v3618_v2, 2  ;;  %v3731_v40 = vrot.slane %v8204_v12, 2  ;;  %v3298_v41 = vmul.f32 %v7326_v22, %v7835_v43  ;;  %v3930_v36 = vmul.f32 %v7432_v13, %v7930_v60 }
 0x205   : > { %v3885_v21 = vadd.f32 %v3853_v59, %v3817_v48  ;;  %v3262_v11 = vadd.f32 %v3176_v3, %v3018_v4  ;;  %v8220_v25 = vld [vmem:[#allocation3 + $0x148] sm:$0x3]  ;;  %v3854_v57 = vmul.f32 %v7376_v47, %v7930_v60  ;;  %v3931_v7 = vmul.f32 %v7432_v13, %v7932_v49 }
 0x206   : > { %v4174_v6 = vmul.f32 %v7435_v14, %v7930_v60  ;;  %v8230_v59 = vmul.f32 %v7435_v14, %v7932_v49  ;;  %4760 = vst.msk [vmem:[#allocation3 + $0x148] sm:$0x3] %vm2547_vm6, %v5600_v38  ;;  %v3488_v23 = vsel %vm709_vm3, %v3486_v54, %v3487_v27  ;;  %v4042_v28 = vrot.slane %v3930_v36, 1 }
 0x207   : > { %v4129_v51 = vadd.f32 %v4041_v26, %v3885_v21  ;;  %v3330_v50 = vadd.f32 %v3298_v41, %v3262_v11  ;;  %v3732_v34 = vsel %vm954_vm4, %v3730_v5, %v3731_v40  ;;  %v4043_v32 = vrot.slane %v3931_v7, 1  ;;  %v8240_v56 = vld [vmem:[#allocation3 + $0x138] sm:$0xff]  ;;  %v8242_v24 = vld [vmem:[#allocation3 + $0x140] sm:$0xff] }
 0x208   : > { %v4286_v8 = vrot.slane %v4174_v6, 2  ;;  %v2820_v18 = vmul.f32 %v7315_v29, %v7728_v15  ;;  %v4287_v16 = vrot.slane %v8230_v59, 2  ;;  %v3064_v53 = vmul.f32 %v7318_v63, %v7728_v15  ;;  %4758 = vst.msk [vmem:[#allocation3 + $0x138] sm:$0xff] %vm2544_vm5, %v5600_v38  ;;  %4759 = vst.msk [vmem:[#allocation3 + $0x140] sm:$0xff] %vm2544_vm5, %v5600_v38 }
 0x209   : > { %v4373_v26 = vadd.f32 %v4285_v19, %v4129_v51  ;;  %v3574_v1 = vadd.f32 %v3488_v23, %v3330_v50  ;;  %v2743_v35 = vmul.f32 %v7309_v33, %v7747_v20  ;;  %v3299_v12 = vmul.f32 %v7326_v22, %v7837_v17 }
 0x20a   : > { %v2933_v2 = vrot.slane %v2820_v18, 1  ;;  %v3376_v48 = vmul.f32 %v7329_v39, %v7819_v52  ;;  %v4044_v15 = vsel %vm709_vm3, %v4042_v28, %v4043_v32  ;;  %v3177_v54 = vrot.slane %v3064_v53, 2 }
 0x20b   : > { %5450 = vmatmul.mubr.msk.f32.gmra.mxu1 %vm2544_vm5, %v4373_v26  ;;  %v3818_v4 = vadd.f32 %v3732_v34, %v3574_v1  ;;  %v3620_v19 = vmul.f32 %v7332_v30, %v7819_v52  ;;  %v3932_v20 = vmul.f32 %v7432_v13, %v7915_v58  ;;  %v4176_v21 = vmul.f32 %v7435_v14, %v7915_v58 }
 0x20c   : > { %v2934_v3 = vsel %vm709_vm3, %v2931_v10, %v2933_v2  ;;  %v3489_v5 = vrot.slane %v3376_v48, 1  ;;  %v4288_v41 = vsel %vm954_vm4, %v4286_v8, %v4287_v16  ;;  %v3855_v7 = vmul.f32 %v7376_v47, %v7932_v49 }
 0x20d   : > { %v3886_v11 = vadd.f32 %v3854_v57, %v3818_v4  ;;  %v3019_v36 = vadd.f32 %v2934_v3, %v2743_v35  ;;  %v3178_v6 = vsel %vm954_vm4, %v3175_v0, %v3177_v54  ;;  %v3733_v51 = vrot.slane %v3620_v19, 2 }
 0x20e   : > { %v3490_v59 = vsel %vm709_vm3, %v3487_v27, %v3489_v5  ;;  %v4045_v10 = vrot.slane %v3932_v20, 1  ;;  %v4289_v28 = vrot.slane %v4176_v21, 2  ;;  %v2821_v34 = vmul.f32 %v7315_v29, %v7835_v43 }
 0x20f   : > { %v4130_v50 = vadd.f32 %v4044_v15, %v3886_v11  ;;  %v3263_v23 = vadd.f32 %v3178_v6, %v3019_v36  ;;  %v3734_v57 = vsel %vm954_vm4, %v3731_v40, %v3733_v51  ;;  %v2744_v8 = vmul.f32 %v7309_v33, %v7835_v43 }
 0x210   : > { %v8280_v18 = vmul.f32 %v7315_v29, %v7837_v17  ;;  %v3065_v0 = vmul.f32 %v7318_v63, %v7835_v43  ;;  %v2935_v1 = vrot.slane %v2821_v34, 1  ;;  %v8286_v53 = vmul.f32 %v7318_v63, %v7837_v17 }
 0x211   : > { %v4374_v27 = vadd.f32 %v4288_v41, %v4130_v50  ;;  %v3331_v26 = vadd.f32 %v3299_v12, %v3263_v23  ;;  %v4046_v35 = vsel %vm709_vm3, %v4043_v32, %v4045_v10  ;;  %v3377_v48 = vmul.f32 %v7329_v39, %v7930_v60 }
 0x212   : > { %v2936_v40 = vrot.slane %v8280_v18, 1  ;;  %v3179_v2 = vrot.slane %v3065_v0, 2  ;;  %v3180_v43 = vrot.slane %v8286_v53, 2  ;;  %v8296_v12 = vmul.f32 %v7329_v39, %v7932_v49 }
 0x213   : > { %5452 = vmatprep.mubr.msk.f32.mxu1 %vm2544_vm5, %v4374_v27  ;;  %v3575_v4 = vadd.f32 %v3490_v59, %v3331_v26  ;;  %v3621_v15 = vmul.f32 %v7332_v30, %v7930_v60  ;;  %v4290_v32 = vsel %vm954_vm4, %v4287_v16, %v4289_v28  ;;  %v3491_v19 = vrot.slane %v3377_v48, 1  ;;  %v5422_v59 = vpop.f32.mrf.mxu1 }
 0x214   : > { %v2937_v54 = vsel %vm709_vm3, %v2935_v1, %v2936_v40  ;;  %v8306_v3 = vmul.f32 %v7332_v30, %v7932_v49  ;;  %v3181_v21 = vsel %vm954_vm4, %v3179_v2, %v3180_v43  ;;  %v3492_v11 = vrot.slane %v8296_v12, 1 }
 0x215   : > { %v3819_v5 = vadd.f32 %v3734_v57, %v3575_v4  ;;  %v3020_v20 = vadd.f32 %v2937_v54, %v2744_v8  ;;  %v3735_v41 = vrot.slane %v3621_v15, 2  ;;  %v3933_v36 = vmul.f32 %v7432_v13, %v8034_v42  ;;  %v2525_v0 = vpop.f32.mrf.mxu1 }
 0x216   : > { %v3736_v16 = vrot.slane %v8306_v3, 2  ;;  %v8317_v6 = vmul.f32 %v7432_v13, %v8036_v37  ;;  %v3300_v50 = vmul.f32 %v7326_v22, %v7930_v60  ;;  %v4177_v23 = vmul.f32 %v7435_v14, %v8034_v42 }
 0x217   : > { %v3887_v51 = vadd.f32 %v3855_v7, %v3819_v5  ;;  %v3264_v10 = vadd.f32 %v3181_v21, %v3020_v20  ;;  %v2531_v28 = vadd.f32 %v7867_v44, %v5422_v59  ;;  %v3856_v34 = vmul.f32 %v7376_v47, %v8034_v42  ;;  %v5282_v5 = vld [vmem:[%s5842_s16 + $0xc0] ss:$2 sm:$0xff] }
 0x218   : > { %v4047_v57 = vrot.slane %v3933_v36, 1  ;;  %v4048_v8 = vrot.slane %v8317_v6, 1  ;;  %v3493_v26 = vsel %vm709_vm3, %v3491_v19, %v3492_v11  ;;  %v8330_v1 = vmul.f32 %v7435_v14, %v8036_v37  ;;  %v5283_v20 = vld [vmem:[%s5842_s16 + $0xe0] ss:$2 sm:$0xff]  ;;  %5487 = vmatprep.mubr.msk.f32.mxu0 %vm331_vm1, %v5282_v5 }
 0x219   : > { %v4131_v27 = vadd.f32 %v4046_v35, %v3887_v51  ;;  %v3332_v7 = vadd.f32 %v3300_v50, %v3264_v10  ;;  %v2629_v2 = vmax.f32 %v2531_v28, 0.0  ;;  %v2526_v48 = vadd.f32 %v7867_v44, %v2525_v0  ;;  %5488 = vmatmul.mubr.msk.f32.gmra.mxu0 %vm331_vm1, %v5283_v20  ;;  %v5419_v10 = vpop.f32.mrf.mxu0 }
 0x21a   : > { %v3737_v4 = vsel %vm954_vm4, %v3735_v41, %v3736_v16  ;;  %v4291_v12 = vrot.slane %v4177_v23, 2  ;;  %v4292_v3 = vrot.slane %v8330_v1, 2  ;;  %v2823_v35 = vmul.f32 %v7315_v29, %v7819_v52 }
 0x21b   : > { %v4375_v15 = vadd.f32 %v4290_v32, %v4131_v27  ;;  %v3576_v54 = vadd.f32 %v3493_v26, %v3332_v7  ;;  %2662 = vst.msk [vmem:[#allocation3 + $0x171] sm:$0xff] %vm2544_vm5, %v2629_v2  ;;  %v2628_v19 = vmax.f32 %v2526_v48, 0.0  ;;  %v4049_v21 = vsel %vm709_vm3, %v4047_v57, %v4048_v8  ;;  %v2515_v7 = vpop.f32.mrf.mxu0 }
 0x21c   : > { %v3067_v36 = vmul.f32 %v7318_v63, %v7819_v52  ;;  %v3379_v41 = vmul.f32 %v7329_v39, %v7915_v58  ;;  %v2745_v6 = vmul.f32 %v7309_v33, %v7837_v17  ;;  %v2938_v59 = vrot.slane %v2823_v35, 1 }
 0x21d   : > { %5453 = vmatmul.mubr.msk.f32.gmra.mxu1 %vm2544_vm5, %v4375_v15  ;;  %v3820_v32 = vadd.f32 %v3737_v4, %v3576_v54  ;;  %v3623_v51 = vmul.f32 %v7332_v30, %v7915_v58  ;;  %2661 = vst.msk [vmem:[#allocation3 + $0x169] sm:$0xff] %vm2544_vm5, %v2628_v19  ;;  %v4293_v52 = vsel %vm954_vm4, %v4291_v12, %v4292_v3 }
 0x21e   : > { %v3182_v50 = vrot.slane %v3067_v36, 2  ;;  %v3301_v23 = vmul.f32 %v7326_v22, %v7932_v49  ;;  %v3935_v17 = vmul.f32 %v7432_v13, %v8014_v9  ;;  %v2521_v28 = vadd.f32 %v7867_v44, %v5419_v10 }
 0x21f   : > { %v3888_v57 = vadd.f32 %v3856_v34, %v3820_v32  ;;  %v2939_v0 = vsel %vm709_vm3, %v2936_v40, %v2938_v59  ;;  %v3494_v27 = vrot.slane %v3379_v41, 1  ;;  %v3738_v48 = vrot.slane %v3623_v51, 2 }
 0x220   : > { %v3021_v26 = vadd.f32 %v2939_v0, %v2745_v6  ;;  %v3183_v2 = vsel %vm954_vm4, %v3180_v43, %v3182_v50  ;;  %v3857_v4 = vmul.f32 %v7376_v47, %v8036_v37  ;;  %v2627_v12 = vmax.f32 %v2521_v28, 0.0 }
 0x221   : > { %v2516_v15 = vadd.f32 %v7867_v44, %v2515_v7  ;;  %v4132_v54 = vadd.f32 %v4049_v21, %v3888_v57  ;;  %v3495_v34 = vsel %vm709_vm3, %v3492_v11, %v3494_v27  ;;  %v3739_v40 = vsel %vm954_vm4, %v3736_v16, %v3738_v48 }
 0x222   : > { %v3265_v18 = vadd.f32 %v3183_v2, %v3021_v26  ;;  %v4050_v35 = vrot.slane %v3935_v17, 1  ;;  %v4179_v5 = vmul.f32 %v7435_v14, %v8014_v9  ;;  %v8374_v53 = vld [vmem:[#allocation3 + $0x178] sm:$0x3]  ;;  %2660 = vst.msk [vmem:[#allocation3 + $0x159] sm:$0xff] %vm2544_vm5, %v2627_v12  ;;  %v2824_v19 = vmul.f32 %v7315_v29, %v7930_v60 }
 0x223   : > { %v2626_v43 = vmax.f32 %v2516_v15, 0.0  ;;  %v4376_v20 = vadd.f32 %v4293_v52, %v4132_v54  ;;  %v8381_v44 = vmul.f32 %v7315_v29, %v7932_v49  ;;  %4766 = vst.msk [vmem:[#allocation3 + $0x178] sm:$0x3] %vm2547_vm6, %v5600_v38  ;;  %v3068_v21 = vmul.f32 %v7318_v63, %v7930_v60 }
 0x224   : > { %v3333_v11 = vadd.f32 %v3301_v23, %v3265_v18  ;;  %v4051_v16 = vsel %vm709_vm3, %v4048_v8, %v4050_v35  ;;  %v8390_v36 = vmul.f32 %v7318_v63, %v7932_v49  ;;  %v2746_v41 = vmul.f32 %v7309_v33, %v7930_v60  ;;  %v8399_v59 = vld [vmem:[#allocation3 + $0x168] sm:$0xff]  ;;  %v8401_v51 = vld [vmem:[#allocation3 + $0x170] sm:$0xff] }
 0x225   : > { %2659 = vst.msk [vmem:[#allocation3 + $0x151] sm:$0xff] %vm2544_vm5, %v2626_v43  ;;  %5455 = vmatprep.mubr.msk.f32.mxu1 %vm2544_vm5, %v4376_v20  ;;  %v2940_v32 = vrot.slane %v2824_v19, 1  ;;  %v2941_v6 = vrot.slane %v8381_v44, 1  ;;  %v3380_v8 = vmul.f32 %v7329_v39, %v8034_v42  ;;  %v4294_v52 = vrot.slane %v4179_v5, 2  ;;  %4764 = vst.msk [vmem:[#allocation3 + $0x168] sm:$0xff] %vm2544_vm5, %v5600_v38 }
 0x226   : > { %v3577_v10 = vadd.f32 %v3495_v34, %v3333_v11  ;;  %v3184_v50 = vrot.slane %v3068_v21, 2  ;;  %v3185_v23 = vrot.slane %v8390_v36, 2  ;;  %4765 = vst.msk [vmem:[#allocation3 + $0x170] sm:$0xff] %vm2544_vm5, %v5600_v38  ;;  %v3302_v17 = vmul.f32 %v7326_v22, %v8034_v42 }
 0x227   : > { %v2942_v60 = vsel %vm709_vm3, %v2940_v32, %v2941_v6  ;;  %v8413_v28 = vmul.f32 %v7329_v39, %v8036_v37  ;;  %v3624_v57 = vmul.f32 %v7332_v30, %v8034_v42  ;;  %v3496_v7 = vrot.slane %v3380_v8, 1 }
 0x228   : > { %v3821_v0 = vadd.f32 %v3739_v40, %v3577_v10  ;;  %v3022_v27 = vadd.f32 %v2942_v60, %v2746_v41  ;;  %v8419_v26 = vmul.f32 %v7332_v30, %v8036_v37  ;;  %v3186_v2 = vsel %vm954_vm4, %v3184_v50, %v3185_v23 }
 0x229   : > { %v3497_v48 = vrot.slane %v8413_v28, 1  ;;  %v3740_v12 = vrot.slane %v3624_v57, 2  ;;  %v3936_v15 = vmul.f32 %v7432_v13, %v8129_v61  ;;  %v8427_v54 = vld [vmem:[#allocation3 + $0x160] sm:$0x3]  ;;  %v3937_v35 = vmul.f32 %v7432_v13, %v8131_v31 }
 0x22a   : > { %v3889_v34 = vadd.f32 %v3857_v4, %v3821_v0  ;;  %v3266_v18 = vadd.f32 %v3186_v2, %v3022_v27  ;;  %v3741_v40 = vrot.slane %v8419_v26, 2  ;;  %4763 = vst.msk [vmem:[#allocation3 + $0x160] sm:$0x3] %vm2547_vm6, %v5600_v38  ;;  %v4295_v5 = vsel %vm954_vm4, %v4292_v3, %v4294_v52  ;;  %v5425_v27 = vpop.f32.mrf.mxu1 }
 0x22b   : > { %v4052_v43 = vrot.slane %v3936_v15, 1  ;;  %v4180_v20 = vmul.f32 %v7435_v14, %v8129_v61  ;;  %v8441_v4 = vmul.f32 %v7435_v14, %v8131_v31  ;;  %v3858_v11 = vmul.f32 %v7376_v47, %v8129_v61 }
 0x22c   : > { %v4133_v19 = vadd.f32 %v4051_v16, %v3889_v34  ;;  %v3334_v44 = vadd.f32 %v3302_v17, %v3266_v18  ;;  %v4053_v21 = vrot.slane %v3937_v35, 1  ;;  %v8445_v41 = vld [vmem:[#allocation3 + $0x150] sm:$0xff]  ;;  %v8447_v32 = vld [vmem:[#allocation3 + $0x158] sm:$0xff]  ;;  %v3498_v1 = vsel %vm709_vm3, %v3496_v7, %v3497_v48  ;;  %v2535_v35 = vpop.f32.mrf.mxu1 }
 0x22d   : > { %v4296_v3 = vrot.slane %v4180_v20, 2  ;;  %v4297_v8 = vrot.slane %v8441_v4, 2  ;;  %v2826_v10 = vmul.f32 %v7315_v29, %v7915_v58  ;;  %4761 = vst.msk [vmem:[#allocation3 + $0x150] sm:$0xff] %vm2544_vm5, %v5600_v38  ;;  %4762 = vst.msk [vmem:[#allocation3 + $0x158] sm:$0xff] %vm2544_vm5, %v5600_v38  ;;  %v3742_v50 = vsel %vm954_vm4, %v3740_v12, %v3741_v40 }
 0x22e   : > { %v4377_v16 = vadd.f32 %v4295_v5, %v4133_v19  ;;  %v3578_v52 = vadd.f32 %v3498_v1, %v3334_v44  ;;  %v3070_v60 = vmul.f32 %v7318_v63, %v7915_v58  ;;  %v4054_v17 = vsel %vm709_vm3, %v4052_v43, %v4053_v21 }
 0x22f   : > { %v2747_v28 = vmul.f32 %v7309_v33, %v7932_v49  ;;  %v2943_v57 = vrot.slane %v2826_v10, 1  ;;  %v3382_v0 = vmul.f32 %v7329_v39, %v8014_v9  ;;  %v4298_v26 = vsel %vm954_vm4, %v4296_v3, %v4297_v8  ;;  %v5536_v49 = vld [vmem:[%s9012_s3] ss:$0 sm:$0xff] }
 0x230   : > { %5456 = vmatmul.mubr.msk.f32.gmra.mxu1 %vm2544_vm5, %v4377_v16  ;;  %v3822_v7 = vadd.f32 %v3742_v50, %v3578_v52  ;;  %v3303_v58 = vmul.f32 %v7326_v22, %v8036_v37  ;;  %v3626_v2 = vmul.f32 %v7332_v30, %v8014_v9  ;;  %v2541_v12 = vadd.f32 %v5536_v49, %v5425_v27 }
 0x231   : > { %v2944_v15 = vsel %vm709_vm3, %v2941_v6, %v2943_v57  ;;  %v3187_v34 = vrot.slane %v3070_v60, 2  ;;  %v3938_v18 = vmul.f32 %v7432_v13, %v8112_v55  ;;  %v3499_v20 = vrot.slane %v3382_v0, 1 }
 0x232   : > { %v3890_v5 = vadd.f32 %v3858_v11, %v3822_v7  ;;  %v3023_v43 = vadd.f32 %v2944_v15, %v2747_v28  ;;  %v3859_v19 = vmul.f32 %v7376_v47, %v8131_v31  ;;  %v2631_v44 = vmax.f32 %v2541_v12, 0.0 }
 0x233   : > { %v2536_v1 = vadd.f32 %v5536_v49, %v2535_v35  ;;  %v3188_v3 = vsel %vm954_vm4, %v3185_v23, %v3187_v34  ;;  %v3743_v10 = vrot.slane %v3626_v2, 2  ;;  %v4055_v52 = vrot.slane %v3938_v18, 1 }
 0x234   : > { %v4134_v16 = vadd.f32 %v4054_v17, %v3890_v5  ;;  %v3267_v6 = vadd.f32 %v3188_v3, %v3023_v43  ;;  %v4182_v50 = vmul.f32 %v7435_v14, %v8112_v55  ;;  %2664 = vst.msk [vmem:[#allocation3 + $0x189] sm:$0xff] %vm2544_vm5, %v2631_v44  ;;  %v3500_v60 = vsel %vm709_vm3, %v3497_v48, %v3499_v20 }
 0x235   : > { %v2630_v11 = vmax.f32 %v2536_v1, 0.0  ;;  %v3744_v28 = vsel %vm954_vm4, %v3741_v40, %v3743_v10  ;;  %v2827_v57 = vmul.f32 %v7315_v29, %v8034_v42  ;;  %v4056_v23 = vsel %vm709_vm3, %v4053_v21, %v4055_v52 }
 0x236   : > { %v4378_v36 = vadd.f32 %v4298_v26, %v4134_v16  ;;  %v3335_v0 = vadd.f32 %v3303_v58, %v3267_v6  ;;  %v8494_v17 = vmul.f32 %v7315_v29, %v8036_v37  ;;  %v2748_v27 = vmul.f32 %v7309_v33, %v8034_v42 }
 0x237   : > { %2663 = vst.msk [vmem:[#allocation3 + $0x181] sm:$0xff] %vm2544_vm5, %v2630_v11  ;;  %v2945_v7 = vrot.slane %v2827_v57, 1  ;;  %v3071_v48 = vmul.f32 %v7318_v63, %v8034_v42  ;;  %v8503_v40 = vmul.f32 %v7318_v63, %v8036_v37  ;;  %v4299_v26 = vrot.slane %v4182_v50, 2 }
 0x238   : > { %5458 = vmatprep.mubr.msk.f32.mxu1 %vm2544_vm5, %v4378_v36  ;;  %v3579_v21 = vadd.f32 %v3500_v60, %v3335_v0  ;;  %v2946_v58 = vrot.slane %v8494_v17, 1  ;;  %v3383_v2 = vmul.f32 %v7329_v39, %v8129_v61  ;;  %v3384_v15 = vmul.f32 %v7329_v39, %v8131_v31 }
 0x239   : > { %v3189_v49 = vrot.slane %v3071_v48, 2  ;;  %v3190_v12 = vrot.slane %v8503_v40, 2  ;;  %v3627_v42 = vmul.f32 %v7332_v30, %v8129_v61  ;;  %v3304_v35 = vmul.f32 %v7326_v22, %v8129_v61 }
 0x23a   : > { %v3823_v34 = vadd.f32 %v3744_v28, %v3579_v21  ;;  %v2947_v18 = vsel %vm709_vm3, %v2945_v7, %v2946_v58  ;;  %v3628_v5 = vmul.f32 %v7332_v30, %v8131_v31  ;;  %v4300_v43 = vsel %vm954_vm4, %v4297_v8, %v4299_v26 }
 0x23b   : > { %v3024_v20 = vadd.f32 %v2947_v18, %v2748_v27  ;;  %v3501_v44 = vrot.slane %v3383_v2, 1  ;;  %v3502_v1 = vrot.slane %v3384_v15, 1  ;;  %v8522_v3 = vld [vmem:[#allocation3 + $0x190] sm:$0x3]  ;;  %v3191_v16 = vsel %vm954_vm4, %v3189_v49, %v3190_v12 }
 0x23c   : > { %v3891_v10 = vadd.f32 %v3859_v19, %v3823_v34  ;;  %v3745_v6 = vrot.slane %v3627_v42, 2  ;;  %v3939_v52 = vmul.f32 %v7432_v13, %v8240_v56  ;;  %4769 = vst.msk [vmem:[#allocation3 + $0x190] sm:$0x3] %vm2547_vm6, %v5600_v38  ;;  %v3746_v11 = vrot.slane %v3628_v5, 2 }
 0x23d   : > { %v3268_v50 = vadd.f32 %v3191_v16, %v3024_v20  ;;  %v3940_v4 = vmul.f32 %v7432_v13, %v8242_v24  ;;  %v4183_v8 = vmul.f32 %v7435_v14, %v8240_v56  ;;  %v3860_v19 = vmul.f32 %v7376_v47, %v8240_v56 }
 0x23e   : > { %v4135_v60 = vadd.f32 %v4056_v23, %v3891_v10  ;;  %v4057_v28 = vrot.slane %v3939_v52, 1  ;;  %v4184_v57 = vmul.f32 %v7435_v14, %v8242_v24  ;;  %v8537_v36 = vld [vmem:[#allocation3 + $0x180] sm:$0xff]  ;;  %v8539_v0 = vld [vmem:[#allocation3 + $0x188] sm:$0xff]  ;;  %v3503_v27 = vsel %vm709_vm3, %v3501_v44, %v3502_v1 }
 0x23f   : > { %v3336_v17 = vadd.f32 %v3304_v35, %v3268_v50  ;;  %v4058_v7 = vrot.slane %v3940_v4, 1  ;;  %v4301_v48 = vrot.slane %v4183_v8, 2  ;;  %4767 = vst.msk [vmem:[#allocation3 + $0x180] sm:$0xff] %vm2544_vm5, %v5600_v38  ;;  %4768 = vst.msk [vmem:[#allocation3 + $0x188] sm:$0xff] %vm2544_vm5, %v5600_v38  ;;  %v2829_v21 = vmul.f32 %v7315_v29, %v8014_v9 }
 0x240   : > { %v4379_v23 = vadd.f32 %v4300_v43, %v4135_v60  ;;  %v4302_v40 = vrot.slane %v4184_v57, 2  ;;  %v3073_v26 = vmul.f32 %v7318_v63, %v8014_v9  ;;  %v3747_v49 = vsel %vm954_vm4, %v3745_v6, %v3746_v11 }
 0x241   : > { %v3580_v2 = vadd.f32 %v3503_v27, %v3336_v17  ;;  %v2749_v15 = vmul.f32 %v7309_v33, %v8036_v37  ;;  %v3385_v42 = vmul.f32 %v7329_v39, %v8112_v55  ;;  %v4059_v38 = vsel %vm709_vm3, %v4057_v28, %v4058_v7 }
 0x242   : > { %5459 = vmatmul.mubr.msk.f32.gmra.mxu1 %vm2544_vm5, %v4379_v23  ;;  %v2948_v34 = vrot.slane %v2829_v21, 1  ;;  %v3305_v18 = vmul.f32 %v7326_v22, %v8131_v31  ;;  %v3629_v9 = vmul.f32 %v7332_v30, %v8112_v55  ;;  %v4303_v5 = vsel %vm954_vm4, %v4301_v48, %v4302_v40 }
 0x243   : > { %v3824_v35 = vadd.f32 %v3747_v49, %v3580_v2  ;;  %v3192_v43 = vrot.slane %v3073_v26, 2  ;;  %v3941_v37 = vmul.f32 %v7432_v13, %v8220_v25  ;;  %v3504_v44 = vrot.slane %v3385_v42, 1 }
 0x244   : > { %v2949_v20 = vsel %vm709_vm3, %v2946_v58, %v2948_v34  ;;  %v3748_v10 = vrot.slane %v3629_v9, 2  ;;  %v4185_v16 = vmul.f32 %v7435_v14, %v8220_v25  ;;  %v3861_v4 = vmul.f32 %v7376_v47, %v8242_v24 }
 0x245   : > { %v3892_v6 = vadd.f32 %v3860_v19, %v3824_v35  ;;  %v3025_v52 = vadd.f32 %v2949_v20, %v2749_v15  ;;  %v3193_v50 = vsel %vm954_vm4, %v3190_v12, %v3192_v43  ;;  %v3505_v8 = vsel %vm709_vm3, %v3502_v1, %v3504_v44 }
 0x246   : > { %v3749_v60 = vsel %vm954_vm4, %v3746_v11, %v3748_v10  ;;  %v4060_v28 = vrot.slane %v3941_v37, 1  ;;  %v2830_v58 = vmul.f32 %v7315_v29, %v8129_v61  ;;  %v4304_v27 = vrot.slane %v4185_v16, 2 }
 0x247   : > { %v4136_v57 = vadd.f32 %v4059_v38, %v3892_v6  ;;  %v3269_v17 = vadd.f32 %v3193_v50, %v3025_v52  ;;  %v2831_v19 = vmul.f32 %v7315_v29, %v8131_v31  ;;  %v2750_v12 = vmul.f32 %v7309_v33, %v8129_v61 }
 0x248   : > { %v2950_v48 = vrot.slane %v2830_v58, 1  ;;  %v3074_v23 = vmul.f32 %v7318_v63, %v8129_v61  ;;  %v3075_v1 = vmul.f32 %v7318_v63, %v8131_v31  ;;  %v4061_v26 = vsel %vm709_vm3, %v4058_v7, %v4060_v28 }
 0x249   : > { %v4380_v11 = vadd.f32 %v4303_v5, %v4136_v57  ;;  %v3337_v21 = vadd.f32 %v3305_v18, %v3269_v17  ;;  %v2951_v2 = vrot.slane %v2831_v19, 1  ;;  %v3386_v42 = vmul.f32 %v7329_v39, %v8240_v56 }
 0x24a   : > { %v3194_v49 = vrot.slane %v3074_v23, 2  ;;  %v3195_v15 = vrot.slane %v3075_v1, 2  ;;  %v3387_v38 = vmul.f32 %v7329_v39, %v8242_v24  ;;  %v3630_v9 = vmul.f32 %v7332_v30, %v8240_v56 }
 0x24b   : > { %5461 = vmatprep.mubr.msk.f32.mxu1 %vm2544_vm5, %v4380_v11  ;;  %v3581_v34 = vadd.f32 %v3505_v8, %v3337_v21  ;;  %v2952_v61 = vsel %vm709_vm3, %v2950_v48, %v2951_v2  ;;  %v3631_v7 = vmul.f32 %v7332_v30, %v8242_v24  ;;  %v4305_v18 = vsel %vm954_vm4, %v4302_v40, %v4304_v27 }
 0x24c   : > { %v3026_v35 = vadd.f32 %v2952_v61, %v2750_v12  ;;  %v3506_v5 = vrot.slane %v3386_v42, 1  ;;  %v3507_v43 = vrot.slane %v3387_v38, 1  ;;  %v3196_v20 = vsel %vm954_vm4, %v3194_v49, %v3195_v15 }
 0x24d   : > { %v3825_v37 = vadd.f32 %v3749_v60, %v3581_v34  ;;  %v3750_v44 = vrot.slane %v3630_v9, 2  ;;  %v3751_v10 = vrot.slane %v3631_v7, 2  ;;  %v3306_v6 = vmul.f32 %v7326_v22, %v8240_v56 }
 0x24e   : > { %v3270_v16 = vadd.f32 %v3196_v20, %v3026_v35  ;;  %v3942_v52 = vmul.f32 %v7432_v13, %v8445_v41  ;;  %v3943_v50 = vmul.f32 %v7432_v13, %v8447_v32  ;;  %v3862_v40 = vmul.f32 %v7376_v47, %v8445_v41 }
 0x24f   : > { %v3893_v8 = vadd.f32 %v3861_v4, %v3825_v37  ;;  %v4186_v60 = vmul.f32 %v7435_v14, %v8445_v41  ;;  %v4187_v28 = vmul.f32 %v7435_v14, %v8447_v32  ;;  %v3508_v57 = vsel %vm709_vm3, %v3506_v5, %v3507_v43 }
 0x250   : > { %v3338_v58 = vadd.f32 %v3306_v6, %v3270_v16  ;;  %v4062_v17 = vrot.slane %v3942_v52, 1  ;;  %v4063_v27 = vrot.slane %v3943_v50, 1  ;;  %v3752_v12 = vsel %vm954_vm4, %v3750_v44, %v3751_v10 }
 0x251   : > { %v4137_v19 = vadd.f32 %v4061_v26, %v3893_v8  ;;  %v2751_v4 = vmul.f32 %v7309_v33, %v8131_v31  ;;  %v2832_v48 = vmul.f32 %v7315_v29, %v8112_v55  ;;  %v4306_v1 = vrot.slane %v4186_v60, 2 }
 0x252   : > { %v3582_v23 = vadd.f32 %v3508_v57, %v3338_v58  ;;  %v4307_v11 = vrot.slane %v4187_v28, 2  ;;  %v3076_v21 = vmul.f32 %v7318_v63, %v8112_v55  ;;  %v4064_v42 = vsel %vm709_vm3, %v4062_v17, %v4063_v27 }
 0x253   : > { %v4381_v49 = vadd.f32 %v4305_v18, %v4137_v19  ;;  %v2953_v38 = vrot.slane %v2832_v48, 1  ;;  %v3388_v26 = vmul.f32 %v7329_v39, %v8220_v25  ;;  %v3307_v31 = vmul.f32 %v7326_v22, %v8242_v24 }
 0x254   : > { %v3826_v34 = vadd.f32 %v3752_v12, %v3582_v23  ;;  %v3197_v61 = vrot.slane %v3076_v21, 2  ;;  %v3632_v9 = vmul.f32 %v7332_v30, %v8220_v25  ;;  %v3944_v18 = vmul.f32 %v7432_v13, %v8427_v54 }
 0x255   : > { %5462 = vmatmul.mubr.msk.f32.gmra.mxu1 %vm2544_vm5, %v4381_v49  ;;  %v2954_v7 = vsel %vm709_vm3, %v2951_v2, %v2953_v38  ;;  %v3509_v55 = vrot.slane %v3388_v26, 1  ;;  %v4188_v35 = vmul.f32 %v7435_v14, %v8427_v54  ;;  %v4308_v37 = vsel %vm954_vm4, %v4306_v1, %v4307_v11 }
 0x256   : > { %v3894_v5 = vadd.f32 %v3862_v40, %v3826_v34  ;;  %v3027_v20 = vadd.f32 %v2954_v7, %v2751_v4  ;;  %v3863_v44 = vmul.f32 %v7376_v47, %v8447_v32  ;;  %v3198_v16 = vsel %vm954_vm4, %v3195_v15, %v3197_v61 }
 0x257   : > { %v3510_v6 = vsel %vm709_vm3, %v3507_v43, %v3509_v55  ;;  %v3753_v52 = vrot.slane %v3632_v9, 2  ;;  %v4065_v2 = vrot.slane %v3944_v18, 1  ;;  %v4309_v60 = vrot.slane %v4188_v35, 2 }
 0x258   : > { %v4138_v50 = vadd.f32 %v4064_v42, %v3894_v5  ;;  %v3271_v8 = vadd.f32 %v3198_v16, %v3027_v20  ;;  %v2833_v28 = vmul.f32 %v7315_v29, %v8240_v56  ;;  %v2752_v58 = vmul.f32 %v7309_v33, %v8240_v56 }
 0x259   : > { %v3754_v40 = vsel %vm954_vm4, %v3751_v10, %v3753_v52  ;;  %v2834_v57 = vmul.f32 %v7315_v29, %v8242_v24  ;;  %v3077_v15 = vmul.f32 %v7318_v63, %v8240_v56  ;;  %v3078_v12 = vmul.f32 %v7318_v63, %v8242_v24 }
 0x25a   : > { %v4382_v43 = vadd.f32 %v4308_v37, %v4138_v50  ;;  %v3339_v17 = vadd.f32 %v3307_v31, %v3271_v8  ;;  %v2955_v19 = vrot.slane %v2833_v28, 1  ;;  %v4066_v4 = vsel %vm709_vm3, %v4063_v27, %v4065_v2 }
 0x25b   : > { %v2956_v48 = vrot.slane %v2834_v57, 1  ;;  %v3199_v23 = vrot.slane %v3077_v15, 2  ;;  %v3389_v10 = vmul.f32 %v7329_v39, %v8445_v41  ;;  %v3200_v21 = vrot.slane %v3078_v12, 2 }
 0x25c   : > { %5464 = vmatprep.mubr.msk.f32.mxu1 %vm2544_vm5, %v4382_v43  ;;  %v3583_v1 = vadd.f32 %v3510_v6, %v3339_v17  ;;  %v3390_v56 = vmul.f32 %v7329_v39, %v8447_v32  ;;  %v3633_v49 = vmul.f32 %v7332_v30, %v8445_v41  ;;  %v4310_v42 = vsel %vm954_vm4, %v4307_v11, %v4309_v60 }
 0x25d   : > { %v2957_v38 = vsel %vm709_vm3, %v2955_v19, %v2956_v48  ;;  %v3511_v27 = vrot.slane %v3389_v10, 1  ;;  %v3634_v26 = vmul.f32 %v7332_v30, %v8447_v32  ;;  %v3201_v31 = vsel %vm954_vm4, %v3199_v23, %v3200_v21 }
 0x25e   : > { %v3827_v34 = vadd.f32 %v3754_v40, %v3583_v1  ;;  %v3028_v61 = vadd.f32 %v2957_v38, %v2752_v58  ;;  %v3512_v9 = vrot.slane %v3390_v56, 1  ;;  %v3755_v7 = vrot.slane %v3633_v49, 2 }
 0x25f   : > { %v3756_v55 = vrot.slane %v3634_v26, 2  ;;  %v3945_v18 = vmul.f32 %v7432_v13, %v8399_v59  ;;  %v3946_v35 = vmul.f32 %v7432_v13, %v8401_v51  ;;  %v3308_v37 = vmul.f32 %v7326_v22, %v8445_v41 }
 0x260   : > { %v3895_v11 = vadd.f32 %v3863_v44, %v3827_v34  ;;  %v3272_v5 = vadd.f32 %v3201_v31, %v3028_v61  ;;  %v4189_v20 = vmul.f32 %v7435_v14, %v8399_v59  ;;  %v3864_v16 = vmul.f32 %v7376_v47, %v8399_v59 }
 0x261   : > { %v4067_v6 = vrot.slane %v3945_v18, 1  ;;  %v4068_v52 = vrot.slane %v3946_v35, 1  ;;  %v4190_v2 = vmul.f32 %v7435_v14, %v8401_v51  ;;  %v3513_v60 = vsel %vm709_vm3, %v3511_v27, %v3512_v9 }
 0x262   : > { %v4139_v50 = vadd.f32 %v4066_v4, %v3895_v11  ;;  %v3340_v8 = vadd.f32 %v3308_v37, %v3272_v5  ;;  %v4311_v44 = vrot.slane %v4189_v20, 2  ;;  %v3757_v28 = vsel %vm954_vm4, %v3755_v7, %v3756_v55 }
 0x263   : > { %v4312_v40 = vrot.slane %v4190_v2, 2  ;;  %v2835_v58 = vmul.f32 %v7315_v29, %v8220_v25  ;;  %v3079_v57 = vmul.f32 %v7318_v63, %v8220_v25  ;;  %v2753_v17 = vmul.f32 %v7309_v33, %v8242_v24 }
 0x264   : > { %v4383_v15 = vadd.f32 %v4310_v42, %v4139_v50  ;;  %v3584_v43 = vadd.f32 %v3513_v60, %v3340_v8  ;;  %v3391_v19 = vmul.f32 %v7329_v39, %v8427_v54  ;;  %v4069_v12 = vsel %vm709_vm3, %v4067_v6, %v4068_v52 }
 0x265   : > { %v2958_v4 = vrot.slane %v2835_v58, 1  ;;  %v3309_v23 = vmul.f32 %v7326_v22, %v8447_v32  ;;  %v3635_v10 = vmul.f32 %v7332_v30, %v8427_v54  ;;  %v4313_v1 = vsel %vm954_vm4, %v4311_v44, %v4312_v40 }
 0x266   : > { %5465 = vmatmul.mubr.msk.f32.gmra.mxu1 %vm2544_vm5, %v4383_v15  ;;  %v3828_v25 = vadd.f32 %v3757_v28, %v3584_v43  ;;  %v3202_v56 = vrot.slane %v3079_v57, 2  ;;  %v3947_v24 = vmul.f32 %v7432_v13, %v8374_v53  ;;  %v3514_v42 = vrot.slane %v3391_v19, 1 }
 0x267   : > { %v2959_v49 = vsel %vm709_vm3, %v2956_v48, %v2958_v4  ;;  %v3758_v38 = vrot.slane %v3635_v10, 2  ;;  %v4191_v27 = vmul.f32 %v7435_v14, %v8374_v53  ;;  %v3865_v61 = vmul.f32 %v7376_v47, %v8401_v51 }
 0x268   : > { %v3896_v26 = vadd.f32 %v3864_v16, %v3828_v25  ;;  %v3029_v34 = vadd.f32 %v2959_v49, %v2753_v17  ;;  %v4070_v31 = vrot.slane %v3947_v24, 1  ;;  %v3203_v7 = vsel %vm954_vm4, %v3200_v21, %v3202_v56 }
 0x269   : > { %v3515_v18 = vsel %vm709_vm3, %v3512_v9, %v3514_v42  ;;  %v3759_v35 = vsel %vm954_vm4, %v3756_v55, %v3758_v38  ;;  %v2836_v48 = vmul.f32 %v7315_v29, %v8445_v41  ;;  %v4314_v37 = vrot.slane %v4191_v27, 2 }
 0x26a   : > { %v4140_v11 = vadd.f32 %v4069_v12, %v3896_v26  ;;  %v3273_v5 = vadd.f32 %v3203_v7, %v3029_v34  ;;  %v2837_v20 = vmul.f32 %v7315_v29, %v8447_v32  ;;  %v2754_v16 = vmul.f32 %v7309_v33, %v8445_v41 }
 0x26b   : > { %v2960_v6 = vrot.slane %v2836_v48, 1  ;;  %v3080_v21 = vmul.f32 %v7318_v63, %v8445_v41  ;;  %v8706_v9 = vmul.f32 %v7318_v63, %v8447_v32  ;;  %v4071_v50 = vsel %vm709_vm3, %v4068_v52, %v4070_v31 }
 0x26c   : > { %v4384_v55 = vadd.f32 %v4313_v1, %v4140_v11  ;;  %v3341_v2 = vadd.f32 %v3309_v23, %v3273_v5  ;;  %v2961_v8 = vrot.slane %v2837_v20, 1  ;;  %v3392_v28 = vmul.f32 %v7329_v39, %v8399_v59  ;;  %v8742_v11 = vpop.f32.mrf.mxu1 }
 0x26d   : > { %v3204_v60 = vrot.slane %v3080_v21, 2  ;;  %v3205_v44 = vrot.slane %v8706_v9, 2  ;;  %v3393_v58 = vmul.f32 %v7329_v39, %v8401_v51  ;;  %v3636_v15 = vmul.f32 %v7332_v30, %v8399_v59 }
 0x26e   : > { %5467 = vmatprep.mubr.msk.f32.mxu1 %vm2544_vm5, %v4384_v55  ;;  %v3585_v41 = vadd.f32 %v3515_v18, %v3341_v2  ;;  %v2962_v57 = vsel %vm709_vm3, %v2960_v6, %v2961_v8  ;;  %v3637_v52 = vmul.f32 %v7332_v30, %v8401_v51  ;;  %v4315_v43 = vsel %vm954_vm4, %v4312_v40, %v4314_v37 }
 0x26f   : > { %v3030_v17 = vadd.f32 %v2962_v57, %v2754_v16  ;;  %v3516_v19 = vrot.slane %v3392_v28, 1  ;;  %v3517_v12 = vrot.slane %v3393_v58, 1  ;;  %v3206_v23 = vsel %vm954_vm4, %v3204_v60, %v3205_v44  ;;  %v8760_v57 = vpop.f32.mrf.mxu1 }
 0x270   : > { %v3829_v4 = vadd.f32 %v3759_v35, %v3585_v41  ;;  %v3760_v10 = vrot.slane %v3636_v15, 2  ;;  %v3761_v25 = vrot.slane %v3637_v52, 2  ;;  %v3310_v56 = vmul.f32 %v7326_v22, %v8399_v59 }
 0x271   : > { %v3274_v1 = vadd.f32 %v3206_v23, %v3030_v17  ;;  %v3948_v24 = vmul.f32 %v7432_v13, %v8537_v36  ;;  %v3949_v49 = vmul.f32 %v7432_v13, %v8539_v0  ;;  %v3866_v40 = vmul.f32 %v7376_v47, %v8537_v36 }
 0x272   : > { %v3897_v42 = vadd.f32 %v3865_v61, %v3829_v4  ;;  %v4192_v38 = vmul.f32 %v7435_v14, %v8537_v36  ;;  %v8734_v27 = vmul.f32 %v7435_v14, %v8539_v0  ;;  %v3518_v34 = vsel %vm709_vm3, %v3516_v19, %v3517_v12 }
 0x273   : > { %v3342_v26 = vadd.f32 %v3310_v56, %v3274_v1  ;;  %v4072_v31 = vrot.slane %v3948_v24, 1  ;;  %v4073_v7 = vrot.slane %v3949_v49, 1  ;;  %v3762_v35 = vsel %vm954_vm4, %v3760_v10, %v3761_v25  ;;  %v8767_v10 = vpop.f32.mrf.mxu1 }
 0x274   : > { %v4141_v18 = vadd.f32 %v4071_v50, %v3897_v42  ;;  %v2755_v61 = vmul.f32 %v7309_v33, %v8447_v32  ;;  %v2838_v48 = vmul.f32 %v7315_v29, %v8427_v54  ;;  %v4316_v37 = vrot.slane %v4192_v38, 2 }
 0x275   : > { %v3586_v5 = vadd.f32 %v3518_v34, %v3342_v26  ;;  %v4317_v20 = vrot.slane %v8734_v27, 2  ;;  %v3082_v16 = vmul.f32 %v7318_v63, %v8427_v54  ;;  %v4074_v21 = vsel %vm709_vm3, %v4072_v31, %v4073_v7 }
 0x276   : > { %v4385_v6 = vadd.f32 %v4315_v43, %v4141_v18  ;;  %v2963_v9 = vrot.slane %v2838_v48, 1  ;;  %v3394_v55 = vmul.f32 %v7329_v39, %v8374_v53  ;;  %v3311_v50 = vmul.f32 %v7326_v22, %v8401_v51 }
 0x277   : > { %v3830_v32 = vadd.f32 %v3762_v35, %v3586_v5  ;;  %v3207_v2 = vrot.slane %v3082_v16, 2  ;;  %v3638_v60 = vmul.f32 %v7332_v30, %v8374_v53  ;;  %v3950_v58 = vmul.f32 %v7432_v13, %v8522_v3 }
 0x278   : > { %5468 = vmatmul.mubr.msk.f32.gmra.mxu1 %vm2544_vm5, %v4385_v6  ;;  %v2964_v28 = vsel %vm709_vm3, %v2961_v8, %v2963_v9  ;;  %v3519_v54 = vrot.slane %v3394_v55, 1  ;;  %v4194_v41 = vmul.f32 %v7435_v14, %v8522_v3  ;;  %v4318_v52 = vsel %vm954_vm4, %v4316_v37, %v4317_v20 }
 0x279   : > { %v3898_v15 = vadd.f32 %v3866_v40, %v3830_v32  ;;  %v3031_v43 = vadd.f32 %v2964_v28, %v2755_v61  ;;  %v3763_v17 = vrot.slane %v3638_v60, 2  ;;  %v3208_v19 = vsel %vm954_vm4, %v3205_v44, %v3207_v2  ;;  %v8783_v61 = vpop.f32.mrf.mxu1 }
 0x27a   : > { %v3520_v4 = vsel %vm709_vm3, %v3517_v12, %v3519_v54  ;;  %v3867_v8 = vmul.f32 %v7376_v47, %v8539_v0  ;;  %v4075_v23 = vrot.slane %v3950_v58, 1  ;;  %v4319_v24 = vrot.slane %v4194_v41, 2 }
 0x27b   : > { %v4142_v1 = vadd.f32 %v4074_v21, %v3898_v15  ;;  %v3275_v56 = vadd.f32 %v3208_v19, %v3031_v43  ;;  %v2839_v49 = vmul.f32 %v7315_v29, %v8399_v59  ;;  %v3764_v42 = vsel %vm954_vm4, %v3761_v25, %v3763_v17  ;;  %v5436_v9 = vpop.f32.mrf.mxu1 }
 0x27c   : > { %v2756_v40 = vmul.f32 %v7309_v33, %v8399_v59  ;;  %v2840_v44 = vmul.f32 %v7315_v29, %v8401_v51  ;;  %v3083_v12 = vmul.f32 %v7318_v63, %v8399_v59  ;;  %v3084_v34 = vmul.f32 %v7318_v63, %v8401_v51 }
 0x27d   : > { %v4386_v38 = vadd.f32 %v4318_v52, %v4142_v1  ;;  %v3343_v27 = vadd.f32 %v3311_v50, %v3275_v56  ;;  %v2965_v26 = vrot.slane %v2839_v49, 1  ;;  %v4076_v31 = vsel %vm709_vm3, %v4073_v7, %v4075_v23  ;;  %v4580_v23 = vpop.f32.mrf.mxu1 }
 0x27e   : > { %v2966_v18 = vrot.slane %v2840_v44, 1  ;;  %v3209_v35 = vrot.slane %v3083_v12, 2  ;;  %v3395_v25 = vmul.f32 %v7329_v39, %v8537_v36  ;;  %v3210_v5 = vrot.slane %v3084_v34, 2 }
 0x27f   : > { %5470 = vmatprep.mubr.msk.f32.mxu1 %vm2544_vm5, %v4386_v38  ;;  %v3587_v48 = vadd.f32 %v3520_v4, %v3343_v27  ;;  %v3396_v59 = vmul.f32 %v7329_v39, %v8539_v0  ;;  %v3639_v37 = vmul.f32 %v7332_v30, %v8537_v36  ;;  %v3312_v7 = vmul.f32 %v7326_v22, %v8537_v36 }
 0x280   : > { %v2967_v16 = vsel %vm709_vm3, %v2965_v26, %v2966_v18  ;;  %v3521_v6 = vrot.slane %v3395_v25, 1  ;;  %v8795_v21 = vmul.f32 %v7332_v30, %v8539_v0  ;;  %v3211_v2 = vsel %vm954_vm4, %v3209_v35, %v3210_v5 }
 0x281   : > { %v3831_v55 = vadd.f32 %v3764_v42, %v3587_v48  ;;  %v3032_v32 = vadd.f32 %v2967_v16, %v2756_v40  ;;  %v3522_v50 = vrot.slane %v3396_v59, 1  ;;  %v3765_v60 = vrot.slane %v3639_v37, 2 }
 0x282   : > { %v3766_v28 = vrot.slane %v8795_v21, 2  ;;  %v3951_v54 = vmul.f32 %v7432_v13, %v8194_v62  ;;  %v8803_v36 = vmul.f32 %v7432_v13, %v8196_v46  ;;  %v4320_v41 = vsel %vm954_vm4, %v4317_v20, %v4319_v24 }
 0x283   : > { %v3899_v58 = vadd.f32 %v3867_v8, %v3831_v55  ;;  %v3276_v15 = vadd.f32 %v3211_v2, %v3032_v32  ;;  %v4195_v52 = vmul.f32 %v7435_v14, %v8194_v62  ;;  %v3523_v43 = vsel %vm709_vm3, %v3521_v6, %v3522_v50  ;;  %v4839_v32 = vld [vmem:[#allocation3 + $0x1] ss:$2 sm:$0xff] }
 0x284   : > { %v3767_v17 = vsel %vm954_vm4, %v3765_v60, %v3766_v28  ;;  %v3868_v19 = vmul.f32 %v7376_v47, %v8194_v62  ;;  %v8814_v4 = vmul.f32 %v7435_v14, %v8196_v46  ;;  %v4077_v56 = vrot.slane %v3951_v54, 1 }
 0x285   : > { %v4143_v1 = vadd.f32 %v4076_v31, %v3899_v58  ;;  %v3344_v8 = vadd.f32 %v3312_v7, %v3276_v15  ;;  %v4078_v20 = vrot.slane %v8803_v36, 1  ;;  %v4321_v24 = vrot.slane %v4195_v52, 2  ;;  %v5439_v31 = vpop.f32.mrf.mxu1  ;;  %v4890_v15 = vld [vmem:[#allocation3 + $0x2] ss:$2 sm:$0xff] }
 0x286   : > { %v2757_v49 = vmul.f32 %v7309_v33, %v8401_v51  ;;  %v2841_v42 = vmul.f32 %v7315_v29, %v8374_v53  ;;  %v3085_v62 = vmul.f32 %v7318_v63, %v8374_v53  ;;  %v4322_v12 = vrot.slane %v8814_v4, 2  ;;  %v8832_v29 = vld [vmem:[%s9015_s6] ss:$0 sm:$0xff] }
 0x287   : > { %v4387_v40 = vadd.f32 %v4320_v41, %v4143_v1  ;;  %v3588_v44 = vadd.f32 %v3523_v43, %v3344_v8  ;;  %v3397_v38 = vmul.f32 %v7329_v39, %v8522_v3  ;;  %v3641_v34 = vmul.f32 %v7332_v30, %v8522_v3  ;;  %v4590_v16 = vpop.f32.mrf.mxu1  ;;  %v5480_v41 = vpop.f32.mrf.mxu0 }
 0x288   : > { %v2968_v27 = vrot.slane %v2841_v42, 1  ;;  %v3212_v26 = vrot.slane %v3085_v62, 2  ;;  %v4079_v63 = vsel %vm709_vm3, %v4077_v56, %v4078_v20  ;;  %v4323_v30 = vsel %vm954_vm4, %v4321_v24, %v4322_v12 }
 0x289   : > { %5471 = vmatmul.mubr.msk.f32.gmra.mxu1 %vm2544_vm5, %v4387_v40  ;;  %v3832_v33 = vadd.f32 %v3767_v17, %v3588_v44  ;;  %v3524_v51 = vrot.slane %v3397_v38, 1  ;;  %v3313_v25 = vmul.f32 %v7326_v22, %v8539_v0  ;;  %v3768_v48 = vrot.slane %v3641_v34, 2  ;;  %v5072_v62 = vpop.f32.mrf.mxu0 }
 0x28a   : > { %v2969_v39 = vsel %vm709_vm3, %v2966_v18, %v2968_v27  ;;  %v3213_v53 = vsel %vm954_vm4, %v3210_v5, %v3212_v26  ;;  %v3953_v59 = vmul.f32 %v7432_v13, %v8235_v45  ;;  %v4566_v37 = vadd.f32 %v8742_v11, %v8832_v29 }
 0x28b   : > { %v3900_v35 = vadd.f32 %v3868_v19, %v3832_v33  ;;  %v3033_v3 = vadd.f32 %v2969_v39, %v2757_v49  ;;  %v4561_v18 = vadd.f32 %v8832_v29, %v8760_v57  ;;  %v4197_v6 = vmul.f32 %v7435_v14, %v8235_v45 }
 0x28c   : > { %v4576_v21 = vadd.f32 %v8767_v10, %v8832_v29  ;;  %v3525_v22 = vsel %vm709_vm3, %v3522_v50, %v3524_v51  ;;  %4774 = vst.msk [vmem:[#allocation3 + $0x21] sm:$0xff] %vm2544_vm5, %v4566_v37  ;;  %v4571_v13 = vadd.f32 %v8832_v29, %v8783_v61  ;;  %v4586_v0 = vadd.f32 %v5436_v9, %v8832_v29  ;;  %v4805_v10 = vld [vmem:[#allocation3] ss:$2 sm:$0xff] }
 0x28d   : > { %v4144_v5 = vadd.f32 %v4079_v63, %v3900_v35  ;;  %v3277_v7 = vadd.f32 %v3213_v53, %v3033_v3  ;;  %4773 = vst.msk [vmem:[#allocation3 + $0x19] sm:$0xff] %vm2544_vm5, %v4561_v18  ;;  %v4581_v11 = vadd.f32 %v8832_v29, %v4580_v23  ;;  %v4596_v14 = vadd.f32 %v5439_v31, %v8832_v29  ;;  %v8881_v23 = vld [vmem:[%s9017_s8] ss:$0 sm:$0xff] }
 0x28e   : > { %4776 = vst.msk [vmem:[#allocation3 + $0x39] sm:$0xff] %vm2544_vm5, %v4576_v21  ;;  %v4591_v45 = vadd.f32 %v8832_v29, %v4590_v16  ;;  %v3769_v2 = vsel %vm954_vm4, %v3766_v28, %v3768_v48  ;;  %v4080_v50 = vrot.slane %v3953_v59, 1  ;;  %4775 = vst.msk [vmem:[#allocation3 + $0x31] sm:$0xff] %vm2544_vm5, %v4571_v13  ;;  %v3869_v9 = vmul.f32 %v7376_v47, %v8196_v46 }
 0x28f   : > { %v4388_v57 = vadd.f32 %v4323_v30, %v4144_v5  ;;  %v3345_v55 = vadd.f32 %v3313_v25, %v3277_v7  ;;  %4778 = vst.msk [vmem:[#allocation3 + $0x51] sm:$0xff] %vm2544_vm5, %v4586_v0  ;;  %4777 = vst.msk [vmem:[#allocation3 + $0x49] sm:$0xff] %vm2544_vm5, %v4581_v11  ;;  %v4324_v60 = vrot.slane %v4197_v6, 2  ;;  %v4872_v28 = vmax.f32 %v4805_v10, %v4839_v32  ;;  %v5483_v11 = vpop.f32.mrf.mxu0 }
 0x290   : > { %4780 = vst.msk [vmem:[#allocation3 + $0x69] sm:$0xff] %vm2544_vm5, %v4596_v14  ;;  %4779 = vst.msk [vmem:[#allocation3 + $0x61] sm:$0xff] %vm2544_vm5, %v4591_v45  ;;  %v4081_v52 = vsel %vm709_vm3, %v4078_v20, %v4080_v50  ;;  %v5073_v35 = vadd.f32 %v8881_v23, %v5072_v62  ;;  %v5078_v59 = vadd.f32 %v5480_v41, %v8881_v23 }
 0x291   : > { %5473 = vmatprep.mubr.msk.f32.mxu1 %vm2544_vm5, %v4388_v57  ;;  %v3589_v61 = vadd.f32 %v3525_v22, %v3345_v55  ;;  %v4325_v4 = vsel %vm954_vm4, %v4322_v12, %v4324_v60  ;;  %v4923_v56 = vmax.f32 %v4872_v28, %v4890_v15  ;;  %v5082_v10 = vpop.f32.mrf.mxu0  ;;  %v5088_v62 = vadd.f32 %v5483_v11, %v8881_v23 }
 0x293   : > { %v3833_v54 = vadd.f32 %v3769_v2, %v3589_v61  ;;  %v5442_v58 = vpop.f32.mrf.mxu1 }
 0x294   : > { %v4606_v43 = vadd.f32 %v5442_v58, %v8832_v29  ;;  %v4807_v47 = vld [vmem:[#allocation3 + $0x18] ss:$2 sm:$0xff]  ;;  %v4841_v46 = vld [vmem:[#allocation3 + $0x19] ss:$2 sm:$0xff] }
 0x295   : > { %v3901_v17 = vadd.f32 %v3869_v9, %v3833_v54  ;;  %v4600_v19 = vpop.f32.mrf.mxu1  ;;  %v4873_v1 = vmax.f32 %v4807_v47, %v4841_v46  ;;  %v4892_v8 = vld [vmem:[#allocation3 + $0x1a] ss:$2 sm:$0xff]  ;;  %v4843_v42 = vld [vmem:[#allocation3 + $0x31] ss:$2 sm:$0xff]  ;;  %v5083_v9 = vadd.f32 %v8881_v23, %v5082_v10 }
 0x296   : > { %4782 = vst.msk [vmem:[#allocation3 + $0x81] sm:$0xff] %vm2544_vm5, %v4606_v43  ;;  %v4601_v36 = vadd.f32 %v8832_v29, %v4600_v19  ;;  %v4809_v24 = vld [vmem:[#allocation3 + $0x30] ss:$2 sm:$0xff]  ;;  %v4845_v44 = vld [vmem:[#allocation3 + $0x49] ss:$2 sm:$0xff] }
 0x297   : > { %v4145_v20 = vadd.f32 %v4081_v52, %v3901_v17  ;;  %v4811_v49 = vld [vmem:[#allocation3 + $0x48] ss:$2 sm:$0xff]  ;;  %v4847_v12 = vld [vmem:[#allocation3 + $0x61] ss:$2 sm:$0xff]  ;;  %v4874_v38 = vmax.f32 %v4809_v24, %v4843_v42  ;;  %v4924_v27 = vmax.f32 %v4873_v1, %v4892_v8 }
 0x298   : > { %v4813_v40 = vld [vmem:[#allocation3 + $0x60] ss:$2 sm:$0xff]  ;;  %4781 = vst.msk [vmem:[#allocation3 + $0x79] sm:$0xff] %vm2544_vm5, %v4601_v36  ;;  %v4875_v34 = vmax.f32 %v4811_v49, %v4845_v44 }
 0x299   : > { %v4389_v26 = vadd.f32 %v4325_v4, %v4145_v20  ;;  %v4876_v31 = vmax.f32 %v4813_v40, %v4847_v12  ;;  %v4894_v33 = vld [vmem:[#allocation3 + $0x32] ss:$2 sm:$0xff]  ;;  %v4898_v39 = vld [vmem:[#allocation3 + $0x62] ss:$2 sm:$0xff]  ;;  %v4940_v51 = vmax.f32 %v4923_v56, %v4924_v27 }
 0x29a   : > { %v4896_v63 = vld [vmem:[#allocation3 + $0x4a] ss:$2 sm:$0xff]  ;;  %v4925_v53 = vmax.f32 %v4874_v38, %v4894_v33 }
 0x29b   : > { %5474 = vmatmul.mubr.msk.f32.gmra.mxu1 %vm2544_vm5, %v4389_v26  ;;  %v4926_v30 = vmax.f32 %v4875_v34, %v4896_v63  ;;  %v4927_v3 = vmax.f32 %v4876_v31, %v4898_v39 }
 0x29c   : > { %v4948_v25 = vmax.f32 %v4940_v51, %v4925_v53 }
 0x29d   : > { %v4941_v48 = vmax.f32 %v4925_v53, %v4926_v30 }
 0x29e   : > { %v5111_v37 = vadd.f32 %v5073_v35, %v4948_v25 }
 0x29f   : > { %v4949_v18 = vmax.f32 %v4941_v48, %v4927_v3  ;;  %v4815_v22 = vld [vmem:[#allocation3 + $0x78] ss:$2 sm:$0xff]  ;;  %v4849_v13 = vld [vmem:[#allocation3 + $0x79] ss:$2 sm:$0xff] }
 0x2a0   : > { %5119 = vst.msk [vmem:[%s8890_s21] sm:$0xff] %vm2544_vm5, %v5111_v37  ;;  %v4877_v0 = vmax.f32 %v4815_v22, %v4849_v13  ;;  %v4900_v57 = vld [vmem:[#allocation3 + $0x7a] ss:$2 sm:$0xff] }
 0x2a1   : > { %v5112_v16 = vadd.f32 %v5078_v59, %v4949_v18 }
 0x2a2   : > { %v4928_v55 = vmax.f32 %v4877_v0, %v4900_v57 }
 0x2a3   : > { %5120 = vst.msk [vmem:[%s8890_s21 + $0x8] sm:$0xff] %vm2544_vm5, %v5112_v16 }
 0x2a4   : > { %v4942_v61 = vmax.f32 %v4927_v3, %v4928_v55 }
 0x2a6   : > { %v5445_v5 = vpop.f32.mrf.mxu1 }
 0x2a7   : > { %v4616_v7 = vadd.f32 %v5445_v5, %v8832_v29  ;;  %v5486_v35 = vpop.f32.mrf.mxu0 }
 0x2a8   : > { %v4610_v6 = vpop.f32.mrf.mxu1 }
 0x2a9   : > { %4784 = vst.msk [vmem:[#allocation3 + $0x99] sm:$0xff] %vm2544_vm5, %v4616_v7  ;;  %v4611_v21 = vadd.f32 %v8832_v29, %v4610_v6  ;;  %v5092_v59 = vpop.f32.mrf.mxu0 }
 0x2aa   : > { %v5093_v7 = vadd.f32 %v8881_v23, %v5092_v59 }
 0x2ab   : > { %4783 = vst.msk [vmem:[#allocation3 + $0x91] sm:$0xff] %vm2544_vm5, %v4611_v21 }
 0x2b2   : > { %v4817_v14 = vld [vmem:[#allocation3 + $0x90] ss:$2 sm:$0xff]  ;;  %v4851_v45 = vld [vmem:[#allocation3 + $0x91] ss:$2 sm:$0xff] }
 0x2b3   : > { %v4878_v32 = vmax.f32 %v4817_v14, %v4851_v45  ;;  %v4902_v2 = vld [vmem:[#allocation3 + $0x92] ss:$2 sm:$0xff] }
 0x2b5   : > { %v4929_v50 = vmax.f32 %v4878_v32, %v4902_v2 }
 0x2b7   : > { %v4950_v60 = vmax.f32 %v4942_v61, %v4929_v50 }
 0x2b8   : > { %v5448_v28 = vpop.f32.mrf.mxu1 }
 0x2b9   : > { %v4626_v54 = vadd.f32 %v5448_v28, %v8832_v29  ;;  %v5113_v58 = vadd.f32 %v5083_v9, %v4950_v60 }
 0x2ba   : > { %v4620_v41 = vpop.f32.mrf.mxu1 }
 0x2bb   : > { %4786 = vst.msk [vmem:[#allocation3 + $0xb1] sm:$0xff] %vm2544_vm5, %v4626_v54  ;;  %v4621_v15 = vadd.f32 %v8832_v29, %v4620_v41  ;;  %5121 = vst.msk [vmem:[%s8890_s21 + $0x10] sm:$0xff] %vm2544_vm5, %v5113_v58 }
 0x2bd   : > { %4785 = vst.msk [vmem:[#allocation3 + $0xa9] sm:$0xff] %vm2544_vm5, %v4621_v15  ;;  %v5098_v15 = vadd.f32 %v5486_v35, %v8881_v23 }
 0x2c4   : > { %v4819_v47 = vld [vmem:[#allocation3 + $0xa8] ss:$2 sm:$0xff]  ;;  %v4853_v46 = vld [vmem:[#allocation3 + $0xa9] ss:$2 sm:$0xff] }
 0x2c5   : > { %v4879_v4 = vmax.f32 %v4819_v47, %v4853_v46  ;;  %v4904_v36 = vld [vmem:[#allocation3 + $0xaa] ss:$2 sm:$0xff] }
 0x2c7   : > { %v4930_v1 = vmax.f32 %v4879_v4, %v4904_v36 }
 0x2c9   : > { %v4943_v42 = vmax.f32 %v4929_v50, %v4930_v1 }
 0x2cb   : > { %v5451_v52 = vpop.f32.mrf.mxu1 }
 0x2cc   : > { %v4636_v43 = vadd.f32 %v5451_v52, %v8832_v29 }
 0x2cd   : > { %v4630_v17 = vpop.f32.mrf.mxu1 }
 0x2ce   : > { %4788 = vst.msk [vmem:[#allocation3 + $0xc9] sm:$0xff] %vm2544_vm5, %v4636_v43  ;;  %v4631_v19 = vadd.f32 %v8832_v29, %v4630_v17 }
 0x2d0   : > { %4787 = vst.msk [vmem:[#allocation3 + $0xc1] sm:$0xff] %vm2544_vm5, %v4631_v19 }
 0x2d7   : > { %v4821_v8 = vld [vmem:[#allocation3 + $0xc0] ss:$2 sm:$0xff]  ;;  %v4855_v56 = vld [vmem:[#allocation3 + $0xc1] ss:$2 sm:$0xff] }
 0x2d8   : > { %v4880_v20 = vmax.f32 %v4821_v8, %v4855_v56  ;;  %v4906_v24 = vld [vmem:[#allocation3 + $0xc2] ss:$2 sm:$0xff] }
 0x2da   : > { %v4931_v49 = vmax.f32 %v4880_v20, %v4906_v24 }
 0x2dc   : > { %v4951_v40 = vmax.f32 %v4943_v42, %v4931_v49 }
 0x2dd   : > { %v5454_v44 = vpop.f32.mrf.mxu1 }
 0x2de   : > { %v4646_v12 = vadd.f32 %v5454_v44, %v8832_v29  ;;  %v5114_v38 = vadd.f32 %v5088_v62, %v4951_v40 }
 0x2df   : > { %v4640_v27 = vpop.f32.mrf.mxu1 }
 0x2e0   : > { %4790 = vst.msk [vmem:[#allocation3 + $0xe1] sm:$0xff] %vm2544_vm5, %v4646_v12  ;;  %v4641_v26 = vadd.f32 %v8832_v29, %v4640_v27  ;;  %5122 = vst.msk [vmem:[%s8890_s21 + $0x18] sm:$0xff] %vm2544_vm5, %v5114_v38 }
 0x2e2   : > { %4789 = vst.msk [vmem:[#allocation3 + $0xd9] sm:$0xff] %vm2544_vm5, %v4641_v26 }
 0x2e9   : > { %v4823_v39 = vld [vmem:[#allocation3 + $0xd8] ss:$2 sm:$0xff]  ;;  %v4857_v53 = vld [vmem:[#allocation3 + $0xd9] ss:$2 sm:$0xff] }
 0x2ea   : > { %v4881_v51 = vmax.f32 %v4823_v39, %v4857_v53  ;;  %v4908_v30 = vld [vmem:[#allocation3 + $0xda] ss:$2 sm:$0xff] }
 0x2ec   : > { %v4932_v3 = vmax.f32 %v4881_v51, %v4908_v30 }
 0x2ee   : > { %v4944_v5 = vmax.f32 %v4931_v49, %v4932_v3  ;;  %v5489_v49 = vpop.f32.mrf.mxu0 }
 0x2f0   : > { %v5457_v34 = vpop.f32.mrf.mxu1  ;;  %v5102_v12 = vpop.f32.mrf.mxu0 }
 0x2f1   : > { %v4656_v31 = vadd.f32 %v5457_v34, %v8832_v29 }
 0x2f2   : > { %v4650_v33 = vpop.f32.mrf.mxu1 }
 0x2f3   : > { %4792 = vst.msk [vmem:[#allocation3 + $0xf9] sm:$0xff] %vm2544_vm5, %v4656_v31  ;;  %v4651_v63 = vadd.f32 %v8832_v29, %v4650_v33  ;;  %v5103_v31 = vadd.f32 %v8881_v23, %v5102_v12 }
 0x2f5   : > { %4791 = vst.msk [vmem:[#allocation3 + $0xf1] sm:$0xff] %vm2544_vm5, %v4651_v63 }
 0x2fc   : > { %v4825_v25 = vld [vmem:[#allocation3 + $0xf0] ss:$2 sm:$0xff]  ;;  %v4859_v48 = vld [vmem:[#allocation3 + $0xf1] ss:$2 sm:$0xff] }
 0x2fd   : > { %v4882_v37 = vmax.f32 %v4825_v25, %v4859_v48  ;;  %v4910_v18 = vld [vmem:[#allocation3 + $0xf2] ss:$2 sm:$0xff] }
 0x2ff   : > { %v4933_v16 = vmax.f32 %v4882_v37, %v4910_v18 }
 0x301   : > { %v4952_v6 = vmax.f32 %v4944_v5, %v4933_v16 }
 0x302   : > { %v5460_v21 = vpop.f32.mrf.mxu1 }
 0x303   : > { %v4666_v22 = vadd.f32 %v5460_v21, %v8832_v29  ;;  %v5115_v13 = vadd.f32 %v5093_v7, %v4952_v6 }
 0x304   : > { %v4660_v0 = vpop.f32.mrf.mxu1 }
 0x305   : > { %4794 = vst.msk [vmem:[#allocation3 + $0x111] sm:$0xff] %vm2544_vm5, %v4666_v22  ;;  %v4661_v11 = vadd.f32 %v8832_v29, %v4660_v0  ;;  %5123 = vst.msk [vmem:[%s8890_s21 + $0x20] sm:$0xff] %vm2544_vm5, %v5115_v13 }
 0x307   : > { %4793 = vst.msk [vmem:[#allocation3 + $0x109] sm:$0xff] %vm2544_vm5, %v4661_v11 }
 0x30e   : > { %v4827_v10 = vld [vmem:[#allocation3 + $0x108] ss:$2 sm:$0xff]  ;;  %v4861_v32 = vld [vmem:[#allocation3 + $0x109] ss:$2 sm:$0xff] }
 0x30f   : > { %v4883_v2 = vmax.f32 %v4827_v10, %v4861_v32  ;;  %v4912_v50 = vld [vmem:[#allocation3 + $0x10a] ss:$2 sm:$0xff] }
 0x311   : > { %v4934_v61 = vmax.f32 %v4883_v2, %v4912_v50 }
 0x313   : > { %v4945_v41 = vmax.f32 %v4933_v16, %v4934_v61 }
 0x315   : > { %v5463_v57 = vpop.f32.mrf.mxu1 }
 0x316   : > { %v4676_v55 = vadd.f32 %v5463_v57, %v8832_v29 }
 0x317   : > { %v4670_v14 = vpop.f32.mrf.mxu1 }
 0x318   : > { %4796 = vst.msk [vmem:[#allocation3 + $0x129] sm:$0xff] %vm2544_vm5, %v4676_v55  ;;  %v4671_v45 = vadd.f32 %v8832_v29, %v4670_v14 }
 0x31a   : > { %4795 = vst.msk [vmem:[#allocation3 + $0x121] sm:$0xff] %vm2544_vm5, %v4671_v45 }
 0x321   : > { %v4829_v9 = vld [vmem:[#allocation3 + $0x120] ss:$2 sm:$0xff]  ;;  %v4863_v60 = vld [vmem:[#allocation3 + $0x121] ss:$2 sm:$0xff] }
 0x322   : > { %v4884_v28 = vmax.f32 %v4829_v9, %v4863_v60  ;;  %v4914_v54 = vld [vmem:[#allocation3 + $0x122] ss:$2 sm:$0xff] }
 0x324   : > { %v4935_v58 = vmax.f32 %v4884_v28, %v4914_v54 }
 0x326   : > { %v5466_v52 = vpop.f32.mrf.mxu1  ;;  %v4953_v43 = vmax.f32 %v4945_v41, %v4935_v58 }
 0x327   : > { %v4686_v17 = vadd.f32 %v5466_v52, %v8832_v29 }
 0x328   : > { %v4680_v19 = vpop.f32.mrf.mxu1  ;;  %v5116_v47 = vadd.f32 %v5098_v15, %v4953_v43 }
 0x329   : > { %4798 = vst.msk [vmem:[#allocation3 + $0x141] sm:$0xff] %vm2544_vm5, %v4686_v17  ;;  %v4681_v46 = vadd.f32 %v8832_v29, %v4680_v19 }
 0x32a   : > { %5124 = vst.msk [vmem:[%s8890_s21 + $0x28] sm:$0xff] %vm2544_vm5, %v5116_v47 }
 0x32b   : > { %4797 = vst.msk [vmem:[#allocation3 + $0x139] sm:$0xff] %vm2544_vm5, %v4681_v46 }
 0x332   : > { %v4831_v56 = vld [vmem:[#allocation3 + $0x138] ss:$2 sm:$0xff]  ;;  %v4865_v20 = vld [vmem:[#allocation3 + $0x139] ss:$2 sm:$0xff] }
 0x333   : > { %v4885_v24 = vmax.f32 %v4831_v56, %v4865_v20  ;;  %v4916_v42 = vld [vmem:[#allocation3 + $0x13a] ss:$2 sm:$0xff] }
 0x335   : > { %v4936_v62 = vmax.f32 %v4885_v24, %v4916_v42 }
 0x337   : > { %v4946_v34 = vmax.f32 %v4935_v58, %v4936_v62 }
 0x338   : > { %v5469_v4 = vpop.f32.mrf.mxu1 }
 0x339   : > { %v4696_v36 = vadd.f32 %v5469_v4, %v8832_v29 }
 0x33a   : > { %v4690_v1 = vpop.f32.mrf.mxu1 }
 0x33b   : > { %4800 = vst.msk [vmem:[#allocation3 + $0x159] sm:$0xff] %vm2544_vm5, %v4696_v36  ;;  %v4691_v8 = vadd.f32 %v8832_v29, %v4690_v1 }
 0x33d   : > { %4799 = vst.msk [vmem:[#allocation3 + $0x151] sm:$0xff] %vm2544_vm5, %v4691_v8 }
 0x344   : > { %v4833_v40 = vld [vmem:[#allocation3 + $0x150] ss:$2 sm:$0xff]  ;;  %v4867_v44 = vld [vmem:[#allocation3 + $0x151] ss:$2 sm:$0xff] }
 0x345   : > { %v4886_v38 = vmax.f32 %v4833_v40, %v4867_v44  ;;  %v4918_v27 = vld [vmem:[#allocation3 + $0x152] ss:$2 sm:$0xff] }
 0x347   : > { %v4937_v26 = vmax.f32 %v4886_v38, %v4918_v27 }
 0x349   : > { %v5472_v33 = vpop.f32.mrf.mxu1  ;;  %v4954_v63 = vmax.f32 %v4946_v34, %v4937_v26 }
 0x34a   : > { %v4706_v39 = vadd.f32 %v5472_v33, %v8832_v29 }
 0x34b   : > { %v4700_v53 = vpop.f32.mrf.mxu1  ;;  %v5117_v51 = vadd.f32 %v5103_v31, %v4954_v63 }
 0x34c   : > { %4802 = vst.msk [vmem:[#allocation3 + $0x171] sm:$0xff] %vm2544_vm5, %v4706_v39  ;;  %v4701_v35 = vadd.f32 %v8832_v29, %v4700_v53 }
 0x34d   : > { %5125 = vst.msk [vmem:[%s8890_s21 + $0x30] sm:$0xff] %vm2544_vm5, %v5117_v51 }
 0x34e   : > { %4801 = vst.msk [vmem:[#allocation3 + $0x169] sm:$0xff] %vm2544_vm5, %v4701_v35 }
 0x355   : > { %v4835_v59 = vld [vmem:[#allocation3 + $0x168] ss:$2 sm:$0xff]  ;;  %v4869_v37 = vld [vmem:[#allocation3 + $0x169] ss:$2 sm:$0xff] }
 0x356   : > { %v4887_v18 = vmax.f32 %v4835_v59, %v4869_v37  ;;  %v4920_v16 = vld [vmem:[#allocation3 + $0x16a] ss:$2 sm:$0xff] }
 0x358   : > { %v4938_v5 = vmax.f32 %v4887_v18, %v4920_v16 }
 0x35a   : > { %v4947_v0 = vmax.f32 %v4937_v26, %v4938_v5 }
 0x35b   : > { %v5475_v30 = vpop.f32.mrf.mxu1 }
 0x35c   : > { %v4716_v3 = vadd.f32 %v5475_v30, %v8832_v29 }
 0x35d   : > { %v4710_v25 = vpop.f32.mrf.mxu1 }
 0x35e   : > { %4804 = vst.msk [vmem:[#allocation3 + $0x189] sm:$0xff] %vm2544_vm5, %v4716_v3  ;;  %v4711_v48 = vadd.f32 %v8832_v29, %v4710_v25  ;;  %v5108_v29 = vadd.f32 %v5489_v49, %v8881_v23 }
 0x360   : > { %4803 = vst.msk [vmem:[#allocation3 + $0x181] sm:$0xff] %vm2544_vm5, %v4711_v48 }
 0x367   : > { %v4837_v7 = vld [vmem:[#allocation3 + $0x180] ss:$2 sm:$0xff]  ;;  %v4871_v6 = vld [vmem:[#allocation3 + $0x181] ss:$2 sm:$0xff] }
 0x368   : > { %v4888_v21 = vmax.f32 %v4837_v7, %v4871_v6  ;;  %v4922_v22 = vld [vmem:[#allocation3 + $0x182] ss:$2 sm:$0xff] }
 0x36a   : > { %v4939_v13 = vmax.f32 %v4888_v21, %v4922_v22 }
 0x36c   : > { %v4955_v11 = vmax.f32 %v4947_v0, %v4939_v13 }
 0x36e   : > { %v5118_v57 = vadd.f32 %v5108_v29, %v4955_v11 }
 0x370   : > { %5126 = vst.msk [vmem:[%s8890_s21 + $0x38] sm:$0xff] %vm2544_vm5, %v5118_v57 }
 0x371   : > { %5550 = shalt.err (!%p5547_p3)
}
 0x372   : > { %s5551_s28 = scalar_lea.hbm %s8961_s25, 1024  ;;  %s5555_s22 = scalar_lea.hbm %s9018_s9, 2048 }
 0x373   : > { %p5552_p4 = scmp.ne.s32.totalorder %s8961_s25, %s5551_s28  ;;  %p5556_p9 = scmp.lt.s32.totalorder %s8961_s25, %s9018_s9 }
 0x374   : > { %p5557_p10 = scmp.lt.s32.totalorder %s5555_s22, %s5551_s28 }
 0x375   : > { %p5553_p7 = pnand %p5552_p4, %p5692_p5 }
 0x376   : > { %p5558_p11 = por %p5557_p10, %p5556_p9 }
 0x377   : > { %p5554_p8 = pneg %p5553_p7 }
 0x379   : > { %p5559_p12 = pnand %p5558_p11, %p5554_p8 }
 0x37b   : > { %5562 = shalt.err (!%p5559_p12)
}
 0x37c   : > { %s5602_s13 = smov 128   ;;  %s5603_s27 = smov 8  }
 0x37d   : > { %5492 = dma.vmem_to_hbm [thread:$0]  (%p5692_p5), %s8963_s23, 1024, %s8961_s25, %s8969_s26, %s5602_s13, %s5602_s13, %s5603_s27  }
 0x37e PF: > { %p5498_p13 = scmp.ge.s32.totalorder %s5597_s12, 2  ;;  %s5156_s29 = sand.u32 1, %s5585_s30  }
 0x37f   : > { %s5157_s14 = scalar_lea.sflag [#allocation5], %s5156_s29 }
 0x380   : > { %p5495_p0 = pnand %p5498_p13, %p5696_p6 }
 0x382   : > { %p5496_p1 = pneg %p5495_p0 }
 0x384   : > { %5580 = dma.done.wait (%p5496_p1), %s5157_s14, 1024  }
 0x385   : > { %5582 = vsyncadd (%p5496_p1), %s5157_s14, 4294966272  ;;  %p19_p2 = scmp.ge.s32.totalorder %s5679_s15, 4   ;;  %s9028_s30 = smov %s5589_s10 }
 0x386   : > { %s9029_s10 = smov %s5593_s11  ;;  %s9030_s11 = smov %s5690_s18 }
 0x387   : > { %s9031_s12 = smov %s5679_s15  ;;  %21 = sbr.rel (!%p19_p2) target bundleno = 3 (0x3), region = 150 }
 0x38c   :  { %5162 = vsyncpa [#allocation5], 1 }
 0x38d   :  { %5164 = vsyncpa [#allocation5 + $0x1], 1 }

</bundles_post_ra>
